<compile_context>
chip_gen: v7x
topology: tpu7x:2x2x1
jax: 0.10.0
libtpu: 0.0.40
codegen_flags: <defaults>
</compile_context>

<pallas_src>
import functools

import jax
import jax.numpy as jnp
from jax.experimental import pallas as pl
from jax.experimental.pallas import tpu as pltpu

# Architecture constants.
H_IN = 80                      # input spatial size (forced by Linear(32*9*9, 256))
K1, S1, C1 = 4, 4, 16          # conv1: kernel 4, stride 4, 16 out channels
K2, S2, C2 = 4, 2, 32          # conv2: kernel 4, stride 2, 32 out channels
HP = 10                        # conv1 20x20 output -> 2x2 space-to-depth -> 10x10
SP = HP * HP                   # 100 positions per (batch, parity) block
CHUNK = 128                    # positions padded to one full lane tile
NPAR = 4                       # 2x2 space-to-depth parity chunks
H2V = 9                        # valid conv2 output spatial extent (9x9)
FC1 = 256

# --- fragile-coupling guard (see review) -------------------------------------
# Largest tap shift is (kh//2)*10 + (kw//2) = 11 and the largest VALID conv2
# position index is 8*10+8 = 88, so every valid read stays inside its own
# 128-wide chunk (11 + 88 = 99 < 128).  Every other read (chunk padding,
# next-chunk spill, per-tile tail pad) lands on a conv2 output column with
# position >= 89, ALL of which map to zero rows of the repacked fc1 weight.
assert (HP + 1) + ((H2V - 1) * HP + (H2V - 1)) < CHUNK
assert SP <= CHUNK


# ----------------------------------------------------------------------------
# The fused kernel (one batch tile of `tb` examples per grid step)
# ----------------------------------------------------------------------------
def _racing_net_kernel(p1_ref, w1_ref, b1_ref, w2_ref, b2_ref, w3_ref, b3_ref,
                       w4_ref, b4_ref, o_ref, flat_ref, *, tb: int):
    """p1 : (C_in*16, (4*tb+1)*128) bf16  conv1 im2col, columns (parity, b, pos),
                                          pos padded 100->128, +128 tail pad.
    w1  : (16, C_in*16) bf16   conv1 weight, columns (c, kh, kw).
    w2  : (16, 32, 16)  bf16   conv2 weight, one (out,in) slab per tap kh*4+kw.
    w3  : (32*128, 256) bf16   fc1 weight, rows (c, pos); zero rows at every
                               junk / padded position.
    w4  : (256, out)    f32    fc2 weight (tiny, kept in f32).
    """
    bw = tb * CHUNK                                  # width of one parity chunk

    # --- conv1 + ReLU over the whole tile, ONE bf16 cast --------------------
    h1 = jnp.dot(w1_ref[...], p1_ref[...], preferred_element_type=jnp.float32)
    h1 = jnp.maximum(h1 + b1_ref[...], 0.0).astype(jnp.bfloat16)

    # --- conv2 + ReLU as 16 accumulating MXU matmuls (no im2col scratch) ----
    # Tap (kh, kw) is one contiguous slice of h1: parity chunk (kh%2, kw%2)
    # shifted by (kh//2)*10 + (kw//2).  Chunk bases are 128-aligned.
    acc = jnp.zeros((C2, bw), jnp.float32)
    for kh in range(K2):
        for kw in range(K2):
            tap = kh * K2 + kw
            start = ((kh % 2) * 2 + (kw % 2)) * bw + (kh // 2) * HP + (kw // 2)
            acc = acc + jnp.dot(w2_ref[tap], h1[:, start:start + bw],
                                preferred_element_type=jnp.float32)
    h2 = jnp.maximum(acc + b2_ref[...], 0.0).astype(jnp.bfloat16)   # (32, tb*128)

    # --- NCHW flatten: 128-aligned, full-lane-width bf16 copies -------------
    # flat[b, c*128 + s] = h2[c, b*128 + s]; junk columns die on zero w3 rows.
    for b in range(tb):
        for c in range(C2):
            flat_ref[b:b + 1, c * CHUNK:(c + 1) * CHUNK] = (
                h2[c:c + 1, b * CHUNK:(b + 1) * CHUNK])

    # --- fc1 + ReLU: (tb, 4096) @ (4096, 256), bf16 operands, f32 acc -------
    y1 = jnp.dot(flat_ref[...], w3_ref[...], preferred_element_type=jnp.float32)
    y1 = jnp.maximum(y1 + b3_ref[...], 0.0)

    # --- fc2 (tiny, f32) -----------------------------------------------------
    o_ref[...] = (jnp.dot(y1, w4_ref[...], preferred_element_type=jnp.float32)
                  + b4_ref[...])


# ----------------------------------------------------------------------------
# Host-side layout glue (input packing per call, weights once)
# ----------------------------------------------------------------------------
def _pack_input(x: jax.Array, tb: int, nb: int) -> jax.Array:
    """Conv1 im2col (k=4, s=4 is non-overlapping => pure reshape/transpose),
    columns grouped per batch tile as (parity, b_local, pos) with pos padded
    100->128 and a 128-column tail pad per tile (absorbs shifted tap reads)."""
    B, C, H, W = x.shape
    assert H == H_IN and W == H_IN, "RacingNet needs 80x80 input (Linear(32*9*9, 256))"
    k_dim = C * K1 * K1
    b_pad = nb * tb
    # H index = 8*h' + 4*ph + kh ; W index = 8*w' + 4*pw + kw.
    x8 = x.reshape(B, C, HP, 2, K1, HP, 2, K1)               # (b,c,h',ph,kh,w',pw,kw)
    xt = jnp.transpose(x8, (1, 4, 7, 0, 3, 6, 2, 5))         # (c,kh,kw,b,ph,pw,h',w')
    p = xt.reshape(k_dim, B, NPAR, SP)                       # cols (b, parity, pos)
    p = jnp.pad(p, ((0, 0), (0, b_pad - B), (0, 0), (0, CHUNK - SP)))
    p = p.reshape(k_dim, nb, tb, NPAR, CHUNK)
    p = jnp.transpose(p, (0, 1, 3, 2, 4))                    # (k, tile, parity, b, 128)
    p = p.reshape(k_dim, nb, NPAR * tb * CHUNK)
    p = jnp.pad(p, ((0, 0), (0, 0), (0, CHUNK)))             # per-tile tail pad
    return p.reshape(k_dim, nb * (NPAR * tb + 1) * CHUNK).astype(jnp.bfloat16)


def prepare_params(params):
    """One-time repacking of PyTorch-layout parameters into kernel layout."""
    w1, b1, w2, b2, w3, b3, w4, b4 = params
    c_in = w1.shape[1]
    out_dim = w4.shape[0]
    # conv1 (16, C, 4, 4) -> (16, C*16), columns (c, kh, kw).
    w1m = w1.reshape(C1, c_in * K1 * K1).astype(jnp.bfloat16)
    # conv2 (32, 16, 4, 4) -> (16 taps, 32, 16), tap index kh*4 + kw.
    w2t = jnp.transpose(w2, (2, 3, 0, 1)).reshape(K2 * K2, C2, C1).astype(jnp.bfloat16)
    # fc1 (256, 32*9*9) -> (32*128, 256), rows (c, s) with s = H2*10 + W2;
    # zero rows at H2==9, W2==9 and s >= 100 kill every garbage conv2 column.
    w3p = jnp.pad(w3.reshape(FC1, C2, H2V, H2V), ((0, 0), (0, 0), (0, 1), (0, 1)))
    w3p = jnp.pad(w3p.reshape(FC1, C2, SP), ((0, 0), (0, 0), (0, CHUNK - SP)))
    w3p = jnp.transpose(w3p, (1, 2, 0)).reshape(C2 * CHUNK, FC1).astype(jnp.bfloat16)
    # fc2 (out, 256) -> (256, out), f32 (tiny).
    w4m = w4.T.astype(jnp.float32)
    return (w1m, b1.reshape(C1, 1).astype(jnp.float32),
            w2t, b2.reshape(C2, 1).astype(jnp.float32),
            w3p, b3.reshape(1, FC1).astype(jnp.float32),
            w4m, b4.reshape(1, out_dim).astype(jnp.float32))


def racing_net_forward(x: jax.Array, prepared, *, batch_tile: int = 8) -> jax.Array:
    """x: (B, C_in, 80, 80) float32, NCHW like the PyTorch module."""
    w1m, b1, w2t, b2, w3p, b3, w4m, b4 = prepared
    B, C = x.shape[0], x.shape[1]
    out_dim = w4m.shape[1]
    k_dim = C * K1 * K1

    tb = B if B <= batch_tile else batch_tile        # batch elements per grid step
    nb = pl.cdiv(B, tb)
    b_pad = nb * tb
    tile_w = (NPAR * tb + 1) * CHUNK                 # columns per tile (128-multiple)

    p1 = _pack_input(x, tb, nb)                      # (k_dim, nb*tile_w) bf16

    grid_spec = pltpu.PrefetchScalarGridSpec(
        num_scalar_prefetch=0,
        grid=(nb,),
        in_specs=[
            pl.BlockSpec((k_dim, tile_w), lambda i: (0, i)),          # activations
            pl.BlockSpec((C1, k_dim), lambda i: (0, 0)),              # w1
            pl.BlockSpec((C1, 1), lambda i: (0, 0)),                  # b1
            pl.BlockSpec((K2 * K2, C2, C1), lambda i: (0, 0, 0)),     # w2 (per tap)
            pl.BlockSpec((C2, 1), lambda i: (0, 0)),                  # b2
            pl.BlockSpec((C2 * CHUNK, FC1), lambda i: (0, 0)),        # w3
            pl.BlockSpec((1, FC1), lambda i: (0, 0)),                 # b3
            pl.BlockSpec((FC1, out_dim), lambda i: (0, 0)),           # w4
            pl.BlockSpec((1, out_dim), lambda i: (0, 0)),             # b4
        ],
        out_specs=pl.BlockSpec((tb, out_dim), lambda i: (i, 0)),
        scratch_shapes=[pltpu.VMEM((tb, C2 * CHUNK), jnp.bfloat16)],  # bf16 flatten
    )
    out = pl.pallas_call(
        functools.partial(_racing_net_kernel, tb=tb),
        out_shape=jax.ShapeDtypeStruct((b_pad, out_dim), jnp.float32),
        grid_spec=grid_spec,
        compiler_params=pltpu.CompilerParams(
            dimension_semantics=("parallel",),        # megacore over batch tiles
            vmem_limit_bytes=32 * 1024 * 1024,
            allow_input_fusion=[True] + [False] * 8,  # fuse host-side im2col into the call
        ),
    )(p1, w1m, b1, w2t, b2, w3p, b3, w4m, b4)
    return out[:B]


# ----------------------------------------------------------------------------
# Pure-JAX reference (exact PyTorch semantics, f32) and synthetic params
# ----------------------------------------------------------------------------
def _reference_forward(x, params):
    w1, b1, w2, b2, w3, b3, w4, b4 = params
    dn = ("NCHW", "OIHW", "NCHW")
    h = jax.lax.conv_general_dilated(x, w1, (S1, S1), "VALID", dimension_numbers=dn)
    h = jax.nn.relu(h + b1[None, :, None, None])
    h = jax.lax.conv_general_dilated(h, w2, (S2, S2), "VALID", dimension_numbers=dn)
    h = jax.nn.relu(h + b2[None, :, None, None])
    h = h.reshape(h.shape[0], -1)                    # NCHW flatten (nn.Flatten)
    h = jax.nn.relu(h @ w3.T + b3)
    return h @ w4.T + b4


def init_params(key, input_dim: int, output_dim: int):
    """Deterministic synthetic parameters in PyTorch-native shapes."""
    ks = jax.random.split(key, 8)
    s = 0.05
    w1 = jax.random.normal(ks[0], (C1, input_dim, K1, K1), jnp.float32) * s
    b1 = jax.random.normal(ks[1], (C1,), jnp.float32) * s
    w2 = jax.random.normal(ks[2], (C2, C1, K2, K2), jnp.float32) * s
    b2 = jax.random.normal(ks[3], (C2,), jnp.float32) * s
    w3 = jax.random.normal(ks[4], (FC1, C2 * H2V * H2V), jnp.float32) * s
    b3 = jax.random.normal(ks[5], (FC1,), jnp.float32) * s
    w4 = jax.random.normal(ks[6], (output_dim, FC1), jnp.float32) * s
    b4 = jax.random.normal(ks[7], (output_dim,), jnp.float32) * s
    return (w1, b1, w2, b2, w3, b3, w4, b4)


if __name__ == "__main__":
    key = jax.random.PRNGKey(0)
    k_x, k_p = jax.random.split(key)

    B, C_IN, OUT_DIM = 2, 4, 5   # spatial 80x80 is dictated by Linear(32*9*9, 256)
    x = jax.random.normal(k_x, (B, C_IN, H_IN, H_IN), jnp.float32)
    params = init_params(k_p, C_IN, OUT_DIM)
    prepared = prepare_params(params)            # one-time weight repacking

    fwd = jax.jit(racing_net_forward)
    out = jax.block_until_ready(fwd(x, prepared))

    assert out.shape == (B, OUT_DIM), out.shape
    assert out.dtype == jnp.float32
    assert bool(jnp.all(jnp.isfinite(out)))

    # Loose check vs the f32 XLA reference (kernel uses bf16 MXU operands).
    ref = _reference_forward(x, params)
    assert bool(jnp.allclose(out, ref, rtol=5e-2, atol=5e-2)), (out, ref)

    print("KERNEL_OK")
</pallas_src>

<mosaic_0001>
module attributes {stable_mosaic.version = 11 : i64} {
  func.func @_racing_net_kernel(%arg0: i32, %arg1: memref<64x1152xbf16, #tpu.memory_space<vmem>>, %arg2: memref<16x64xbf16, #tpu.memory_space<vmem>>, %arg3: memref<16x1xf32, #tpu.memory_space<vmem>>, %arg4: memref<16x32x16xbf16, #tpu.memory_space<vmem>>, %arg5: memref<32x1xf32, #tpu.memory_space<vmem>>, %arg6: memref<4096x256xbf16, #tpu.memory_space<vmem>>, %arg7: memref<1x256xf32, #tpu.memory_space<vmem>>, %arg8: memref<256x5xf32, #tpu.memory_space<vmem>>, %arg9: memref<1x5xf32, #tpu.memory_space<vmem>>, %arg10: memref<2x5xf32, #tpu.memory_space<vmem>>, %arg11: memref<2x4096xbf16, #tpu.memory_space<vmem>>) attributes {dimension_semantics = [#tpu.dimension_semantics<parallel>], iteration_bounds = array<i64: 1>, scalar_prefetch = 0 : i64, scratch_operands = 1 : i64, tpu.core_type = #tpu.core_type<tc>, window_params = [{transform_indices = @transform_0, window_bounds = array<i64: 64, 1152>}, {pipeline_mode = #tpu.pipeline_mode<synchronous>, transform_indices = @transform_1, window_bounds = array<i64: 16, 64>}, {pipeline_mode = #tpu.pipeline_mode<synchronous>, transform_indices = @transform_2, window_bounds = array<i64: 16, 1>}, {pipeline_mode = #tpu.pipeline_mode<synchronous>, transform_indices = @transform_3, window_bounds = array<i64: 16, 32, 16>}, {pipeline_mode = #tpu.pipeline_mode<synchronous>, transform_indices = @transform_4, window_bounds = array<i64: 32, 1>}, {pipeline_mode = #tpu.pipeline_mode<synchronous>, transform_indices = @transform_5, window_bounds = array<i64: 4096, 256>}, {pipeline_mode = #tpu.pipeline_mode<synchronous>, transform_indices = @transform_6, window_bounds = array<i64: 1, 256>}, {pipeline_mode = #tpu.pipeline_mode<synchronous>, transform_indices = @transform_7, window_bounds = array<i64: 256, 5>}, {pipeline_mode = #tpu.pipeline_mode<synchronous>, transform_indices = @transform_8, window_bounds = array<i64: 1, 5>}, {transform_indices = @transform_9, window_bounds = array<i64: 2, 5>}]} {
    %c0 = arith.constant 0 : index
    %c0_0 = arith.constant 0 : index
    %0 = vector.load %arg2[%c0, %c0_0] : memref<16x64xbf16, #tpu.memory_space<vmem>>, vector<16x64xbf16>
    %c0_1 = arith.constant 0 : index
    %c0_2 = arith.constant 0 : index
    %1 = vector.load %arg1[%c0_1, %c0_2] : memref<64x1152xbf16, #tpu.memory_space<vmem>>, vector<64x1152xbf16>
    %cst = arith.constant dense<0.000000e+00> : vector<16x1152xf32>
    %2 = tpu.matmul %0, %1, %cst {dimension_numbers = #tpu.dot_dimension_numbers<[1], [0], [0], [1], [0, 0, 1, 1], [], []>} : vector<16x64xbf16>, vector<64x1152xbf16>, vector<16x1152xf32> -> vector<16x1152xf32>
    %c0_3 = arith.constant 0 : index
    %c0_4 = arith.constant 0 : index
    %3 = vector.load %arg3[%c0_3, %c0_4] : memref<16x1xf32, #tpu.memory_space<vmem>>, vector<16x1xf32>
    %4 = vector.broadcast %3 : vector<16x1xf32> to vector<16x1152xf32>
    %5 = arith.addf %2, %4 : vector<16x1152xf32>
    %cst_5 = arith.constant 0.000000e+00 : f32
    %6 = vector.broadcast %cst_5 : f32 to vector<16x1152xf32>
    %7 = arith.maximumf %5, %6 : vector<16x1152xf32>
    %8 = arith.truncf %7 : vector<16x1152xf32> to vector<16x1152xbf16>
    %cst_6 = arith.constant 0.000000e+00 : f32
    %9 = vector.broadcast %cst_6 : f32 to vector<32x256xf32>
    %c0_7 = arith.constant 0 : index
    %c0_8 = arith.constant 0 : index
    %c0_9 = arith.constant 0 : index
    %10 = vector.load %arg4[%c0_7, %c0_8, %c0_9] : memref<16x32x16xbf16, #tpu.memory_space<vmem>>, vector<1x32x16xbf16>
    %11 = vector.shape_cast %10 : vector<1x32x16xbf16> to vector<32x16xbf16>
    %12 = vector.extract_strided_slice %8 {offsets = [0, 0], sizes = [16, 256], strides = [1, 1]} : vector<16x1152xbf16> to vector<16x256xbf16>
    %cst_10 = arith.constant dense<0.000000e+00> : vector<32x256xf32>
    %13 = tpu.matmul %11, %12, %cst_10 {dimension_numbers = #tpu.dot_dimension_numbers<[1], [0], [0], [1], [0, 0, 1, 1], [], []>} : vector<32x16xbf16>, vector<16x256xbf16>, vector<32x256xf32> -> vector<32x256xf32>
    %14 = arith.addf %9, %13 : vector<32x256xf32>
    %c1 = arith.constant 1 : index
    %c0_11 = arith.constant 0 : index
    %c0_12 = arith.constant 0 : index
    %15 = vector.load %arg4[%c1, %c0_11, %c0_12] : memref<16x32x16xbf16, #tpu.memory_space<vmem>>, vector<1x32x16xbf16>
    %16 = vector.shape_cast %15 : vector<1x32x16xbf16> to vector<32x16xbf16>
    %17 = vector.extract_strided_slice %8 {offsets = [0, 256], sizes = [16, 256], strides = [1, 1]} : vector<16x1152xbf16> to vector<16x256xbf16>
    %cst_13 = arith.constant dense<0.000000e+00> : vector<32x256xf32>
    %18 = tpu.matmul %16, %17, %cst_13 {dimension_numbers = #tpu.dot_dimension_numbers<[1], [0], [0], [1], [0, 0, 1, 1], [], []>} : vector<32x16xbf16>, vector<16x256xbf16>, vector<32x256xf32> -> vector<32x256xf32>
    %19 = arith.addf %14, %18 : vector<32x256xf32>
    %c2 = arith.constant 2 : index
    %c0_14 = arith.constant 0 : index
    %c0_15 = arith.constant 0 : index
    %20 = vector.load %arg4[%c2, %c0_14, %c0_15] : memref<16x32x16xbf16, #tpu.memory_space<vmem>>, vector<1x32x16xbf16>
    %21 = vector.shape_cast %20 : vector<1x32x16xbf16> to vector<32x16xbf16>
    %22 = vector.extract_strided_slice %8 {offsets = [0, 1], sizes = [16, 256], strides = [1, 1]} : vector<16x1152xbf16> to vector<16x256xbf16>
    %cst_16 = arith.constant dense<0.000000e+00> : vector<32x256xf32>
    %23 = tpu.matmul %21, %22, %cst_16 {dimension_numbers = #tpu.dot_dimension_numbers<[1], [0], [0], [1], [0, 0, 1, 1], [], []>} : vector<32x16xbf16>, vector<16x256xbf16>, vector<32x256xf32> -> vector<32x256xf32>
    %24 = arith.addf %19, %23 : vector<32x256xf32>
    %c3 = arith.constant 3 : index
    %c0_17 = arith.constant 0 : index
    %c0_18 = arith.constant 0 : index
    %25 = vector.load %arg4[%c3, %c0_17, %c0_18] : memref<16x32x16xbf16, #tpu.memory_space<vmem>>, vector<1x32x16xbf16>
    %26 = vector.shape_cast %25 : vector<1x32x16xbf16> to vector<32x16xbf16>
    %27 = vector.extract_strided_slice %8 {offsets = [0, 257], sizes = [16, 256], strides = [1, 1]} : vector<16x1152xbf16> to vector<16x256xbf16>
    %cst_19 = arith.constant dense<0.000000e+00> : vector<32x256xf32>
    %28 = tpu.matmul %26, %27, %cst_19 {dimension_numbers = #tpu.dot_dimension_numbers<[1], [0], [0], [1], [0, 0, 1, 1], [], []>} : vector<32x16xbf16>, vector<16x256xbf16>, vector<32x256xf32> -> vector<32x256xf32>
    %29 = arith.addf %24, %28 : vector<32x256xf32>
    %c4 = arith.constant 4 : index
    %c0_20 = arith.constant 0 : index
    %c0_21 = arith.constant 0 : index
    %30 = vector.load %arg4[%c4, %c0_20, %c0_21] : memref<16x32x16xbf16, #tpu.memory_space<vmem>>, vector<1x32x16xbf16>
    %31 = vector.shape_cast %30 : vector<1x32x16xbf16> to vector<32x16xbf16>
    %32 = vector.extract_strided_slice %8 {offsets = [0, 512], sizes = [16, 256], strides = [1, 1]} : vector<16x1152xbf16> to vector<16x256xbf16>
    %cst_22 = arith.constant dense<0.000000e+00> : vector<32x256xf32>
    %33 = tpu.matmul %31, %32, %cst_22 {dimension_numbers = #tpu.dot_dimension_numbers<[1], [0], [0], [1], [0, 0, 1, 1], [], []>} : vector<32x16xbf16>, vector<16x256xbf16>, vector<32x256xf32> -> vector<32x256xf32>
    %34 = arith.addf %29, %33 : vector<32x256xf32>
    %c5 = arith.constant 5 : index
    %c0_23 = arith.constant 0 : index
    %c0_24 = arith.constant 0 : index
    %35 = vector.load %arg4[%c5, %c0_23, %c0_24] : memref<16x32x16xbf16, #tpu.memory_space<vmem>>, vector<1x32x16xbf16>
    %36 = vector.shape_cast %35 : vector<1x32x16xbf16> to vector<32x16xbf16>
    %37 = vector.extract_strided_slice %8 {offsets = [0, 768], sizes = [16, 256], strides = [1, 1]} : vector<16x1152xbf16> to vector<16x256xbf16>
    %cst_25 = arith.constant dense<0.000000e+00> : vector<32x256xf32>
    %38 = tpu.matmul %36, %37, %cst_25 {dimension_numbers = #tpu.dot_dimension_numbers<[1], [0], [0], [1], [0, 0, 1, 1], [], []>} : vector<32x16xbf16>, vector<16x256xbf16>, vector<32x256xf32> -> vector<32x256xf32>
    %39 = arith.addf %34, %38 : vector<32x256xf32>
    %c6 = arith.constant 6 : index
    %c0_26 = arith.constant 0 : index
    %c0_27 = arith.constant 0 : index
    %40 = vector.load %arg4[%c6, %c0_26, %c0_27] : memref<16x32x16xbf16, #tpu.memory_space<vmem>>, vector<1x32x16xbf16>
    %41 = vector.shape_cast %40 : vector<1x32x16xbf16> to vector<32x16xbf16>
    %42 = vector.extract_strided_slice %8 {offsets = [0, 513], sizes = [16, 256], strides = [1, 1]} : vector<16x1152xbf16> to vector<16x256xbf16>
    %cst_28 = arith.constant dense<0.000000e+00> : vector<32x256xf32>
    %43 = tpu.matmul %41, %42, %cst_28 {dimension_numbers = #tpu.dot_dimension_numbers<[1], [0], [0], [1], [0, 0, 1, 1], [], []>} : vector<32x16xbf16>, vector<16x256xbf16>, vector<32x256xf32> -> vector<32x256xf32>
    %44 = arith.addf %39, %43 : vector<32x256xf32>
    %c7 = arith.constant 7 : index
    %c0_29 = arith.constant 0 : index
    %c0_30 = arith.constant 0 : index
    %45 = vector.load %arg4[%c7, %c0_29, %c0_30] : memref<16x32x16xbf16, #tpu.memory_space<vmem>>, vector<1x32x16xbf16>
    %46 = vector.shape_cast %45 : vector<1x32x16xbf16> to vector<32x16xbf16>
    %47 = vector.extract_strided_slice %8 {offsets = [0, 769], sizes = [16, 256], strides = [1, 1]} : vector<16x1152xbf16> to vector<16x256xbf16>
    %cst_31 = arith.constant dense<0.000000e+00> : vector<32x256xf32>
    %48 = tpu.matmul %46, %47, %cst_31 {dimension_numbers = #tpu.dot_dimension_numbers<[1], [0], [0], [1], [0, 0, 1, 1], [], []>} : vector<32x16xbf16>, vector<16x256xbf16>, vector<32x256xf32> -> vector<32x256xf32>
    %49 = arith.addf %44, %48 : vector<32x256xf32>
    %c8 = arith.constant 8 : index
    %c0_32 = arith.constant 0 : index
    %c0_33 = arith.constant 0 : index
    %50 = vector.load %arg4[%c8, %c0_32, %c0_33] : memref<16x32x16xbf16, #tpu.memory_space<vmem>>, vector<1x32x16xbf16>
    %51 = vector.shape_cast %50 : vector<1x32x16xbf16> to vector<32x16xbf16>
    %52 = vector.extract_strided_slice %8 {offsets = [0, 10], sizes = [16, 256], strides = [1, 1]} : vector<16x1152xbf16> to vector<16x256xbf16>
    %cst_34 = arith.constant dense<0.000000e+00> : vector<32x256xf32>
    %53 = tpu.matmul %51, %52, %cst_34 {dimension_numbers = #tpu.dot_dimension_numbers<[1], [0], [0], [1], [0, 0, 1, 1], [], []>} : vector<32x16xbf16>, vector<16x256xbf16>, vector<32x256xf32> -> vector<32x256xf32>
    %54 = arith.addf %49, %53 : vector<32x256xf32>
    %c9 = arith.constant 9 : index
    %c0_35 = arith.constant 0 : index
    %c0_36 = arith.constant 0 : index
    %55 = vector.load %arg4[%c9, %c0_35, %c0_36] : memref<16x32x16xbf16, #tpu.memory_space<vmem>>, vector<1x32x16xbf16>
    %56 = vector.shape_cast %55 : vector<1x32x16xbf16> to vector<32x16xbf16>
    %57 = vector.extract_strided_slice %8 {offsets = [0, 266], sizes = [16, 256], strides = [1, 1]} : vector<16x1152xbf16> to vector<16x256xbf16>
    %cst_37 = arith.constant dense<0.000000e+00> : vector<32x256xf32>
    %58 = tpu.matmul %56, %57, %cst_37 {dimension_numbers = #tpu.dot_dimension_numbers<[1], [0], [0], [1], [0, 0, 1, 1], [], []>} : vector<32x16xbf16>, vector<16x256xbf16>, vector<32x256xf32> -> vector<32x256xf32>
    %59 = arith.addf %54, %58 : vector<32x256xf32>
    %c10 = arith.constant 10 : index
    %c0_38 = arith.constant 0 : index
    %c0_39 = arith.constant 0 : index
    %60 = vector.load %arg4[%c10, %c0_38, %c0_39] : memref<16x32x16xbf16, #tpu.memory_space<vmem>>, vector<1x32x16xbf16>
    %61 = vector.shape_cast %60 : vector<1x32x16xbf16> to vector<32x16xbf16>
    %62 = vector.extract_strided_slice %8 {offsets = [0, 11], sizes = [16, 256], strides = [1, 1]} : vector<16x1152xbf16> to vector<16x256xbf16>
    %cst_40 = arith.constant dense<0.000000e+00> : vector<32x256xf32>
    %63 = tpu.matmul %61, %62, %cst_40 {dimension_numbers = #tpu.dot_dimension_numbers<[1], [0], [0], [1], [0, 0, 1, 1], [], []>} : vector<32x16xbf16>, vector<16x256xbf16>, vector<32x256xf32> -> vector<32x256xf32>
    %64 = arith.addf %59, %63 : vector<32x256xf32>
    %c11 = arith.constant 11 : index
    %c0_41 = arith.constant 0 : index
    %c0_42 = arith.constant 0 : index
    %65 = vector.load %arg4[%c11, %c0_41, %c0_42] : memref<16x32x16xbf16, #tpu.memory_space<vmem>>, vector<1x32x16xbf16>
    %66 = vector.shape_cast %65 : vector<1x32x16xbf16> to vector<32x16xbf16>
    %67 = vector.extract_strided_slice %8 {offsets = [0, 267], sizes = [16, 256], strides = [1, 1]} : vector<16x1152xbf16> to vector<16x256xbf16>
    %cst_43 = arith.constant dense<0.000000e+00> : vector<32x256xf32>
    %68 = tpu.matmul %66, %67, %cst_43 {dimension_numbers = #tpu.dot_dimension_numbers<[1], [0], [0], [1], [0, 0, 1, 1], [], []>} : vector<32x16xbf16>, vector<16x256xbf16>, vector<32x256xf32> -> vector<32x256xf32>
    %69 = arith.addf %64, %68 : vector<32x256xf32>
    %c12 = arith.constant 12 : index
    %c0_44 = arith.constant 0 : index
    %c0_45 = arith.constant 0 : index
    %70 = vector.load %arg4[%c12, %c0_44, %c0_45] : memref<16x32x16xbf16, #tpu.memory_space<vmem>>, vector<1x32x16xbf16>
    %71 = vector.shape_cast %70 : vector<1x32x16xbf16> to vector<32x16xbf16>
    %72 = vector.extract_strided_slice %8 {offsets = [0, 522], sizes = [16, 256], strides = [1, 1]} : vector<16x1152xbf16> to vector<16x256xbf16>
    %cst_46 = arith.constant dense<0.000000e+00> : vector<32x256xf32>
    %73 = tpu.matmul %71, %72, %cst_46 {dimension_numbers = #tpu.dot_dimension_numbers<[1], [0], [0], [1], [0, 0, 1, 1], [], []>} : vector<32x16xbf16>, vector<16x256xbf16>, vector<32x256xf32> -> vector<32x256xf32>
    %74 = arith.addf %69, %73 : vector<32x256xf32>
    %c13 = arith.constant 13 : index
    %c0_47 = arith.constant 0 : index
    %c0_48 = arith.constant 0 : index
    %75 = vector.load %arg4[%c13, %c0_47, %c0_48] : memref<16x32x16xbf16, #tpu.memory_space<vmem>>, vector<1x32x16xbf16>
    %76 = vector.shape_cast %75 : vector<1x32x16xbf16> to vector<32x16xbf16>
    %77 = vector.extract_strided_slice %8 {offsets = [0, 778], sizes = [16, 256], strides = [1, 1]} : vector<16x1152xbf16> to vector<16x256xbf16>
    %cst_49 = arith.constant dense<0.000000e+00> : vector<32x256xf32>
    %78 = tpu.matmul %76, %77, %cst_49 {dimension_numbers = #tpu.dot_dimension_numbers<[1], [0], [0], [1], [0, 0, 1, 1], [], []>} : vector<32x16xbf16>, vector<16x256xbf16>, vector<32x256xf32> -> vector<32x256xf32>
    %79 = arith.addf %74, %78 : vector<32x256xf32>
    %c14 = arith.constant 14 : index
    %c0_50 = arith.constant 0 : index
    %c0_51 = arith.constant 0 : index
    %80 = vector.load %arg4[%c14, %c0_50, %c0_51] : memref<16x32x16xbf16, #tpu.memory_space<vmem>>, vector<1x32x16xbf16>
    %81 = vector.shape_cast %80 : vector<1x32x16xbf16> to vector<32x16xbf16>
    %82 = vector.extract_strided_slice %8 {offsets = [0, 523], sizes = [16, 256], strides = [1, 1]} : vector<16x1152xbf16> to vector<16x256xbf16>
    %cst_52 = arith.constant dense<0.000000e+00> : vector<32x256xf32>
    %83 = tpu.matmul %81, %82, %cst_52 {dimension_numbers = #tpu.dot_dimension_numbers<[1], [0], [0], [1], [0, 0, 1, 1], [], []>} : vector<32x16xbf16>, vector<16x256xbf16>, vector<32x256xf32> -> vector<32x256xf32>
    %84 = arith.addf %79, %83 : vector<32x256xf32>
    %c15 = arith.constant 15 : index
    %c0_53 = arith.constant 0 : index
    %c0_54 = arith.constant 0 : index
    %85 = vector.load %arg4[%c15, %c0_53, %c0_54] : memref<16x32x16xbf16, #tpu.memory_space<vmem>>, vector<1x32x16xbf16>
    %86 = vector.shape_cast %85 : vector<1x32x16xbf16> to vector<32x16xbf16>
    %87 = vector.extract_strided_slice %8 {offsets = [0, 779], sizes = [16, 256], strides = [1, 1]} : vector<16x1152xbf16> to vector<16x256xbf16>
    %cst_55 = arith.constant dense<0.000000e+00> : vector<32x256xf32>
    %88 = tpu.matmul %86, %87, %cst_55 {dimension_numbers = #tpu.dot_dimension_numbers<[1], [0], [0], [1], [0, 0, 1, 1], [], []>} : vector<32x16xbf16>, vector<16x256xbf16>, vector<32x256xf32> -> vector<32x256xf32>
    %89 = arith.addf %84, %88 : vector<32x256xf32>
    %c0_56 = arith.constant 0 : index
    %c0_57 = arith.constant 0 : index
    %90 = vector.load %arg5[%c0_56, %c0_57] : memref<32x1xf32, #tpu.memory_space<vmem>>, vector<32x1xf32>
    %91 = vector.broadcast %90 : vector<32x1xf32> to vector<32x256xf32>
    %92 = arith.addf %89, %91 : vector<32x256xf32>
    %cst_58 = arith.constant 0.000000e+00 : f32
    %93 = vector.broadcast %cst_58 : f32 to vector<32x256xf32>
    %94 = arith.maximumf %92, %93 : vector<32x256xf32>
    %95 = arith.truncf %94 : vector<32x256xf32> to vector<32x256xbf16>
    %96 = vector.extract_strided_slice %95 {offsets = [0, 0], sizes = [1, 128], strides = [1, 1]} : vector<32x256xbf16> to vector<1x128xbf16>
    %c0_59 = arith.constant 0 : index
    %c0_60 = arith.constant 0 : index
    %97 = vector.load %arg11[%c0_59, %c0_60] : memref<2x4096xbf16, #tpu.memory_space<vmem>>, vector<1x128xbf16>
    tpu.vector_store %arg11[%c0_59, %c0_60], %96 {strides = array<i32>} : memref<2x4096xbf16, #tpu.memory_space<vmem>>, vector<1x128xbf16>,
    %98 = vector.extract_strided_slice %95 {offsets = [1, 0], sizes = [1, 128], strides = [1, 1]} : vector<32x256xbf16> to vector<1x128xbf16>
    %c0_61 = arith.constant 0 : index
    %c128 = arith.constant 128 : index
    %99 = vector.load %arg11[%c0_61, %c128] : memref<2x4096xbf16, #tpu.memory_space<vmem>>, vector<1x128xbf16>
    tpu.vector_store %arg11[%c0_61, %c128], %98 {strides = array<i32>} : memref<2x4096xbf16, #tpu.memory_space<vmem>>, vector<1x128xbf16>,
    %100 = vector.extract_strided_slice %95 {offsets = [2, 0], sizes = [1, 128], strides = [1, 1]} : vector<32x256xbf16> to vector<1x128xbf16>
    %c0_62 = arith.constant 0 : index
    %c256 = arith.constant 256 : index
    %101 = vector.load %arg11[%c0_62, %c256] : memref<2x4096xbf16, #tpu.memory_space<vmem>>, vector<1x128xbf16>
    tpu.vector_store %arg11[%c0_62, %c256], %100 {strides = array<i32>} : memref<2x4096xbf16, #tpu.memory_space<vmem>>, vector<1x128xbf16>,
    %102 = vector.extract_strided_slice %95 {offsets = [3, 0], sizes = [1, 128], strides = [1, 1]} : vector<32x256xbf16> to vector<1x128xbf16>
    %c0_63 = arith.constant 0 : index
    %c384 = arith.constant 384 : index
    %103 = vector.load %arg11[%c0_63, %c384] : memref<2x4096xbf16, #tpu.memory_space<vmem>>, vector<1x128xbf16>
    tpu.vector_store %arg11[%c0_63, %c384], %102 {strides = array<i32>} : memref<2x4096xbf16, #tpu.memory_space<vmem>>, vector<1x128xbf16>,
    %104 = vector.extract_strided_slice %95 {offsets = [4, 0], sizes = [1, 128], strides = [1, 1]} : vector<32x256xbf16> to vector<1x128xbf16>
    %c0_64 = arith.constant 0 : index
    %c512 = arith.constant 512 : index
    %105 = vector.load %arg11[%c0_64, %c512] : memref<2x4096xbf16, #tpu.memory_space<vmem>>, vector<1x128xbf16>
    tpu.vector_store %arg11[%c0_64, %c512], %104 {strides = array<i32>} : memref<2x4096xbf16, #tpu.memory_space<vmem>>, vector<1x128xbf16>,
    %106 = vector.extract_strided_slice %95 {offsets = [5, 0], sizes = [1, 128], strides = [1, 1]} : vector<32x256xbf16> to vector<1x128xbf16>
    %c0_65 = arith.constant 0 : index
    %c640 = arith.constant 640 : index
    %107 = vector.load %arg11[%c0_65, %c640] : memref<2x4096xbf16, #tpu.memory_space<vmem>>, vector<1x128xbf16>
    tpu.vector_store %arg11[%c0_65, %c640], %106 {strides = array<i32>} : memref<2x4096xbf16, #tpu.memory_space<vmem>>, vector<1x128xbf16>,
    %108 = vector.extract_strided_slice %95 {offsets = [6, 0], sizes = [1, 128], strides = [1, 1]} : vector<32x256xbf16> to vector<1x128xbf16>
    %c0_66 = arith.constant 0 : index
    %c768 = arith.constant 768 : index
    %109 = vector.load %arg11[%c0_66, %c768] : memref<2x4096xbf16, #tpu.memory_space<vmem>>, vector<1x128xbf16>
    tpu.vector_store %arg11[%c0_66, %c768], %108 {strides = array<i32>} : memref<2x4096xbf16, #tpu.memory_space<vmem>>, vector<1x128xbf16>,
    %110 = vector.extract_strided_slice %95 {offsets = [7, 0], sizes = [1, 128], strides = [1, 1]} : vector<32x256xbf16> to vector<1x128xbf16>
    %c0_67 = arith.constant 0 : index
    %c896 = arith.constant 896 : index
    %111 = vector.load %arg11[%c0_67, %c896] : memref<2x4096xbf16, #tpu.memory_space<vmem>>, vector<1x128xbf16>
    tpu.vector_store %arg11[%c0_67, %c896], %110 {strides = array<i32>} : memref<2x4096xbf16, #tpu.memory_space<vmem>>, vector<1x128xbf16>,
    %112 = vector.extract_strided_slice %95 {offsets = [8, 0], sizes = [1, 128], strides = [1, 1]} : vector<32x256xbf16> to vector<1x128xbf16>
    %c0_68 = arith.constant 0 : index
    %c1024 = arith.constant 1024 : index
    %113 = vector.load %arg11[%c0_68, %c1024] : memref<2x4096xbf16, #tpu.memory_space<vmem>>, vector<1x128xbf16>
    tpu.vector_store %arg11[%c0_68, %c1024], %112 {strides = array<i32>} : memref<2x4096xbf16, #tpu.memory_space<vmem>>, vector<1x128xbf16>,
    %114 = vector.extract_strided_slice %95 {offsets = [9, 0], sizes = [1, 128], strides = [1, 1]} : vector<32x256xbf16> to vector<1x128xbf16>
    %c0_69 = arith.constant 0 : index
    %c1152 = arith.constant 1152 : index
    %115 = vector.load %arg11[%c0_69, %c1152] : memref<2x4096xbf16, #tpu.memory_space<vmem>>, vector<1x128xbf16>
    tpu.vector_store %arg11[%c0_69, %c1152], %114 {strides = array<i32>} : memref<2x4096xbf16, #tpu.memory_space<vmem>>, vector<1x128xbf16>,
    %116 = vector.extract_strided_slice %95 {offsets = [10, 0], sizes = [1, 128], strides = [1, 1]} : vector<32x256xbf16> to vector<1x128xbf16>
    %c0_70 = arith.constant 0 : index
    %c1280 = arith.constant 1280 : index
    %117 = vector.load %arg11[%c0_70, %c1280] : memref<2x4096xbf16, #tpu.memory_space<vmem>>, vector<1x128xbf16>
    tpu.vector_store %arg11[%c0_70, %c1280], %116 {strides = array<i32>} : memref<2x4096xbf16, #tpu.memory_space<vmem>>, vector<1x128xbf16>,
    %118 = vector.extract_strided_slice %95 {offsets = [11, 0], sizes = [1, 128], strides = [1, 1]} : vector<32x256xbf16> to vector<1x128xbf16>
    %c0_71 = arith.constant 0 : index
    %c1408 = arith.constant 1408 : index
    %119 = vector.load %arg11[%c0_71, %c1408] : memref<2x4096xbf16, #tpu.memory_space<vmem>>, vector<1x128xbf16>
    tpu.vector_store %arg11[%c0_71, %c1408], %118 {strides = array<i32>} : memref<2x4096xbf16, #tpu.memory_space<vmem>>, vector<1x128xbf16>,
    %120 = vector.extract_strided_slice %95 {offsets = [12, 0], sizes = [1, 128], strides = [1, 1]} : vector<32x256xbf16> to vector<1x128xbf16>
    %c0_72 = arith.constant 0 : index
    %c1536 = arith.constant 1536 : index
    %121 = vector.load %arg11[%c0_72, %c1536] : memref<2x4096xbf16, #tpu.memory_space<vmem>>, vector<1x128xbf16>
    tpu.vector_store %arg11[%c0_72, %c1536], %120 {strides = array<i32>} : memref<2x4096xbf16, #tpu.memory_space<vmem>>, vector<1x128xbf16>,
    %122 = vector.extract_strided_slice %95 {offsets = [13, 0], sizes = [1, 128], strides = [1, 1]} : vector<32x256xbf16> to vector<1x128xbf16>
    %c0_73 = arith.constant 0 : index
    %c1664 = arith.constant 1664 : index
    %123 = vector.load %arg11[%c0_73, %c1664] : memref<2x4096xbf16, #tpu.memory_space<vmem>>, vector<1x128xbf16>
    tpu.vector_store %arg11[%c0_73, %c1664], %122 {strides = array<i32>} : memref<2x4096xbf16, #tpu.memory_space<vmem>>, vector<1x128xbf16>,
    %124 = vector.extract_strided_slice %95 {offsets = [14, 0], sizes = [1, 128], strides = [1, 1]} : vector<32x256xbf16> to vector<1x128xbf16>
    %c0_74 = arith.constant 0 : index
    %c1792 = arith.constant 1792 : index
    %125 = vector.load %arg11[%c0_74, %c1792] : memref<2x4096xbf16, #tpu.memory_space<vmem>>, vector<1x128xbf16>
    tpu.vector_store %arg11[%c0_74, %c1792], %124 {strides = array<i32>} : memref<2x4096xbf16, #tpu.memory_space<vmem>>, vector<1x128xbf16>,
    %126 = vector.extract_strided_slice %95 {offsets = [15, 0], sizes = [1, 128], strides = [1, 1]} : vector<32x256xbf16> to vector<1x128xbf16>
    %c0_75 = arith.constant 0 : index
    %c1920 = arith.constant 1920 : index
    %127 = vector.load %arg11[%c0_75, %c1920] : memref<2x4096xbf16, #tpu.memory_space<vmem>>, vector<1x128xbf16>
    tpu.vector_store %arg11[%c0_75, %c1920], %126 {strides = array<i32>} : memref<2x4096xbf16, #tpu.memory_space<vmem>>, vector<1x128xbf16>,
    %128 = vector.extract_strided_slice %95 {offsets = [16, 0], sizes = [1, 128], strides = [1, 1]} : vector<32x256xbf16> to vector<1x128xbf16>
    %c0_76 = arith.constant 0 : index
    %c2048 = arith.constant 2048 : index
    %129 = vector.load %arg11[%c0_76, %c2048] : memref<2x4096xbf16, #tpu.memory_space<vmem>>, vector<1x128xbf16>
    tpu.vector_store %arg11[%c0_76, %c2048], %128 {strides = array<i32>} : memref<2x4096xbf16, #tpu.memory_space<vmem>>, vector<1x128xbf16>,
    %130 = vector.extract_strided_slice %95 {offsets = [17, 0], sizes = [1, 128], strides = [1, 1]} : vector<32x256xbf16> to vector<1x128xbf16>
    %c0_77 = arith.constant 0 : index
    %c2176 = arith.constant 2176 : index
    %131 = vector.load %arg11[%c0_77, %c2176] : memref<2x4096xbf16, #tpu.memory_space<vmem>>, vector<1x128xbf16>
    tpu.vector_store %arg11[%c0_77, %c2176], %130 {strides = array<i32>} : memref<2x4096xbf16, #tpu.memory_space<vmem>>, vector<1x128xbf16>,
    %132 = vector.extract_strided_slice %95 {offsets = [18, 0], sizes = [1, 128], strides = [1, 1]} : vector<32x256xbf16> to vector<1x128xbf16>
    %c0_78 = arith.constant 0 : index
    %c2304 = arith.constant 2304 : index
    %133 = vector.load %arg11[%c0_78, %c2304] : memref<2x4096xbf16, #tpu.memory_space<vmem>>, vector<1x128xbf16>
    tpu.vector_store %arg11[%c0_78, %c2304], %132 {strides = array<i32>} : memref<2x4096xbf16, #tpu.memory_space<vmem>>, vector<1x128xbf16>,
    %134 = vector.extract_strided_slice %95 {offsets = [19, 0], sizes = [1, 128], strides = [1, 1]} : vector<32x256xbf16> to vector<1x128xbf16>
    %c0_79 = arith.constant 0 : index
    %c2432 = arith.constant 2432 : index
    %135 = vector.load %arg11[%c0_79, %c2432] : memref<2x4096xbf16, #tpu.memory_space<vmem>>, vector<1x128xbf16>
    tpu.vector_store %arg11[%c0_79, %c2432], %134 {strides = array<i32>} : memref<2x4096xbf16, #tpu.memory_space<vmem>>, vector<1x128xbf16>,
    %136 = vector.extract_strided_slice %95 {offsets = [20, 0], sizes = [1, 128], strides = [1, 1]} : vector<32x256xbf16> to vector<1x128xbf16>
    %c0_80 = arith.constant 0 : index
    %c2560 = arith.constant 2560 : index
    %137 = vector.load %arg11[%c0_80, %c2560] : memref<2x4096xbf16, #tpu.memory_space<vmem>>, vector<1x128xbf16>
    tpu.vector_store %arg11[%c0_80, %c2560], %136 {strides = array<i32>} : memref<2x4096xbf16, #tpu.memory_space<vmem>>, vector<1x128xbf16>,
    %138 = vector.extract_strided_slice %95 {offsets = [21, 0], sizes = [1, 128], strides = [1, 1]} : vector<32x256xbf16> to vector<1x128xbf16>
    %c0_81 = arith.constant 0 : index
    %c2688 = arith.constant 2688 : index
    %139 = vector.load %arg11[%c0_81, %c2688] : memref<2x4096xbf16, #tpu.memory_space<vmem>>, vector<1x128xbf16>
    tpu.vector_store %arg11[%c0_81, %c2688], %138 {strides = array<i32>} : memref<2x4096xbf16, #tpu.memory_space<vmem>>, vector<1x128xbf16>,
    %140 = vector.extract_strided_slice %95 {offsets = [22, 0], sizes = [1, 128], strides = [1, 1]} : vector<32x256xbf16> to vector<1x128xbf16>
    %c0_82 = arith.constant 0 : index
    %c2816 = arith.constant 2816 : index
    %141 = vector.load %arg11[%c0_82, %c2816] : memref<2x4096xbf16, #tpu.memory_space<vmem>>, vector<1x128xbf16>
    tpu.vector_store %arg11[%c0_82, %c2816], %140 {strides = array<i32>} : memref<2x4096xbf16, #tpu.memory_space<vmem>>, vector<1x128xbf16>,
    %142 = vector.extract_strided_slice %95 {offsets = [23, 0], sizes = [1, 128], strides = [1, 1]} : vector<32x256xbf16> to vector<1x128xbf16>
    %c0_83 = arith.constant 0 : index
    %c2944 = arith.constant 2944 : index
    %143 = vector.load %arg11[%c0_83, %c2944] : memref<2x4096xbf16, #tpu.memory_space<vmem>>, vector<1x128xbf16>
    tpu.vector_store %arg11[%c0_83, %c2944], %142 {strides = array<i32>} : memref<2x4096xbf16, #tpu.memory_space<vmem>>, vector<1x128xbf16>,
    %144 = vector.extract_strided_slice %95 {offsets = [24, 0], sizes = [1, 128], strides = [1, 1]} : vector<32x256xbf16> to vector<1x128xbf16>
    %c0_84 = arith.constant 0 : index
    %c3072 = arith.constant 3072 : index
    %145 = vector.load %arg11[%c0_84, %c3072] : memref<2x4096xbf16, #tpu.memory_space<vmem>>, vector<1x128xbf16>
    tpu.vector_store %arg11[%c0_84, %c3072], %144 {strides = array<i32>} : memref<2x4096xbf16, #tpu.memory_space<vmem>>, vector<1x128xbf16>,
    %146 = vector.extract_strided_slice %95 {offsets = [25, 0], sizes = [1, 128], strides = [1, 1]} : vector<32x256xbf16> to vector<1x128xbf16>
    %c0_85 = arith.constant 0 : index
    %c3200 = arith.constant 3200 : index
    %147 = vector.load %arg11[%c0_85, %c3200] : memref<2x4096xbf16, #tpu.memory_space<vmem>>, vector<1x128xbf16>
    tpu.vector_store %arg11[%c0_85, %c3200], %146 {strides = array<i32>} : memref<2x4096xbf16, #tpu.memory_space<vmem>>, vector<1x128xbf16>,
    %148 = vector.extract_strided_slice %95 {offsets = [26, 0], sizes = [1, 128], strides = [1, 1]} : vector<32x256xbf16> to vector<1x128xbf16>
    %c0_86 = arith.constant 0 : index
    %c3328 = arith.constant 3328 : index
    %149 = vector.load %arg11[%c0_86, %c3328] : memref<2x4096xbf16, #tpu.memory_space<vmem>>, vector<1x128xbf16>
    tpu.vector_store %arg11[%c0_86, %c3328], %148 {strides = array<i32>} : memref<2x4096xbf16, #tpu.memory_space<vmem>>, vector<1x128xbf16>,
    %150 = vector.extract_strided_slice %95 {offsets = [27, 0], sizes = [1, 128], strides = [1, 1]} : vector<32x256xbf16> to vector<1x128xbf16>
    %c0_87 = arith.constant 0 : index
    %c3456 = arith.constant 3456 : index
    %151 = vector.load %arg11[%c0_87, %c3456] : memref<2x4096xbf16, #tpu.memory_space<vmem>>, vector<1x128xbf16>
    tpu.vector_store %arg11[%c0_87, %c3456], %150 {strides = array<i32>} : memref<2x4096xbf16, #tpu.memory_space<vmem>>, vector<1x128xbf16>,
    %152 = vector.extract_strided_slice %95 {offsets = [28, 0], sizes = [1, 128], strides = [1, 1]} : vector<32x256xbf16> to vector<1x128xbf16>
    %c0_88 = arith.constant 0 : index
    %c3584 = arith.constant 3584 : index
    %153 = vector.load %arg11[%c0_88, %c3584] : memref<2x4096xbf16, #tpu.memory_space<vmem>>, vector<1x128xbf16>
    tpu.vector_store %arg11[%c0_88, %c3584], %152 {strides = array<i32>} : memref<2x4096xbf16, #tpu.memory_space<vmem>>, vector<1x128xbf16>,
    %154 = vector.extract_strided_slice %95 {offsets = [29, 0], sizes = [1, 128], strides = [1, 1]} : vector<32x256xbf16> to vector<1x128xbf16>
    %c0_89 = arith.constant 0 : index
    %c3712 = arith.constant 3712 : index
    %155 = vector.load %arg11[%c0_89, %c3712] : memref<2x4096xbf16, #tpu.memory_space<vmem>>, vector<1x128xbf16>
    tpu.vector_store %arg11[%c0_89, %c3712], %154 {strides = array<i32>} : memref<2x4096xbf16, #tpu.memory_space<vmem>>, vector<1x128xbf16>,
    %156 = vector.extract_strided_slice %95 {offsets = [30, 0], sizes = [1, 128], strides = [1, 1]} : vector<32x256xbf16> to vector<1x128xbf16>
    %c0_90 = arith.constant 0 : index
    %c3840 = arith.constant 3840 : index
    %157 = vector.load %arg11[%c0_90, %c3840] : memref<2x4096xbf16, #tpu.memory_space<vmem>>, vector<1x128xbf16>
    tpu.vector_store %arg11[%c0_90, %c3840], %156 {strides = array<i32>} : memref<2x4096xbf16, #tpu.memory_space<vmem>>, vector<1x128xbf16>,
    %158 = vector.extract_strided_slice %95 {offsets = [31, 0], sizes = [1, 128], strides = [1, 1]} : vector<32x256xbf16> to vector<1x128xbf16>
    %c0_91 = arith.constant 0 : index
    %c3968 = arith.constant 3968 : index
    %159 = vector.load %arg11[%c0_91, %c3968] : memref<2x4096xbf16, #tpu.memory_space<vmem>>, vector<1x128xbf16>
    tpu.vector_store %arg11[%c0_91, %c3968], %158 {strides = array<i32>} : memref<2x4096xbf16, #tpu.memory_space<vmem>>, vector<1x128xbf16>,
    %160 = vector.extract_strided_slice %95 {offsets = [0, 128], sizes = [1, 128], strides = [1, 1]} : vector<32x256xbf16> to vector<1x128xbf16>
    %c1_92 = arith.constant 1 : index
    %c0_93 = arith.constant 0 : index
    %161 = vector.load %arg11[%c1_92, %c0_93] : memref<2x4096xbf16, #tpu.memory_space<vmem>>, vector<1x128xbf16>
    tpu.vector_store %arg11[%c1_92, %c0_93], %160 {strides = array<i32>} : memref<2x4096xbf16, #tpu.memory_space<vmem>>, vector<1x128xbf16>,
    %162 = vector.extract_strided_slice %95 {offsets = [1, 128], sizes = [1, 128], strides = [1, 1]} : vector<32x256xbf16> to vector<1x128xbf16>
    %c1_94 = arith.constant 1 : index
    %c128_95 = arith.constant 128 : index
    %163 = vector.load %arg11[%c1_94, %c128_95] : memref<2x4096xbf16, #tpu.memory_space<vmem>>, vector<1x128xbf16>
    tpu.vector_store %arg11[%c1_94, %c128_95], %162 {strides = array<i32>} : memref<2x4096xbf16, #tpu.memory_space<vmem>>, vector<1x128xbf16>,
    %164 = vector.extract_strided_slice %95 {offsets = [2, 128], sizes = [1, 128], strides = [1, 1]} : vector<32x256xbf16> to vector<1x128xbf16>
    %c1_96 = arith.constant 1 : index
    %c256_97 = arith.constant 256 : index
    %165 = vector.load %arg11[%c1_96, %c256_97] : memref<2x4096xbf16, #tpu.memory_space<vmem>>, vector<1x128xbf16>
    tpu.vector_store %arg11[%c1_96, %c256_97], %164 {strides = array<i32>} : memref<2x4096xbf16, #tpu.memory_space<vmem>>, vector<1x128xbf16>,
    %166 = vector.extract_strided_slice %95 {offsets = [3, 128], sizes = [1, 128], strides = [1, 1]} : vector<32x256xbf16> to vector<1x128xbf16>
    %c1_98 = arith.constant 1 : index
    %c384_99 = arith.constant 384 : index
    %167 = vector.load %arg11[%c1_98, %c384_99] : memref<2x4096xbf16, #tpu.memory_space<vmem>>, vector<1x128xbf16>
    tpu.vector_store %arg11[%c1_98, %c384_99], %166 {strides = array<i32>} : memref<2x4096xbf16, #tpu.memory_space<vmem>>, vector<1x128xbf16>,
    %168 = vector.extract_strided_slice %95 {offsets = [4, 128], sizes = [1, 128], strides = [1, 1]} : vector<32x256xbf16> to vector<1x128xbf16>
    %c1_100 = arith.constant 1 : index
    %c512_101 = arith.constant 512 : index
    %169 = vector.load %arg11[%c1_100, %c512_101] : memref<2x4096xbf16, #tpu.memory_space<vmem>>, vector<1x128xbf16>
    tpu.vector_store %arg11[%c1_100, %c512_101], %168 {strides = array<i32>} : memref<2x4096xbf16, #tpu.memory_space<vmem>>, vector<1x128xbf16>,
    %170 = vector.extract_strided_slice %95 {offsets = [5, 128], sizes = [1, 128], strides = [1, 1]} : vector<32x256xbf16> to vector<1x128xbf16>
    %c1_102 = arith.constant 1 : index
    %c640_103 = arith.constant 640 : index
    %171 = vector.load %arg11[%c1_102, %c640_103] : memref<2x4096xbf16, #tpu.memory_space<vmem>>, vector<1x128xbf16>
    tpu.vector_store %arg11[%c1_102, %c640_103], %170 {strides = array<i32>} : memref<2x4096xbf16, #tpu.memory_space<vmem>>, vector<1x128xbf16>,
    %172 = vector.extract_strided_slice %95 {offsets = [6, 128], sizes = [1, 128], strides = [1, 1]} : vector<32x256xbf16> to vector<1x128xbf16>
    %c1_104 = arith.constant 1 : index
    %c768_105 = arith.constant 768 : index
    %173 = vector.load %arg11[%c1_104, %c768_105] : memref<2x4096xbf16, #tpu.memory_space<vmem>>, vector<1x128xbf16>
    tpu.vector_store %arg11[%c1_104, %c768_105], %172 {strides = array<i32>} : memref<2x4096xbf16, #tpu.memory_space<vmem>>, vector<1x128xbf16>,
    %174 = vector.extract_strided_slice %95 {offsets = [7, 128], sizes = [1, 128], strides = [1, 1]} : vector<32x256xbf16> to vector<1x128xbf16>
    %c1_106 = arith.constant 1 : index
    %c896_107 = arith.constant 896 : index
    %175 = vector.load %arg11[%c1_106, %c896_107] : memref<2x4096xbf16, #tpu.memory_space<vmem>>, vector<1x128xbf16>
    tpu.vector_store %arg11[%c1_106, %c896_107], %174 {strides = array<i32>} : memref<2x4096xbf16, #tpu.memory_space<vmem>>, vector<1x128xbf16>,
    %176 = vector.extract_strided_slice %95 {offsets = [8, 128], sizes = [1, 128], strides = [1, 1]} : vector<32x256xbf16> to vector<1x128xbf16>
    %c1_108 = arith.constant 1 : index
    %c1024_109 = arith.constant 1024 : index
    %177 = vector.load %arg11[%c1_108, %c1024_109] : memref<2x4096xbf16, #tpu.memory_space<vmem>>, vector<1x128xbf16>
    tpu.vector_store %arg11[%c1_108, %c1024_109], %176 {strides = array<i32>} : memref<2x4096xbf16, #tpu.memory_space<vmem>>, vector<1x128xbf16>,
    %178 = vector.extract_strided_slice %95 {offsets = [9, 128], sizes = [1, 128], strides = [1, 1]} : vector<32x256xbf16> to vector<1x128xbf16>
    %c1_110 = arith.constant 1 : index
    %c1152_111 = arith.constant 1152 : index
    %179 = vector.load %arg11[%c1_110, %c1152_111] : memref<2x4096xbf16, #tpu.memory_space<vmem>>, vector<1x128xbf16>
    tpu.vector_store %arg11[%c1_110, %c1152_111], %178 {strides = array<i32>} : memref<2x4096xbf16, #tpu.memory_space<vmem>>, vector<1x128xbf16>,
    %180 = vector.extract_strided_slice %95 {offsets = [10, 128], sizes = [1, 128], strides = [1, 1]} : vector<32x256xbf16> to vector<1x128xbf16>
    %c1_112 = arith.constant 1 : index
    %c1280_113 = arith.constant 1280 : index
    %181 = vector.load %arg11[%c1_112, %c1280_113] : memref<2x4096xbf16, #tpu.memory_space<vmem>>, vector<1x128xbf16>
    tpu.vector_store %arg11[%c1_112, %c1280_113], %180 {strides = array<i32>} : memref<2x4096xbf16, #tpu.memory_space<vmem>>, vector<1x128xbf16>,
    %182 = vector.extract_strided_slice %95 {offsets = [11, 128], sizes = [1, 128], strides = [1, 1]} : vector<32x256xbf16> to vector<1x128xbf16>
    %c1_114 = arith.constant 1 : index
    %c1408_115 = arith.constant 1408 : index
    %183 = vector.load %arg11[%c1_114, %c1408_115] : memref<2x4096xbf16, #tpu.memory_space<vmem>>, vector<1x128xbf16>
    tpu.vector_store %arg11[%c1_114, %c1408_115], %182 {strides = array<i32>} : memref<2x4096xbf16, #tpu.memory_space<vmem>>, vector<1x128xbf16>,
    %184 = vector.extract_strided_slice %95 {offsets = [12, 128], sizes = [1, 128], strides = [1, 1]} : vector<32x256xbf16> to vector<1x128xbf16>
    %c1_116 = arith.constant 1 : index
    %c1536_117 = arith.constant 1536 : index
    %185 = vector.load %arg11[%c1_116, %c1536_117] : memref<2x4096xbf16, #tpu.memory_space<vmem>>, vector<1x128xbf16>
    tpu.vector_store %arg11[%c1_116, %c1536_117], %184 {strides = array<i32>} : memref<2x4096xbf16, #tpu.memory_space<vmem>>, vector<1x128xbf16>,
    %186 = vector.extract_strided_slice %95 {offsets = [13, 128], sizes = [1, 128], strides = [1, 1]} : vector<32x256xbf16> to vector<1x128xbf16>
    %c1_118 = arith.constant 1 : index
    %c1664_119 = arith.constant 1664 : index
    %187 = vector.load %arg11[%c1_118, %c1664_119] : memref<2x4096xbf16, #tpu.memory_space<vmem>>, vector<1x128xbf16>
    tpu.vector_store %arg11[%c1_118, %c1664_119], %186 {strides = array<i32>} : memref<2x4096xbf16, #tpu.memory_space<vmem>>, vector<1x128xbf16>,
    %188 = vector.extract_strided_slice %95 {offsets = [14, 128], sizes = [1, 128], strides = [1, 1]} : vector<32x256xbf16> to vector<1x128xbf16>
    %c1_120 = arith.constant 1 : index
    %c1792_121 = arith.constant 1792 : index
    %189 = vector.load %arg11[%c1_120, %c1792_121] : memref<2x4096xbf16, #tpu.memory_space<vmem>>, vector<1x128xbf16>
    tpu.vector_store %arg11[%c1_120, %c1792_121], %188 {strides = array<i32>} : memref<2x4096xbf16, #tpu.memory_space<vmem>>, vector<1x128xbf16>,
    %190 = vector.extract_strided_slice %95 {offsets = [15, 128], sizes = [1, 128], strides = [1, 1]} : vector<32x256xbf16> to vector<1x128xbf16>
    %c1_122 = arith.constant 1 : index
    %c1920_123 = arith.constant 1920 : index
    %191 = vector.load %arg11[%c1_122, %c1920_123] : memref<2x4096xbf16, #tpu.memory_space<vmem>>, vector<1x128xbf16>
    tpu.vector_store %arg11[%c1_122, %c1920_123], %190 {strides = array<i32>} : memref<2x4096xbf16, #tpu.memory_space<vmem>>, vector<1x128xbf16>,
    %192 = vector.extract_strided_slice %95 {offsets = [16, 128], sizes = [1, 128], strides = [1, 1]} : vector<32x256xbf16> to vector<1x128xbf16>
    %c1_124 = arith.constant 1 : index
    %c2048_125 = arith.constant 2048 : index
    %193 = vector.load %arg11[%c1_124, %c2048_125] : memref<2x4096xbf16, #tpu.memory_space<vmem>>, vector<1x128xbf16>
    tpu.vector_store %arg11[%c1_124, %c2048_125], %192 {strides = array<i32>} : memref<2x4096xbf16, #tpu.memory_space<vmem>>, vector<1x128xbf16>,
    %194 = vector.extract_strided_slice %95 {offsets = [17, 128], sizes = [1, 128], strides = [1, 1]} : vector<32x256xbf16> to vector<1x128xbf16>
    %c1_126 = arith.constant 1 : index
    %c2176_127 = arith.constant 2176 : index
    %195 = vector.load %arg11[%c1_126, %c2176_127] : memref<2x4096xbf16, #tpu.memory_space<vmem>>, vector<1x128xbf16>
    tpu.vector_store %arg11[%c1_126, %c2176_127], %194 {strides = array<i32>} : memref<2x4096xbf16, #tpu.memory_space<vmem>>, vector<1x128xbf16>,
    %196 = vector.extract_strided_slice %95 {offsets = [18, 128], sizes = [1, 128], strides = [1, 1]} : vector<32x256xbf16> to vector<1x128xbf16>
    %c1_128 = arith.constant 1 : index
    %c2304_129 = arith.constant 2304 : index
    %197 = vector.load %arg11[%c1_128, %c2304_129] : memref<2x4096xbf16, #tpu.memory_space<vmem>>, vector<1x128xbf16>
    tpu.vector_store %arg11[%c1_128, %c2304_129], %196 {strides = array<i32>} : memref<2x4096xbf16, #tpu.memory_space<vmem>>, vector<1x128xbf16>,
    %198 = vector.extract_strided_slice %95 {offsets = [19, 128], sizes = [1, 128], strides = [1, 1]} : vector<32x256xbf16> to vector<1x128xbf16>
    %c1_130 = arith.constant 1 : index
    %c2432_131 = arith.constant 2432 : index
    %199 = vector.load %arg11[%c1_130, %c2432_131] : memref<2x4096xbf16, #tpu.memory_space<vmem>>, vector<1x128xbf16>
    tpu.vector_store %arg11[%c1_130, %c2432_131], %198 {strides = array<i32>} : memref<2x4096xbf16, #tpu.memory_space<vmem>>, vector<1x128xbf16>,
    %200 = vector.extract_strided_slice %95 {offsets = [20, 128], sizes = [1, 128], strides = [1, 1]} : vector<32x256xbf16> to vector<1x128xbf16>
    %c1_132 = arith.constant 1 : index
    %c2560_133 = arith.constant 2560 : index
    %201 = vector.load %arg11[%c1_132, %c2560_133] : memref<2x4096xbf16, #tpu.memory_space<vmem>>, vector<1x128xbf16>
    tpu.vector_store %arg11[%c1_132, %c2560_133], %200 {strides = array<i32>} : memref<2x4096xbf16, #tpu.memory_space<vmem>>, vector<1x128xbf16>,
    %202 = vector.extract_strided_slice %95 {offsets = [21, 128], sizes = [1, 128], strides = [1, 1]} : vector<32x256xbf16> to vector<1x128xbf16>
    %c1_134 = arith.constant 1 : index
    %c2688_135 = arith.constant 2688 : index
    %203 = vector.load %arg11[%c1_134, %c2688_135] : memref<2x4096xbf16, #tpu.memory_space<vmem>>, vector<1x128xbf16>
    tpu.vector_store %arg11[%c1_134, %c2688_135], %202 {strides = array<i32>} : memref<2x4096xbf16, #tpu.memory_space<vmem>>, vector<1x128xbf16>,
    %204 = vector.extract_strided_slice %95 {offsets = [22, 128], sizes = [1, 128], strides = [1, 1]} : vector<32x256xbf16> to vector<1x128xbf16>
    %c1_136 = arith.constant 1 : index
    %c2816_137 = arith.constant 2816 : index
    %205 = vector.load %arg11[%c1_136, %c2816_137] : memref<2x4096xbf16, #tpu.memory_space<vmem>>, vector<1x128xbf16>
    tpu.vector_store %arg11[%c1_136, %c2816_137], %204 {strides = array<i32>} : memref<2x4096xbf16, #tpu.memory_space<vmem>>, vector<1x128xbf16>,
    %206 = vector.extract_strided_slice %95 {offsets = [23, 128], sizes = [1, 128], strides = [1, 1]} : vector<32x256xbf16> to vector<1x128xbf16>
    %c1_138 = arith.constant 1 : index
    %c2944_139 = arith.constant 2944 : index
    %207 = vector.load %arg11[%c1_138, %c2944_139] : memref<2x4096xbf16, #tpu.memory_space<vmem>>, vector<1x128xbf16>
    tpu.vector_store %arg11[%c1_138, %c2944_139], %206 {strides = array<i32>} : memref<2x4096xbf16, #tpu.memory_space<vmem>>, vector<1x128xbf16>,
    %208 = vector.extract_strided_slice %95 {offsets = [24, 128], sizes = [1, 128], strides = [1, 1]} : vector<32x256xbf16> to vector<1x128xbf16>
    %c1_140 = arith.constant 1 : index
    %c3072_141 = arith.constant 3072 : index
    %209 = vector.load %arg11[%c1_140, %c3072_141] : memref<2x4096xbf16, #tpu.memory_space<vmem>>, vector<1x128xbf16>
    tpu.vector_store %arg11[%c1_140, %c3072_141], %208 {strides = array<i32>} : memref<2x4096xbf16, #tpu.memory_space<vmem>>, vector<1x128xbf16>,
    %210 = vector.extract_strided_slice %95 {offsets = [25, 128], sizes = [1, 128], strides = [1, 1]} : vector<32x256xbf16> to vector<1x128xbf16>
    %c1_142 = arith.constant 1 : index
    %c3200_143 = arith.constant 3200 : index
    %211 = vector.load %arg11[%c1_142, %c3200_143] : memref<2x4096xbf16, #tpu.memory_space<vmem>>, vector<1x128xbf16>
    tpu.vector_store %arg11[%c1_142, %c3200_143], %210 {strides = array<i32>} : memref<2x4096xbf16, #tpu.memory_space<vmem>>, vector<1x128xbf16>,
    %212 = vector.extract_strided_slice %95 {offsets = [26, 128], sizes = [1, 128], strides = [1, 1]} : vector<32x256xbf16> to vector<1x128xbf16>
    %c1_144 = arith.constant 1 : index
    %c3328_145 = arith.constant 3328 : index
    %213 = vector.load %arg11[%c1_144, %c3328_145] : memref<2x4096xbf16, #tpu.memory_space<vmem>>, vector<1x128xbf16>
    tpu.vector_store %arg11[%c1_144, %c3328_145], %212 {strides = array<i32>} : memref<2x4096xbf16, #tpu.memory_space<vmem>>, vector<1x128xbf16>,
    %214 = vector.extract_strided_slice %95 {offsets = [27, 128], sizes = [1, 128], strides = [1, 1]} : vector<32x256xbf16> to vector<1x128xbf16>
    %c1_146 = arith.constant 1 : index
    %c3456_147 = arith.constant 3456 : index
    %215 = vector.load %arg11[%c1_146, %c3456_147] : memref<2x4096xbf16, #tpu.memory_space<vmem>>, vector<1x128xbf16>
    tpu.vector_store %arg11[%c1_146, %c3456_147], %214 {strides = array<i32>} : memref<2x4096xbf16, #tpu.memory_space<vmem>>, vector<1x128xbf16>,
    %216 = vector.extract_strided_slice %95 {offsets = [28, 128], sizes = [1, 128], strides = [1, 1]} : vector<32x256xbf16> to vector<1x128xbf16>
    %c1_148 = arith.constant 1 : index
    %c3584_149 = arith.constant 3584 : index
    %217 = vector.load %arg11[%c1_148, %c3584_149] : memref<2x4096xbf16, #tpu.memory_space<vmem>>, vector<1x128xbf16>
    tpu.vector_store %arg11[%c1_148, %c3584_149], %216 {strides = array<i32>} : memref<2x4096xbf16, #tpu.memory_space<vmem>>, vector<1x128xbf16>,
    %218 = vector.extract_strided_slice %95 {offsets = [29, 128], sizes = [1, 128], strides = [1, 1]} : vector<32x256xbf16> to vector<1x128xbf16>
    %c1_150 = arith.constant 1 : index
    %c3712_151 = arith.constant 3712 : index
    %219 = vector.load %arg11[%c1_150, %c3712_151] : memref<2x4096xbf16, #tpu.memory_space<vmem>>, vector<1x128xbf16>
    tpu.vector_store %arg11[%c1_150, %c3712_151], %218 {strides = array<i32>} : memref<2x4096xbf16, #tpu.memory_space<vmem>>, vector<1x128xbf16>,
    %220 = vector.extract_strided_slice %95 {offsets = [30, 128], sizes = [1, 128], strides = [1, 1]} : vector<32x256xbf16> to vector<1x128xbf16>
    %c1_152 = arith.constant 1 : index
    %c3840_153 = arith.constant 3840 : index
    %221 = vector.load %arg11[%c1_152, %c3840_153] : memref<2x4096xbf16, #tpu.memory_space<vmem>>, vector<1x128xbf16>
    tpu.vector_store %arg11[%c1_152, %c3840_153], %220 {strides = array<i32>} : memref<2x4096xbf16, #tpu.memory_space<vmem>>, vector<1x128xbf16>,
    %222 = vector.extract_strided_slice %95 {offsets = [31, 128], sizes = [1, 128], strides = [1, 1]} : vector<32x256xbf16> to vector<1x128xbf16>
    %c1_154 = arith.constant 1 : index
    %c3968_155 = arith.constant 3968 : index
    %223 = vector.load %arg11[%c1_154, %c3968_155] : memref<2x4096xbf16, #tpu.memory_space<vmem>>, vector<1x128xbf16>
    tpu.vector_store %arg11[%c1_154, %c3968_155], %222 {strides = array<i32>} : memref<2x4096xbf16, #tpu.memory_space<vmem>>, vector<1x128xbf16>,
    %c0_156 = arith.constant 0 : index
    %c0_157 = arith.constant 0 : index
    %224 = vector.load %arg11[%c0_156, %c0_157] : memref<2x4096xbf16, #tpu.memory_space<vmem>>, vector<2x4096xbf16>
    %c0_158 = arith.constant 0 : index
    %c0_159 = arith.constant 0 : index
    %225 = vector.load %arg6[%c0_158, %c0_159] : memref<4096x256xbf16, #tpu.memory_space<vmem>>, vector<4096x256xbf16>
    %cst_160 = arith.constant dense<0.000000e+00> : vector<2x256xf32>
    %226 = tpu.matmul %224, %225, %cst_160 {dimension_numbers = #tpu.dot_dimension_numbers<[1], [0], [0], [1], [0, 0, 1, 1], [], []>} : vector<2x4096xbf16>, vector<4096x256xbf16>, vector<2x256xf32> -> vector<2x256xf32>
    %c0_161 = arith.constant 0 : index
    %c0_162 = arith.constant 0 : index
    %227 = vector.load %arg7[%c0_161, %c0_162] : memref<1x256xf32, #tpu.memory_space<vmem>>, vector<1x256xf32>
    %228 = vector.broadcast %227 : vector<1x256xf32> to vector<2x256xf32>
    %229 = arith.addf %226, %228 : vector<2x256xf32>
    %cst_163 = arith.constant 0.000000e+00 : f32
    %230 = vector.broadcast %cst_163 : f32 to vector<2x256xf32>
    %231 = arith.maximumf %229, %230 : vector<2x256xf32>
    %c0_164 = arith.constant 0 : index
    %c0_165 = arith.constant 0 : index
    %232 = vector.load %arg8[%c0_164, %c0_165] : memref<256x5xf32, #tpu.memory_space<vmem>>, vector<256x5xf32>
    %cst_166 = arith.constant dense<0.000000e+00> : vector<2x5xf32>
    %233 = tpu.matmul %231, %232, %cst_166 {dimension_numbers = #tpu.dot_dimension_numbers<[1], [0], [0], [1], [0, 0, 1, 1], [], []>} : vector<2x256xf32>, vector<256x5xf32>, vector<2x5xf32> -> vector<2x5xf32>
    %c0_167 = arith.constant 0 : index
    %c0_168 = arith.constant 0 : index
    %234 = vector.load %arg9[%c0_167, %c0_168] : memref<1x5xf32, #tpu.memory_space<vmem>>, vector<1x5xf32>
    %235 = vector.broadcast %234 : vector<1x5xf32> to vector<2x5xf32>
    %236 = arith.addf %233, %235 : vector<2x5xf32>
    %c0_169 = arith.constant 0 : index
    %c0_170 = arith.constant 0 : index
    %237 = vector.load %arg10[%c0_169, %c0_170] : memref<2x5xf32, #tpu.memory_space<vmem>>, vector<2x5xf32>
    tpu.vector_store %arg10[%c0_169, %c0_170], %236 {strides = array<i32>} : memref<2x5xf32, #tpu.memory_space<vmem>>, vector<2x5xf32>,
    return
  }
  func.func @transform_0(%arg0: i32) -> (i32, i32) {
    %c0_i32 = arith.constant 0 : i32
    %c0_i32_0 = arith.constant 0 : i32
    return %c0_i32, %arg0 : i32, i32
  }
  func.func @transform_1(%arg0: i32) -> (i32, i32) {
    %c0_i32 = arith.constant 0 : i32
    %c0_i32_0 = arith.constant 0 : i32
    %c0_i32_1 = arith.constant 0 : i32
    return %c0_i32, %c0_i32_0 : i32, i32
  }
  func.func @transform_2(%arg0: i32) -> (i32, i32) {
    %c0_i32 = arith.constant 0 : i32
    %c0_i32_0 = arith.constant 0 : i32
    %c0_i32_1 = arith.constant 0 : i32
    return %c0_i32, %c0_i32_0 : i32, i32
  }
  func.func @transform_3(%arg0: i32) -> (i32, i32, i32) {
    %c0_i32 = arith.constant 0 : i32
    %c0_i32_0 = arith.constant 0 : i32
    %c0_i32_1 = arith.constant 0 : i32
    %c0_i32_2 = arith.constant 0 : i32
    return %c0_i32, %c0_i32_0, %c0_i32_1 : i32, i32, i32
  }
  func.func @transform_4(%arg0: i32) -> (i32, i32) {
    %c0_i32 = arith.constant 0 : i32
    %c0_i32_0 = arith.constant 0 : i32
    %c0_i32_1 = arith.constant 0 : i32
    return %c0_i32, %c0_i32_0 : i32, i32
  }
  func.func @transform_5(%arg0: i32) -> (i32, i32) {
    %c0_i32 = arith.constant 0 : i32
    %c0_i32_0 = arith.constant 0 : i32
    %c0_i32_1 = arith.constant 0 : i32
    return %c0_i32, %c0_i32_0 : i32, i32
  }
  func.func @transform_6(%arg0: i32) -> (i32, i32) {
    %c0_i32 = arith.constant 0 : i32
    %c0_i32_0 = arith.constant 0 : i32
    %c0_i32_1 = arith.constant 0 : i32
    return %c0_i32, %c0_i32_0 : i32, i32
  }
  func.func @transform_7(%arg0: i32) -> (i32, i32) {
    %c0_i32 = arith.constant 0 : i32
    %c0_i32_0 = arith.constant 0 : i32
    %c0_i32_1 = arith.constant 0 : i32
    return %c0_i32, %c0_i32_0 : i32, i32
  }
  func.func @transform_8(%arg0: i32) -> (i32, i32) {
    %c0_i32 = arith.constant 0 : i32
    %c0_i32_0 = arith.constant 0 : i32
    %c0_i32_1 = arith.constant 0 : i32
    return %c0_i32, %c0_i32_0 : i32, i32
  }
  func.func @transform_9(%arg0: i32) -> (i32, i32) {
    %c0_i32 = arith.constant 0 : i32
    %c0_i32_0 = arith.constant 0 : i32
    return %arg0, %c0_i32 : i32, i32
  }
}

</mosaic_0001>

<bundles_post_ra>
// kernel: racing_net_forward.2
= control target key start
LH: loop header
LB: loop body
LE: loop exit
PB: predicated region body
PF: predicated region fallthrough
CT: control target
= control target key end

     0   :  { %s11860_s0 = inlined_call_operand.vmem [shape: bf16[16,64], index: 0, kind: input, shape index: {}]   ;;  %s11861_s1 = inlined_call_operand.vmem [shape: f32[16,1], index: 1, kind: input, shape index: {}]   ;;  %s11862_s2 = inlined_call_operand.vmem [shape: bf16[16,32,16], index: 2, kind: input, shape index: {}]   ;;  %s11863_s3 = inlined_call_operand.vmem [shape: f32[32,1], index: 3, kind: input, shape index: {}]   ;;  %s11864_s4 = inlined_call_operand.vmem [shape: bf16[4096,256], index: 4, kind: input, shape index: {}]   ;;  %s11865_s5 = inlined_call_operand.vmem [shape: f32[1,256], index: 5, kind: input, shape index: {}]   ;;  %s11866_s6 = inlined_call_operand.vmem [shape: f32[256,5], index: 6, kind: input, shape index: {}]   ;;  %s11867_s7 = inlined_call_operand.vmem [shape: f32[1,5], index: 7, kind: input, shape index: {}]   ;;  %s11868_s8 = inlined_call_operand.vmem [shape: bf16[64,1,1024], index: 8, kind: input, shape index: {}]   ;;  %s11869_s9 = inlined_call_operand.<no memory space> [shape: bf16[], index: 9, kind: input, shape index: {}]   ;;  %s11870_s10 = inlined_call_operand.hbm [shape: f32[2,5], index: 10, kind: output, shape index: {}]  }
   0x1   :  { %v15_v0 = vstv %s11869_s9 }
   0x2   :  { %v9450_v1 = vunpack.i.l.bf16 %v15_v0 }
   0x3   :  { %v8521_v2 = vld [vmem:[%s11868_s8 + $0x8] sm:$0xff]   ;;  %v9384_v4 = vmov 0   ;;  %v39_v6 = vld [vmem:[%s11868_s8] sm:$0xff]   ;;  %v8540_v52 = vld [vmem:[%s11868_s8 + $0x18] sm:$0xff]   ;;  %vm897_vm0 = vcmask 523264   ;;  %vm9386_vm1 = vmmov 0  }
   0x4   :  { %v8522_v3 = vld [vmem:[%s11868_s8 + $0x24] sm:$0xff]   ;;  %976 = vmatprep.mubr.bf16.mxu1 %v9384_v4  ;;  %933 = vmatprep.mubr.bf16.mxu0 %v9384_v4  ;;  %v8523_v5 = vld [vmem:[%s11868_s8 + $0x2c] sm:$0xff]   ;;  %v7290_v7 = vld [vmem:[%s11868_s8 + $0x20] ss:$28 sps:$4 sm:$0xff]   ;;  %44 = vst [vmem:[#allocation10] sm:$0xff] %v39_v6  }
   0x5   :  { %8519 = vset.pattern.permute.xlu0 %v9384_v4  ;;  %8520 = vset.pattern.permute.xlu1 %v9384_v4  ;;  %8069 = vst [vmem:[#allocation10 + $0x28] sm:$0xff] %v8522_v3   ;;  %8074 = vst [vmem:[#allocation10 + $0x30] sm:$0xff] %v8523_v5   ;;  %v8062_v8 = vunpack.c.l.bf16 %v7290_v7  ;;  %v8527_v9 = vld [vmem:[%s11868_s8 + $0x48] sm:$0xff]   ;;  %v8081_v10 = vunpack.c.h.bf16 %v7290_v7  ;;  %v8530_v15 = vld [vmem:[%s11868_s8 + $0x40] sm:$0xff]  }
   0x6   :  { %v8528_v11 = vld [vmem:[%s11868_s8 + $0x64] sm:$0xff]   ;;  %v8529_v13 = vld [vmem:[%s11868_s8 + $0x6c] sm:$0xff]   ;;  %v7306_v16 = vld [vmem:[%s11868_s8 + $0x60] ss:$28 sps:$4 sm:$0xff]  }
   0x7   :  { %v8063_v12 = vpack.c.bf16 %v8062_v8, %v9450_v1  ;;  %v8083_v14 = vpack.c.bf16 %v9450_v1, %v8081_v10  ;;  %8114 = vst [vmem:[#allocation10 + $0x70] sm:$0xff] %v8528_v11   ;;  %8119 = vst [vmem:[#allocation10 + $0x78] sm:$0xff] %v8529_v13   ;;  %v8107_v17 = vunpack.c.l.bf16 %v7306_v16  ;;  %v8531_v18 = vld [vmem:[%s11868_s8 + $0x88] sm:$0xff]   ;;  %v8126_v19 = vunpack.c.h.bf16 %v7306_v16  ;;  %v8534_v27 = vld [vmem:[%s11868_s8 + $0x80] sm:$0xff]  }
   0x8   :  { %v8532_v20 = vld [vmem:[%s11868_s8 + $0xa4] sm:$0xff]   ;;  %v8533_v22 = vld [vmem:[%s11868_s8 + $0xac] sm:$0xff]   ;;  %v7322_v28 = vld [vmem:[%s11868_s8 + $0xa0] ss:$28 sps:$4 sm:$0xff]  }
   0x9   :  { %8064 = vst [vmem:[#allocation10 + $0x20] sm:$0xff] %v8063_v12   ;;  %8084 = vst [vmem:[#allocation10 + $0x40] sm:$0xff] %v8083_v14   ;;  %v8108_v21 = vpack.c.bf16 %v8107_v17, %v9450_v1  ;;  %v8128_v23 = vpack.c.bf16 %v9450_v1, %v8126_v19  ;;  %v8152_v29 = vunpack.c.l.bf16 %v7322_v28  ;;  %v8535_v30 = vld [vmem:[%s11868_s8 + $0xc8] sm:$0xff]   ;;  %v8171_v31 = vunpack.c.h.bf16 %v7322_v28  ;;  %v8538_v41 = vld [vmem:[%s11868_s8 + $0xc0] sm:$0xff]  }
   0xa   :  { %8159 = vst [vmem:[#allocation10 + $0xb8] sm:$0xff] %v8532_v20   ;;  %8164 = vst [vmem:[#allocation10 + $0xc0] sm:$0xff] %v8533_v22   ;;  %v8536_v32 = vld [vmem:[%s11868_s8 + $0xe4] sm:$0xff]   ;;  %v8537_v40 = vld [vmem:[%s11868_s8 + $0xec] sm:$0xff]  }
   0xb   :  { %8109 = vst [vmem:[#allocation10 + $0x68] sm:$0xff] %v8108_v21   ;;  %8129 = vst [vmem:[#allocation10 + $0x88] sm:$0xff] %v8128_v23   ;;  %v8153_v35 = vpack.c.bf16 %v8152_v29, %v9450_v1  ;;  %v8173_v36 = vpack.c.bf16 %v9450_v1, %v8171_v31  ;;  %v7338_v42 = vld [vmem:[%s11868_s8 + $0xe0] ss:$28 sps:$4 sm:$0xff]   ;;  %v8541_v54 = vld [vmem:[%s11868_s8 + $0x34] sm:$0xff]  }
   0xc   :  { %v662_v24 = vld [vmem:[#allocation10 + $0x2c] sm:$0xff]  ;;  %v8524_v33 = vld [vmem:[#allocation10 + $0x4] ss:$36 sps:$4 sm:$0xff]   ;;  %8204 = vst [vmem:[#allocation10 + $0x100] sm:$0xff] %v8536_v32   ;;  %8209 = vst [vmem:[#allocation10 + $0x108] sm:$0xff] %v8537_v40   ;;  %v8197_v45 = vunpack.c.l.bf16 %v7338_v42  ;;  %v8216_v46 = vunpack.c.h.bf16 %v7338_v42 }
   0xd   :  { %v7350_v25 = vcombine.high %v8521_v2, %v662_v24  ;;  %v7349_v26 = vcombine.low %v8521_v2, %v662_v24  ;;  %901 = vmatprep.subr.bf16.mxu0 %v8524_v33  ;;  %8154 = vst [vmem:[#allocation10 + $0xb0] sm:$0xff] %v8153_v35   ;;  %8174 = vst [vmem:[#allocation10 + $0xd0] sm:$0xff] %v8173_v36   ;;  %v8542_v55 = vld [vmem:[%s11868_s8 + $0x10] sm:$0xff]   ;;  %v8543_v57 = vld [vmem:[%s11868_s8 + $0x58] sm:$0xff]  }
   0xe   :  { %v672_v37 = vld [vmem:[#allocation10 + $0x74] sm:$0xff]  ;;  %v8198_v51 = vpack.c.bf16 %v8197_v45, %v9450_v1  ;;  %v8218_v53 = vpack.c.bf16 %v9450_v1, %v8216_v46  ;;  %8079 = vst [vmem:[#allocation10 + $0x38] sm:$0xff] %v8541_v54   ;;  %v9545_v1 = vld [vmem:[%s11860_s0] sm:$0xff]  }
   0xf   :  { %944 = vmatprep.subr.bf16.mxu1 %v7350_v25  ;;  %v7359_v38 = vcombine.high %v8527_v9, %v672_v37  ;;  %v7358_v39 = vcombine.low %v8527_v9, %v672_v37  ;;  %v8544_v60 = vld [vmem:[%s11868_s8 + $0x74] sm:$0xff]   ;;  %v696_v29 = vld [vmem:[%s11861_s1] sm:$0xff] }
  0x10   :  { %945 = vmatpush1.bf16.msra.mxu1 %v7349_v26  ;;  %v8526_v34 = vld [vmem:[#allocation10] ss:$36 sps:$4 sm:$0xff]   ;;  %8199 = vst [vmem:[#allocation10 + $0xf8] sm:$0xff] %v8198_v51   ;;  %8219 = vst [vmem:[#allocation10 + $0x118] sm:$0xff] %v8218_v53   ;;  %v8545_v62 = vld [vmem:[%s11868_s8 + $0x50] sm:$0xff]   ;;  %700 = vperm.xlu0 %8519, %v696_v29  }
  0x11   :  { %902 = vmatpush1.bf16.msra.mxu0 %v8526_v34  ;;  %946 = vmatprep.subr.bf16.mxu1 %v7359_v38  ;;  %v682_v44 = vld [vmem:[#allocation10 + $0xbc] sm:$0xff]  ;;  %8124 = vst [vmem:[#allocation10 + $0x80] sm:$0xff] %v8544_v60   ;;  %v8547_v3 = vld [vmem:[%s11868_s8 + $0xb4] sm:$0xff]  }
  0x12   :  { %v671_v43 = vld [vmem:[#allocation10 + $0x6c] sm:$0xff]  ;;  %v7368_v49 = vcombine.high %v8531_v18, %v682_v44  ;;  %v7367_v50 = vcombine.low %v8531_v18, %v682_v44  ;;  %v8546_v2 = vld [vmem:[%s11868_s8 + $0x98] sm:$0xff]   ;;  %8169 = vst [vmem:[#allocation10 + $0xc8] sm:$0xff] %v8547_v3   ;;  %v8552_v38 = vld [vmem:[#allocation10 + $0x20] ss:$36 sps:$4 sm:$0xff]  }
  0x13   :  { %v7357_v47 = vcombine.high %v8530_v15, %v671_v43  ;;  %v7356_v48 = vcombine.low %v8530_v15, %v671_v43  ;;  %v692_v61 = vld [vmem:[#allocation10 + $0x104] sm:$0xff]  ;;  %v8548_v5 = vld [vmem:[%s11868_s8 + $0x90] sm:$0xff]   ;;  %v8549_v11 = vld [vmem:[%s11868_s8 + $0xd8] sm:$0xff]  }
  0x14   :  { %947 = vmatpush1.bf16.msra.mxu1 %v7358_v39  ;;  %v681_v56 = vld [vmem:[#allocation10 + $0xb4] sm:$0xff]  ;;  %v7377_v63 = vcombine.high %v8535_v30, %v692_v61  ;;  %v7376_v0 = vcombine.low %v8535_v30, %v692_v61  ;;  %v697_v30 = vld [vmem:[%s11861_s1 + $0x8] sm:$0xff]  ;;  %v9385_v39 = vmov 0.0  }
  0x15   :  { %903 = vmatprep.subr.bf16.mxu0 %v7357_v47  ;;  %948 = vmatprep.subr.bf16.mxu1 %v7368_v49  ;;  %v7366_v58 = vcombine.high %v8534_v27, %v681_v56  ;;  %v7365_v59 = vcombine.low %v8534_v27, %v681_v56  ;;  %v664_v9 = vld [vmem:[#allocation10 + $0x3c] sm:$0xff]  ;;  %v663_v10 = vld [vmem:[#allocation10 + $0x34] sm:$0xff]  ;;  %v8553_v40 = vld [vmem:[#allocation10 + $0x68] ss:$36 sps:$4 sm:$0xff]  }
  0x16   :  { %904 = vmatpush1.bf16.msra.mxu0 %v7356_v48  ;;  %v7353_v12 = vcombine.low %v8540_v52, %v664_v9  ;;  %v7354_v13 = vcombine.high %v8540_v52, %v664_v9  ;;  %v7352_v14 = vcombine.high %v8542_v55, %v663_v10  ;;  %v8550_v15 = vld [vmem:[%s11868_s8 + $0xf4] sm:$0xff]   ;;  %v7351_v17 = vcombine.low %v8542_v55, %v663_v10 }
  0x17   :  { %905 = vmatprep.subr.bf16.mxu0 %v7366_v58  ;;  %v691_v6 = vld [vmem:[#allocation10 + $0xfc] sm:$0xff]  ;;  %v8551_v16 = vld [vmem:[%s11868_s8 + $0xd0] sm:$0xff]   ;;  %8214 = vst [vmem:[#allocation10 + $0x110] sm:$0xff] %v8550_v15   ;;  %705 = vperm.xlu0 %8519, %v697_v30  }
  0x18   :  { %949 = vmatpush1.bf16.msra.mxu1 %v7367_v50  ;;  %v7375_v7 = vcombine.high %v8538_v41, %v691_v6  ;;  %v7374_v8 = vcombine.low %v8538_v41, %v691_v6  ;;  %v674_v18 = vld [vmem:[#allocation10 + $0x84] sm:$0xff]  ;;  %v673_v19 = vld [vmem:[#allocation10 + $0x7c] sm:$0xff]  ;;  %v8554_v41 = vld [vmem:[#allocation10 + $0xb0] ss:$36 sps:$4 sm:$0xff]  }
  0x19   :  { %950 = vmatprep.subr.bf16.mxu1 %v7377_v63  ;;  %v7362_v20 = vcombine.low %v8543_v57, %v674_v18  ;;  %v7363_v21 = vcombine.high %v8543_v57, %v674_v18  ;;  %v7361_v22 = vcombine.high %v8545_v62, %v673_v19  ;;  %v684_v23 = vld [vmem:[#allocation10 + $0xcc] sm:$0xff]  ;;  %v683_v24 = vld [vmem:[#allocation10 + $0xc4] sm:$0xff]  ;;  %v7360_v25 = vcombine.low %v8545_v62, %v673_v19  ;;  %v8555_v42 = vld [vmem:[#allocation10 + $0xf8] ss:$36 sps:$4 sm:$0xff]  }
  0x1a   :  { %906 = vmatpush1.bf16.msra.mxu0 %v7365_v59  ;;  %v7372_v26 = vcombine.high %v8546_v2, %v684_v23  ;;  %v7371_v27 = vcombine.low %v8546_v2, %v684_v23  ;;  %v7370_v28 = vcombine.high %v8548_v5, %v683_v24  ;;  %v7369_v33 = vcombine.low %v8548_v5, %v683_v24 }
  0x1b   :  { %907 = vmatprep.subr.bf16.mxu0 %v7375_v7 }
  0x1c   :  { %951 = vmatpush1.bf16.msra.mxu1 %v7376_v0 }
  0x1d   :  { %1030 = vmatprep.subr.bf16.mxu1 %v7354_v13 }
  0x1e   :  { %908 = vmatpush1.bf16.msra.mxu0 %v7374_v8  ;;  %v694_v31 = vld [vmem:[#allocation10 + $0x114] sm:$0xff]  ;;  %v693_v32 = vld [vmem:[#allocation10 + $0x10c] sm:$0xff] }
  0x1f   :  { %7384 = vmatmul.mubr.msk.bf16.vlgmr.msra.gmra.mrb[0].mxu1 %vm897_vm0, %v9545_v1  ;;  %987 = vmatprep.subr.bf16.mxu0 %v7352_v14  ;;  %v7381_v34 = vcombine.high %v8549_v11, %v694_v31  ;;  %v7380_v35 = vcombine.low %v8549_v11, %v694_v31  ;;  %v7379_v36 = vcombine.high %v8551_v16, %v693_v32 }
  0x20   :  { %1031 = vmatpush1.bf16.msra.mxu1 %v7353_v12  ;;  %1062 = vmatprep.mubr.bf16.mxu1 %v9384_v4  ;;  %v7378_v37 = vcombine.low %v8551_v16, %v693_v32 }
  0x21   :  { %7383 = vmatmul.mubr.msk.bf16.vlgmr.msra.gmra.mrb[0].mxu0 %vm897_vm0, %v9545_v1  ;;  %1032 = vmatprep.subr.bf16.mxu1 %v7363_v21 }
  0x22   :  { %988 = vmatpush1.bf16.msra.mxu0 %v7351_v17  ;;  %1019 = vmatprep.mubr.bf16.mxu0 %v9384_v4 }
  0x23   :  { %989 = vmatprep.subr.bf16.mxu0 %v7361_v22 }
  0x24   :  { %1033 = vmatpush1.bf16.msra.mxu1 %v7362_v20 }
  0x25   :  { %1034 = vmatprep.subr.bf16.mxu1 %v7372_v26 }
  0x26   :  { %990 = vmatpush1.bf16.msra.mxu0 %v7360_v25 }
  0x27   :  { %991 = vmatprep.subr.bf16.mxu0 %v7370_v28 }
  0x28   :  { %1035 = vmatpush1.bf16.msra.mxu1 %v7371_v27 }
  0x29   :  { %1036 = vmatprep.subr.bf16.mxu1 %v7381_v34 }
  0x2a   :  { %992 = vmatpush1.bf16.msra.mxu0 %v7369_v33 }
  0x2b   :  { %993 = vmatprep.subr.bf16.mxu0 %v7379_v36 }
  0x2c   :  { %1037 = vmatpush1.bf16.msra.mxu1 %v7380_v35 }
  0x2e   :  { %994 = vmatpush1.bf16.msra.mxu0 %v7378_v37 }
  0x2f   :  { %7386 = vmatmul.mubr.msk.bf16.vlgmr.msra.gmra.mrb[4].mxu1 %vm897_vm0, %v9545_v1  ;;  %8287 = vmatprep.subr.bf16.mxu0 %v9385_v39 }
  0x30   :  { %1199 = vmatprep.mubr.bf16.mxu1 %v9384_v4 }
  0x31   :  { %7385 = vmatmul.mubr.msk.bf16.vlgmr.msra.gmra.mrb[4].mxu0 %vm897_vm0, %v9545_v1 }
  0x32   :  { %8288 = vmatpush3.bf16.msra.mxu0 %v8552_v38  ;;  %8295 = vmatprep.mubr.msk.bf16.mxu0 %vm9386_vm1, %v9385_v39 }
  0x33   :  { %8289 = vmatprep.subr.bf16.mxu0 %v9385_v39 }
  0x36   :  { %8290 = vmatpush3.bf16.msra.mxu0 %v8553_v40 }
  0x37   :  { %8291 = vmatprep.subr.bf16.mxu0 %v9385_v39 }
  0x3a   :  { %8292 = vmatpush3.bf16.msra.mxu0 %v8554_v41 }
  0x3b   :  { %8293 = vmatprep.subr.bf16.mxu0 %v9385_v39 }
  0x3e   :  { %8294 = vmatpush3.bf16.msra.mxu0 %v8555_v42 }
  0x41   :  { %8296 = vmatmul.mubr.msk.bf16.vlgmr.msra.gmra.mrb[8].mxu0 %vm897_vm0, %v9545_v1 }
  0x42   :  { %20 = vsyncpa [#allocation9], 0  ;;  %v8556_v9 = vld [vmem:[%s11862_s2 + $0x10] sm:$0xff]   ;;  %vm1160_vm2 = vcmask 130048   ;;  %s9387_s9 = smov 127   ;;  %v8557_v16 = vld [vmem:[%s11862_s2 + $0x18] sm:$0xff]  }
  0x43   :  { %v8558_v39 = vld [vmem:[%s11862_s2] sm:$0xff]   ;;  %v8559_v41 = vld [vmem:[%s11862_s2 + $0x8] sm:$0xff]   ;;  %s9388_s27 = smov 118   ;;  %s9389_s28 = smov 117   ;;  %vm1313_vm3 = vcmask 1039360   ;;  %vm1846_vm4 = vcmask 965632  }
  0x44   :  { %vm2029_vm5 = vcmask 957440   ;;  %vm2595_vm6 = vcmask 1040384   ;;  %vm2596_vm7 = vsmask.f32 256  ;;  %vm2923_vm9 = vsmask.f32 7938 }
  0x45   :  { %vm10066_vm8 = vmand %vm2595_vm6, %vm2596_vm7  ;;  %s9391_s1 = smov [#allocation8]   ;;  %vm7267_vm11 = vcmask 33792  }
  0x46   :  { %vm10119_vm10 = vmand %vm2595_vm6, %vm2923_vm9  ;;  %s7275_s20 = sshll.u32 %s9391_s1, 4  ;;  %s7276_s20 = int_to_ptr.vmem [resolvable:$true] %s7275_s20 }
  0x47   :  { %p9365_p1 = scmp.lt.s32.totalorder %s7276_s20, %s7276_s20 }
  0x8f   :  { %v9584_v43 = vpop.permute.xlu0 %700 }
  0x96   :  { %v9586_v45 = vpop.permute.xlu0 %705 }
  0xf2   :  { %v978_v44 = vpop.f32.mrb[0].mxu1 }
  0xf3   :  { %v979_v46 = vadd.f32 %v978_v44, %v9584_v43  ;;  %v980_v47 = vpop.f32.mrb[1].mxu1 }
  0xf4   :  { %v981_v48 = vadd.f32 %v980_v47, %v9584_v43  ;;  %v982_v49 = vpop.f32.mrb[2].mxu1  ;;  %v935_v53 = vpop.f32.mrb[0].mxu0 }
  0xf5   :  { %v1116_v50 = vmax.f32 %v979_v46, 0.0  ;;  %v983_v51 = vadd.f32 %v982_v49, %v9586_v45  ;;  %v984_v52 = vpop.f32.mrb[3].mxu1  ;;  %v936_v55 = vadd.f32 %v935_v53, %v9584_v43  ;;  %v937_v57 = vpop.f32.mrb[1].mxu0 }
  0xf6   :  { %v985_v54 = vadd.f32 %v984_v52, %v9586_v45  ;;  %v1117_v58 = vmax.f32 %v981_v48, 0.0  ;;  %v938_v59 = vadd.f32 %v937_v57, %v9584_v43  ;;  %v939_v61 = vpop.f32.mrb[2].mxu0 }
  0xf7   :  { %v1125_v56 = vmax.f32 %v983_v51, 0.0  ;;  %v940_v63 = vadd.f32 %v939_v61, %v9586_v45  ;;  %v941_v0 = vpop.f32.mrb[3].mxu0  ;;  %v1114_v3 = vmax.f32 %v936_v55, 0.0 }
  0xf8   :  { %v1126_v60 = vmax.f32 %v985_v54, 0.0  ;;  %v942_v2 = vadd.f32 %v941_v0, %v9586_v45  ;;  %v1115_v6 = vmax.f32 %v938_v59, 0.0  ;;  %v8561_v59 = vld [vmem:[%s11862_s2 + $0x28] sm:$0xff]   ;;  %v8562_v0 = vld [vmem:[%s11862_s2 + $0x30] sm:$0xff]  }
  0xf9   :  { %v9594_v62 = vpack.c.bf16 %v1125_v56, %v1116_v50  ;;  %v1123_v5 = vmax.f32 %v940_v63, 0.0 }
  0xfa   :  { %v9597_v1 = vpack.c.bf16 %v1126_v60, %v1117_v58  ;;  %v1124_v7 = vmax.f32 %v942_v2, 0.0  ;;  %v8560_v58 = vld [vmem:[%s11862_s2 + $0x20] sm:$0xff]  }
  0xfb   :  { %v9601_v8 = vpack.c.bf16 %v1123_v5, %v1114_v3  ;;  %v8564_v2 = vld [vmem:[%s11862_s2 + $0x40] sm:$0xff]  }
  0xfc   :  { %1167 = vmatprep.subr.bf16.mxu1 %v9597_v1  ;;  %v9607_v10 = vpack.c.bf16 %v1124_v7, %v1115_v6  ;;  %v8565_v7 = vld [vmem:[%s11862_s2 + $0x48] sm:$0xff]  }
  0xfd   :  { %1168 = vmatpush1.bf16.msra.mxu1 %v9594_v62  ;;  %1307 = vrot.lane.b32.xlu0 %v9601_v8, %s9387_s9 }
  0xfe   :  { %1309 = vrot.lane.b32.xlu1 %v9607_v10, %s9387_s9  ;;  %1236 = vmatprep.subr.bf16.mxu1 %v9607_v10 }
 0x100   :  { %7394 = vmatmul.mubr.msk.bf16.vlgmr.msra.gmra.mrb[8].mxu1 %vm1160_vm2, %v8556_v9 }
 0x101   :  { %1237 = vmatpush1.bf16.msra.mxu1 %v9601_v8  ;;  %1209 = vmatprep.mubr.bf16.mxu1 %v9384_v4 }
 0x102   :  { %v1064_v11 = vpop.f32.mrb[4].mxu1  ;;  %1311 = vrot.lane.b32.xlu1 %v9594_v62, %s9387_s9 }
 0x103   :  { %v1065_v12 = vadd.f32 %v1064_v11, %v9584_v43  ;;  %v1066_v13 = vpop.f32.mrb[5].mxu1 }
 0x104   :  { %v1067_v14 = vadd.f32 %v1066_v13, %v9584_v43  ;;  %v1068_v15 = vpop.f32.mrb[6].mxu1  ;;  %v1021_v17 = vpop.f32.mrb[4].mxu0  ;;  %v8567_v13 = vld [vmem:[%s11862_s2 + $0x58] sm:$0xff]  }
 0x105   :  { %v1069_v18 = vadd.f32 %v1068_v15, %v9586_v45  ;;  %v1070_v19 = vpop.f32.mrb[7].mxu1  ;;  %v1022_v20 = vadd.f32 %v1021_v17, %v9584_v43  ;;  %v1023_v21 = vpop.f32.mrb[5].mxu0  ;;  %v1120_v23 = vmax.f32 %v1065_v12, 0.0 }
 0x106   :  { %v1071_v22 = vadd.f32 %v1070_v19, %v9586_v45  ;;  %v1024_v25 = vadd.f32 %v1023_v21, %v9584_v43  ;;  %v1025_v26 = vpop.f32.mrb[6].mxu0  ;;  %1402 = vrot.lane.b32.xlu1 %v9597_v1, %s9387_s9  ;;  %v1121_v27 = vmax.f32 %v1067_v14, 0.0  ;;  %v8568_v14 = vld [vmem:[%s11862_s2 + $0x60] sm:$0xff]   ;;  %v8569_v19 = vld [vmem:[%s11862_s2 + $0x68] sm:$0xff]   ;;  %v8570_v21 = vld [vmem:[%s11862_s2 + $0x70] sm:$0xff]  }
 0x107   :  { %v1129_v24 = vmax.f32 %v1069_v18, 0.0  ;;  %v1026_v29 = vadd.f32 %v1025_v26, %v9586_v45  ;;  %v1027_v30 = vpop.f32.mrb[7].mxu0  ;;  %v1118_v33 = vmax.f32 %v1022_v20, 0.0  ;;  %v8571_v26 = vld [vmem:[%s11862_s2 + $0x78] sm:$0xff]  }
 0x108   :  { %v1130_v28 = vmax.f32 %v1071_v22, 0.0  ;;  %7395 = vmatmul.mubr.msk.bf16.gmra.mrb[12].mxu1 %vm1160_vm2, %v8557_v16  ;;  %v1028_v32 = vadd.f32 %v1027_v30, %v9586_v45  ;;  %v1119_v36 = vmax.f32 %v1024_v25, 0.0  ;;  %v2554_v30 = vld [vmem:[%s11863_s3 + $0x18] sm:$0xff] }
 0x109   :  { %v9632_v31 = vpack.c.bf16 %v1129_v24, %v1120_v23  ;;  %1268 = vmatprep.mubr.bf16.mxu1 %v9384_v4  ;;  %v1127_v35 = vmax.f32 %v1026_v29, 0.0  ;;  %v8593_v29 = vld [vmem:[%s11864_s4 + $0x604] ss:$8 sps:$4 sm:$0xff]  }
 0x10a   :  { %v9636_v34 = vpack.c.bf16 %v1130_v28, %v1121_v27  ;;  %v1128_v37 = vmax.f32 %v1028_v32, 0.0  ;;  %v2552_v27 = vld [vmem:[%s11863_s3 + $0x8] sm:$0xff]  ;;  %6746 = vmatprep.subr.bf16.mxu0 %v8593_v29  ;;  %v8572_v32 = vld [vmem:[%s11862_s2 + $0x80] sm:$0xff]   ;;  %v8623_v29 = vld [vmem:[%s11864_s4 + $0x654] ss:$8 sps:$4 sm:$0xff]  }
 0x10b   :  { %v9638_v38 = vpack.c.bf16 %v1127_v35, %v1118_v33  ;;  %v8591_v28 = vld [vmem:[%s11864_s4 + $0x600] ss:$8 sps:$4 sm:$0xff]   ;;  %v8597_v33 = vld [vmem:[%s11864_s4 + $0x610] ss:$8 sps:$4 sm:$0xff]   ;;  %v8605_v35 = vld [vmem:[%s11864_s4 + $0x624] ss:$8 sps:$4 sm:$0xff]  }
 0x10c   :  { %v9643_v40 = vpack.c.bf16 %v1128_v37, %v1119_v36  ;;  %6747 = vmatpush1.bf16.msra.mxu0 %v8591_v28  ;;  %v8618_v28 = vld [vmem:[%s11864_s4 + $0x50] ss:$8 sps:$4 sm:$0xff]  }
 0x10d   :  { %1404 = vrot.lane.b32.xlu0 %v9638_v38, %s9387_s9 }
 0x10e   :  { %1658 = vrot.lane.b32.xlu1 %v9643_v40, %s9387_s9 }
 0x110   :  { %7398 = vmatmul.mubr.msk.bf16.vlgmr.msra.gmra.mrb[8].mxu1 %vm1160_vm2, %v8558_v39 }
 0x111   :  { %1278 = vmatprep.mubr.bf16.mxu1 %v9384_v4  ;;  %1660 = vrot.lane.b32.xlu0 %v9632_v31, %s9387_s9 }
 0x112   :  { %1750 = vrot.lane.b32.xlu1 %v9636_v34, %s9387_s9 }
 0x114   :  { %v1107_v42 = vpop.f32.mrb[8].mxu0 }
 0x115   :  { %v1108_v44 = vadd.f32 %v1107_v42, %v9584_v43  ;;  %v8297_v46 = vpop.f32.mrb[9].mxu0  ;;  %v2553_v43 = vld [vmem:[%s11863_s3 + $0x10] sm:$0xff] }
 0x116   :  { %v1110_v47 = vpop.f32.mrb[10].mxu0  ;;  %1842 = vrot.lane.b32.xlu1 %v9607_v10, %s9388_s27  ;;  %v8609_v42 = vld [vmem:[%s11864_s4 + $0x630] ss:$8 sps:$4 sm:$0xff]  }
 0x117   :  { %v1111_v48 = vadd.f32 %v1110_v47, %v9586_v45  ;;  %v8298_v49 = vpop.f32.mrb[11].mxu0  ;;  %v1122_v50 = vmax.f32 %v1108_v44, 0.0  ;;  %v2551_v45 = vld [vmem:[%s11863_s3] sm:$0xff] }
 0x118   :  { %7399 = vmatmul.mubr.msk.bf16.gmra.mrb[12].mxu1 %vm1160_vm2, %v8559_v41  ;;  %v8573_v41 = vld [vmem:[%s11862_s2 + $0x88] sm:$0xff]  }
 0x119   :  { %1356 = vmatprep.mubr.bf16.mxu1 %v9384_v4  ;;  %v1131_v51 = vmax.f32 %v1111_v48, 0.0  ;;  %v8617_v44 = vld [vmem:[%s11864_s4 + $0x644] ss:$8 sps:$4 sm:$0xff]   ;;  %v8615_v47 = vld [vmem:[%s11864_s4 + $0x640] ss:$8 sps:$4 sm:$0xff]   ;;  %v8574_v48 = vld [vmem:[%s11862_s2 + $0x90] sm:$0xff]  }
 0x11a   :  { %1840 = vrot.lane.b32.xlu1 %v9601_v8, %s9388_s27 }
 0x11b   :  { %v1140_v52 = vpack.c.bf16 %v1131_v51, %v1122_v50 }
 0x11d   :  { %1752 = vrot.lane.b32.xlu0 %v1140_v52, %s9387_s9  ;;  %s9360_s9 = scalar_lea.vmem %s7276_s20, 32 }
 0x11e   :  { %1935 = vrot.lane.b32.xlu1 %v9638_v38, %s9388_s27  ;;  %p9361_p0 = scmp.ne.s32.totalorder %s7276_s20, %s9360_s9  ;;  %p9366_p2 = scmp.lt.s32.totalorder %s9360_s9, %s9360_s9 }
 0x120   :  { %p9367_p3 = por %p9366_p2, %p9365_p1 }
 0x121   :  { %1844 = vrot.lane.b32.xlu0 %v9594_v62, %s9388_s27 }
 0x122   :  { %2027 = vrot.lane.b32.xlu1 %v9594_v62, %s9389_s28  ;;  %p9368_p4 = pnand %p9367_p3, %p9361_p0 }
 0x125   :  { %1933 = vrot.lane.b32.xlu0 %v9597_v1, %s9388_s27 }
 0x126   :  { %2116 = vrot.lane.b32.xlu1 %v9597_v1, %s9389_s28  ;;  %v8563_v1 = vld [vmem:[%s11862_s2 + $0x38] sm:$0xff]  }
 0x129   :  { %2025 = vrot.lane.b32.xlu0 %v9607_v10, %s9389_s28 }
 0x12a   :  { %2206 = vrot.lane.b32.xlu1 %v9643_v40, %s9388_s27 }
 0x12d   :  { %2023 = vrot.lane.b32.xlu0 %v9601_v8, %s9389_s28  ;;  %v8566_v8 = vld [vmem:[%s11862_s2 + $0x50] sm:$0xff]  }
 0x12e   :  { %2296 = vrot.lane.b32.xlu1 %v9636_v34, %s9388_s27 }
 0x131   :  { %2118 = vrot.lane.b32.xlu0 %v9638_v38, %s9389_s28 }
 0x132   :  { %2386 = vrot.lane.b32.xlu1 %v9643_v40, %s9389_s28 }
 0x135   :  { %2208 = vrot.lane.b32.xlu0 %v9632_v31, %s9388_s27 }
 0x136   :  { %2476 = vrot.lane.b32.xlu1 %v9636_v34, %s9389_s28 }
 0x139   :  { %2298 = vrot.lane.b32.xlu0 %v1140_v52, %s9388_s27 }
 0x13a   :  { %2562 = vperm.xlu1 %8520, %v2552_v27   ;;  %v8620_v27 = vld [vmem:[%s11864_s4 + $0x54] ss:$8 sps:$4 sm:$0xff]  }
 0x13d   :  { %2388 = vrot.lane.b32.xlu0 %v9632_v31, %s9389_s28 }
 0x13e   :  { %2572 = vperm.xlu1 %8520, %v2554_v30   ;;  %v8621_v30 = vld [vmem:[%s11864_s4 + $0x650] ss:$8 sps:$4 sm:$0xff]  }
 0x141   :  { %2478 = vrot.lane.b32.xlu0 %v1140_v52, %s9389_s28 }
 0x145   :  { %2567 = vperm.xlu0 %8519, %v2553_v43   ;;  %v8575_v43 = vld [vmem:[%s11862_s2 + $0x98] sm:$0xff]  }
 0x149   :  { %2557 = vperm.xlu0 %8519, %v2551_v45   ;;  %v8576_v45 = vld [vmem:[%s11862_s2 + $0xa0] sm:$0xff]  }
 0x16f   :  { %v1308_v54 = vpop.permute.xlu0 %1307 }
 0x170   :  { %v1310_v53 = vpop.permute.xlu1 %1309 }
 0x171   :  { %v1314_v57 = vsel %vm1313_vm3, %v1308_v54, %v1310_v53 }
 0x174   :  { %v1312_v55 = vpop.permute.xlu1 %1311 }
 0x175   :  { %v1315_v56 = vsel %vm1313_vm3, %v1310_v53, %v1312_v55 }
 0x176   :  { %1324 = vmatprep.subr.bf16.mxu1 %v1315_v56 }
 0x177   :  { %1325 = vmatpush1.bf16.msra.mxu1 %v1314_v57  ;;  %v8577_v57 = vld [vmem:[%s11862_s2 + $0xa8] sm:$0xff]  }
 0x178   :  { %v1403_v60 = vpop.permute.xlu1 %1402 }
 0x179   :  { %v1406_v63 = vsel %vm1313_vm3, %v1312_v55, %v1403_v60 }
 0x17a   :  { %7406 = vmatmul.mubr.msk.bf16.vlgmr.msra.gmra.mrb[8].mxu1 %vm1160_vm2, %v8560_v58  ;;  %v8578_v58 = vld [vmem:[%s11862_s2 + $0xb0] sm:$0xff]  }
 0x17b   :  { %1366 = vmatprep.mubr.bf16.mxu1 %v9384_v4 }
 0x17f   :  { %v1405_v61 = vpop.permute.xlu0 %1404 }
 0x180   :  { %v1407_v62 = vsel %vm1313_vm3, %v1403_v60, %v1405_v61  ;;  %v1659_v5 = vpop.permute.xlu1 %1658 }
 0x181   :  { %1416 = vmatprep.subr.bf16.mxu1 %v1407_v62  ;;  %v1662_v10 = vsel %vm1313_vm3, %v1405_v61, %v1659_v5 }
 0x182   :  { %7407 = vmatmul.mubr.msk.bf16.gmra.mrb[12].mxu1 %vm1160_vm2, %v8561_v59 }
 0x183   :  { %1417 = vmatpush1.bf16.msra.mxu1 %v1406_v63  ;;  %1448 = vmatprep.mubr.bf16.mxu1 %v9384_v4  ;;  %v1661_v3 = vpop.permute.xlu0 %1660  ;;  %v8579_v63 = vld [vmem:[%s11862_s2 + $0xb8] sm:$0xff]  }
 0x184   :  { %1498 = vmatprep.subr.bf16.mxu1 %v9643_v40  ;;  %v1663_v6 = vsel %vm1313_vm3, %v1659_v5, %v1661_v3  ;;  %v1751_v11 = vpop.permute.xlu1 %1750  ;;  %v8611_v40 = vld [vmem:[%s11864_s4 + $0x634] ss:$8 sps:$4 sm:$0xff]  }
 0x185   :  { %v1754_v16 = vsel %vm1313_vm3, %v1661_v3, %v1751_v11 }
 0x188   :  { %v1843_v17 = vpop.permute.xlu1 %1842 }
 0x18a   :  { %7414 = vmatmul.mubr.msk.bf16.vlgmr.msra.gmra.mrb[8].mxu1 %vm1160_vm2, %v8562_v0  ;;  %v8580_v0 = vld [vmem:[%s11862_s2 + $0xc0] sm:$0xff]  }
 0x18b   :  { %1499 = vmatpush1.bf16.msra.mxu1 %v9638_v38  ;;  %1458 = vmatprep.mubr.bf16.mxu1 %v9384_v4  ;;  %v8603_v38 = vld [vmem:[%s11864_s4 + $0x620] ss:$8 sps:$4 sm:$0xff]  }
 0x18c   :  { %1580 = vmatprep.subr.bf16.mxu1 %v9636_v34  ;;  %v1841_v20 = vpop.permute.xlu1 %1840 }
 0x18d   :  { %v1847_v23 = vsel %vm1846_vm4, %v1841_v20, %v1843_v17  ;;  %v8594_v20 = vld [vmem:[%s11864_s4 + $0x10] ss:$8 sps:$4 sm:$0xff]  }
 0x18f   :  { %v1753_v9 = vpop.permute.xlu0 %1752 }
 0x190   :  { %v1755_v12 = vsel %vm1313_vm3, %v1751_v11, %v1753_v9  ;;  %v9752_v24 = vpop.permute.xlu1 %1935 }
 0x192   :  { %7415 = vmatmul.mubr.msk.bf16.gmra.mrb[12].mxu1 %vm1160_vm2, %v8563_v1 }
 0x193   :  { %1530 = vmatprep.mubr.bf16.mxu1 %v9384_v4  ;;  %v1845_v15 = vpop.permute.xlu0 %1844 }
 0x194   :  { %v1848_v18 = vsel %vm1846_vm4, %v1843_v17, %v1845_v15  ;;  %v2028_v36 = vpop.permute.xlu1 %2027  ;;  %v8586_v17 = vld [vmem:[%s11862_s2 + $0xf0] sm:$0xff]  }
 0x197   :  { %v1934_v22 = vpop.permute.xlu0 %1933 }
 0x198   :  { %v1938_v25 = vsel %vm1846_vm4, %v1934_v22, %v9752_v24  ;;  %v1937_v37 = vsel %vm1846_vm4, %v1845_v15, %v1934_v22  ;;  %v2117_v50 = vpop.permute.xlu1 %2116  ;;  %v8587_v22 = vld [vmem:[%s11862_s2 + $0xf8] sm:$0xff]  }
 0x199   :  { %v2120_v54 = vsel %vm2029_vm5, %v2028_v36, %v2117_v50 }
 0x19a   :  { %7422 = vmatmul.mubr.msk.bf16.vlgmr.msra.gmra.mrb[8].mxu1 %vm1160_vm2, %v8564_v2 }
 0x19b   :  { %1581 = vmatpush1.bf16.msra.mxu1 %v9632_v31  ;;  %1540 = vmatprep.mubr.bf16.mxu1 %v9384_v4  ;;  %v8599_v31 = vld [vmem:[%s11864_s4 + $0x614] ss:$8 sps:$4 sm:$0xff]   ;;  %v2026_v34 = vpop.permute.xlu0 %2025 }
 0x19c   :  { %1672 = vmatprep.subr.bf16.mxu1 %v1663_v6  ;;  %6748 = vmatprep.subr.bf16.mxu0 %v8599_v31  ;;  %v2031_v39 = vsel %vm2029_vm5, %v2026_v34, %v2028_v36  ;;  %v2207_v55 = vpop.permute.xlu1 %2206  ;;  %v8581_v6 = vld [vmem:[%s11862_s2 + $0xc8] sm:$0xff]   ;;  %v8630_v36 = vld [vmem:[%s11864_s4 + $0x70] ss:$8 sps:$4 sm:$0xff]  }
 0x19d   :  { %6749 = vmatpush1.bf16.msra.mxu0 %v8597_v33  ;;  %v2210_v60 = vsel %vm1846_vm4, %v9752_v24, %v2207_v55  ;;  %v8606_v24 = vld [vmem:[%s11864_s4 + $0x30] ss:$8 sps:$4 sm:$0xff]   ;;  %v8626_v31 = vld [vmem:[%s11864_s4 + $0x64] ss:$8 sps:$4 sm:$0xff]  }
 0x19e   :  { %6750 = vmatprep.subr.bf16.mxu0 %v8605_v35  ;;  %v8629_v33 = vld [vmem:[%s11864_s4 + $0x664] ss:$8 sps:$4 sm:$0xff]   ;;  %v8632_v35 = vld [vmem:[%s11864_s4 + $0x74] ss:$8 sps:$4 sm:$0xff]  }
 0x19f   :  { %v2024_v46 = vpop.permute.xlu0 %2023 }
 0x1a0   :  { %v2030_v51 = vsel %vm2029_vm5, %v2024_v46, %v2026_v34  ;;  %v2297_v61 = vpop.permute.xlu1 %2296  ;;  %v8627_v34 = vld [vmem:[%s11864_s4 + $0x660] ss:$8 sps:$4 sm:$0xff]   ;;  %v8642_v46 = vld [vmem:[%s11864_s4 + $0x90] ss:$8 sps:$4 sm:$0xff]  }
 0x1a1   :  { %6751 = vmatpush1.bf16.msra.mxu0 %v8603_v38  ;;  %v8633_v38 = vld [vmem:[%s11864_s4 + $0x670] ss:$8 sps:$4 sm:$0xff]  }
 0x1a2   :  { %7423 = vmatmul.mubr.msk.bf16.gmra.mrb[12].mxu1 %vm1160_vm2, %v8565_v7  ;;  %6752 = vmatprep.subr.bf16.mxu0 %v8611_v40  ;;  %v8582_v7 = vld [vmem:[%s11862_s2 + $0xd0] sm:$0xff]   ;;  %v8636_v40 = vld [vmem:[%s11864_s4 + $0x80] ss:$8 sps:$4 sm:$0xff]  }
 0x1a3   :  { %1612 = vmatprep.mubr.bf16.mxu1 %v9384_v4  ;;  %v2119_v49 = vpop.permute.xlu0 %2118 }
 0x1a4   :  { %v2121_v52 = vsel %vm2029_vm5, %v2117_v50, %v2119_v49  ;;  %v2387_v2 = vpop.permute.xlu1 %2386  ;;  %v8648_v50 = vld [vmem:[%s11864_s4 + $0xa0] ss:$8 sps:$4 sm:$0xff]  }
 0x1a5   :  { %6753 = vmatpush1.bf16.msra.mxu0 %v8609_v42  ;;  %v2390_v9 = vsel %vm2029_vm5, %v2119_v49, %v2387_v2  ;;  %v8639_v42 = vld [vmem:[%s11864_s4 + $0x680] ss:$8 sps:$4 sm:$0xff]   ;;  %v8650_v49 = vld [vmem:[%s11864_s4 + $0xa4] ss:$8 sps:$4 sm:$0xff]  }
 0x1a6   :  { %6754 = vmatprep.subr.bf16.mxu0 %v8617_v44  ;;  %v8644_v44 = vld [vmem:[%s11864_s4 + $0x94] ss:$8 sps:$4 sm:$0xff]  }
 0x1a7   :  { %v2209_v53 = vpop.permute.xlu0 %2208 }
 0x1a8   :  { %v2211_v56 = vsel %vm1846_vm4, %v2207_v55, %v2209_v53  ;;  %v2300_v3 = vsel %vm1846_vm4, %v2209_v53, %v2297_v61  ;;  %v8659_v53 = vld [vmem:[%s11864_s4 + $0x6b4] ss:$8 sps:$4 sm:$0xff]   ;;  %v8662_v55 = vld [vmem:[%s11864_s4 + $0xc4] ss:$8 sps:$4 sm:$0xff]  }
 0x1a9   :  { %6755 = vmatpush1.bf16.msra.mxu0 %v8615_v47  ;;  %v8647_v47 = vld [vmem:[%s11864_s4 + $0x694] ss:$8 sps:$4 sm:$0xff]  }
 0x1aa   :  { %7430 = vmatmul.mubr.msk.bf16.vlgmr.msra.gmra.mrb[8].mxu1 %vm1160_vm2, %v8566_v8  ;;  %6756 = vmatprep.subr.bf16.mxu0 %v8623_v29 }
 0x1ab   :  { %1673 = vmatpush1.bf16.msra.mxu1 %v1662_v10  ;;  %1622 = vmatprep.mubr.bf16.mxu1 %v9384_v4  ;;  %v2299_v59 = vpop.permute.xlu0 %2298  ;;  %v2477_v10 = vpop.permute.xlu1 %2476 }
 0x1ac   :  { %1764 = vmatprep.subr.bf16.mxu1 %v1755_v12  ;;  %v2301_v62 = vsel %vm1846_vm4, %v2297_v61, %v2299_v59  ;;  %v8583_v12 = vld [vmem:[%s11862_s2 + $0xd8] sm:$0xff]  }
 0x1ad   :  { %6757 = vmatpush1.bf16.msra.mxu0 %v8621_v30  ;;  %v8668_v59 = vld [vmem:[%s11864_s4 + $0xd4] ss:$8 sps:$4 sm:$0xff]   ;;  %v8669_v61 = vld [vmem:[%s11864_s4 + $0x6d0] ss:$8 sps:$4 sm:$0xff]   ;;  %v2598_v30 = vld [vmem:[#allocation2] sm:$0x1] }
 0x1ae   :  { %6758 = vmatprep.subr.bf16.mxu0 %v8629_v33 }
 0x1af   :  { %v2389_v1 = vpop.permute.xlu0 %2388 }
 0x1b0   :  { %v2391_v5 = vsel %vm2029_vm5, %v2387_v2, %v2389_v1  ;;  %v2480_v15 = vsel %vm2029_vm5, %v2389_v1, %v2477_v10  ;;  %v8677_v1 = vld [vmem:[%s11864_s4 + $0x6e4] ss:$8 sps:$4 sm:$0xff]   ;;  %v8680_v2 = vld [vmem:[%s11864_s4 + $0xf4] ss:$8 sps:$4 sm:$0xff]  }
 0x1b1   :  { %6759 = vmatpush1.bf16.msra.mxu0 %v8627_v34 }
 0x1b2   :  { %7431 = vmatmul.mubr.msk.bf16.gmra.mrb[12].mxu1 %vm1160_vm2, %v8567_v13  ;;  %v8584_v13 = vld [vmem:[%s11862_s2 + $0xe0] sm:$0xff]  }
 0x1b3   :  { %1704 = vmatprep.mubr.bf16.mxu1 %v9384_v4  ;;  %v2479_v8 = vpop.permute.xlu0 %2478 }
 0x1b4   :  { %v2481_v11 = vsel %vm2029_vm5, %v2477_v10, %v2479_v8  ;;  %v8681_v8 = vld [vmem:[%s11864_s4 + $0x6f0] ss:$8 sps:$4 sm:$0xff]  }
 0x1ba   :  { %7438 = vmatmul.mubr.msk.bf16.vlgmr.msra.gmra.mrb[8].mxu1 %vm1160_vm2, %v8568_v14  ;;  %v8590_v14 = vld [vmem:[%s11864_s4 + $0x4] ss:$8 sps:$4 sm:$0xff]  }
 0x1bb   :  { %1765 = vmatpush1.bf16.msra.mxu1 %v1754_v16  ;;  %1714 = vmatprep.mubr.bf16.mxu1 %v9384_v4  ;;  %v8585_v16 = vld [vmem:[%s11862_s2 + $0xe8] sm:$0xff]  }
 0x1bc   :  { %1857 = vmatprep.subr.bf16.mxu1 %v1848_v18  ;;  %v8588_v18 = vld [vmem:[%s11864_s4] ss:$8 sps:$4 sm:$0xff]  }
 0x1c2   :  { %7439 = vmatmul.mubr.msk.bf16.gmra.mrb[12].mxu1 %vm1160_vm2, %v8569_v19  ;;  %v8596_v19 = vld [vmem:[%s11864_s4 + $0x14] ss:$8 sps:$4 sm:$0xff]  }
 0x1c3   :  { %1796 = vmatprep.mubr.bf16.mxu1 %v9384_v4 }
 0x1c4   :  { %v2568_v10 = vpop.permute.xlu0 %2567 }
 0x1ca   :  { %7446 = vmatmul.mubr.msk.bf16.vlgmr.msra.gmra.mrb[8].mxu1 %vm1160_vm2, %v8570_v21  ;;  %v8602_v21 = vld [vmem:[%s11864_s4 + $0x24] ss:$8 sps:$4 sm:$0xff]  }
 0x1cb   :  { %1858 = vmatpush1.bf16.msra.mxu1 %v1847_v23  ;;  %1806 = vmatprep.mubr.bf16.mxu1 %v9384_v4  ;;  %v8600_v23 = vld [vmem:[%s11864_s4 + $0x20] ss:$8 sps:$4 sm:$0xff]  }
 0x1cc   :  { %1947 = vmatprep.subr.bf16.mxu1 %v1938_v25  ;;  %v8614_v25 = vld [vmem:[%s11864_s4 + $0x44] ss:$8 sps:$4 sm:$0xff]  }
 0x1d2   :  { %7447 = vmatmul.mubr.msk.bf16.gmra.mrb[12].mxu1 %vm1160_vm2, %v8571_v26  ;;  %v8612_v26 = vld [vmem:[%s11864_s4 + $0x40] ss:$8 sps:$4 sm:$0xff]  }
 0x1d3   :  { %1889 = vmatprep.mubr.bf16.mxu1 %v9384_v4 }
 0x1da   :  { %7454 = vmatmul.mubr.msk.bf16.vlgmr.msra.gmra.mrb[8].mxu1 %vm1160_vm2, %v8572_v32  ;;  %v8624_v32 = vld [vmem:[%s11864_s4 + $0x60] ss:$8 sps:$4 sm:$0xff]  }
 0x1db   :  { %1948 = vmatpush1.bf16.msra.mxu1 %v1937_v37  ;;  %1899 = vmatprep.mubr.bf16.mxu1 %v9384_v4  ;;  %v8635_v37 = vld [vmem:[%s11864_s4 + $0x674] ss:$8 sps:$4 sm:$0xff]  }
 0x1dc   :  { %2040 = vmatprep.subr.bf16.mxu1 %v2031_v39  ;;  %6760 = vmatprep.subr.bf16.mxu0 %v8635_v37  ;;  %v8638_v39 = vld [vmem:[%s11864_s4 + $0x84] ss:$8 sps:$4 sm:$0xff]  }
 0x1dd   :  { %6761 = vmatpush1.bf16.msra.mxu0 %v8633_v38 }
 0x1e2   :  { %7455 = vmatmul.mubr.msk.bf16.gmra.mrb[12].mxu1 %vm1160_vm2, %v8573_v41  ;;  %v8641_v41 = vld [vmem:[%s11864_s4 + $0x684] ss:$8 sps:$4 sm:$0xff]  }
 0x1e3   :  { %1979 = vmatprep.mubr.bf16.mxu1 %v9384_v4  ;;  %6762 = vmatprep.subr.bf16.mxu0 %v8641_v41  ;;  %v2690_v41 = vld [vmem:[#allocation2 + $0x8] sm:$0x1] }
 0x1e4   :  { %6763 = vmatpush1.bf16.msra.mxu0 %v8639_v42 }
 0x1e5   :  { %6764 = vmatprep.subr.bf16.mxu0 %v8647_v47 }
 0x1ea   :  { %7462 = vmatmul.mubr.msk.bf16.vlgmr.msra.gmra.mrb[8].mxu1 %vm1160_vm2, %v8574_v48  ;;  %v8645_v48 = vld [vmem:[%s11864_s4 + $0x690] ss:$8 sps:$4 sm:$0xff]  }
 0x1eb   :  { %2041 = vmatpush1.bf16.msra.mxu1 %v2030_v51  ;;  %1989 = vmatprep.mubr.bf16.mxu1 %v9384_v4  ;;  %v8653_v51 = vld [vmem:[%s11864_s4 + $0x6a4] ss:$8 sps:$4 sm:$0xff]  }
 0x1ec   :  { %2130 = vmatprep.subr.bf16.mxu1 %v2121_v52  ;;  %6765 = vmatpush1.bf16.msra.mxu0 %v8645_v48  ;;  %v8651_v52 = vld [vmem:[%s11864_s4 + $0x6a0] ss:$8 sps:$4 sm:$0xff]  }
 0x1ed   :  { %6766 = vmatprep.subr.bf16.mxu0 %v8653_v51 }
 0x1f0   :  { %6767 = vmatpush1.bf16.msra.mxu0 %v8651_v52 }
 0x1f1   :  { %6768 = vmatprep.subr.bf16.mxu0 %v8659_v53  ;;  %v2634_v53 = vld [vmem:[#allocation2 + $0x2] sm:$0x1] }
 0x1f2   :  { %7463 = vmatmul.mubr.msk.bf16.gmra.mrb[12].mxu1 %vm1160_vm2, %v8575_v43  ;;  %v8656_v43 = vld [vmem:[%s11864_s4 + $0xb4] ss:$8 sps:$4 sm:$0xff]  }
 0x1f3   :  { %2072 = vmatprep.mubr.bf16.mxu1 %v9384_v4 }
 0x1fa   :  { %7470 = vmatmul.mubr.msk.bf16.vlgmr.msra.gmra.mrb[8].mxu1 %vm1160_vm2, %v8576_v45  ;;  %v8654_v45 = vld [vmem:[%s11864_s4 + $0xb0] ss:$8 sps:$4 sm:$0xff]  }
 0x1fb   :  { %2131 = vmatpush1.bf16.msra.mxu1 %v2120_v54  ;;  %2082 = vmatprep.mubr.bf16.mxu1 %v9384_v4  ;;  %v8657_v54 = vld [vmem:[%s11864_s4 + $0x6b0] ss:$8 sps:$4 sm:$0xff]  }
 0x1fc   :  { %2220 = vmatprep.subr.bf16.mxu1 %v2211_v56  ;;  %6769 = vmatpush1.bf16.msra.mxu0 %v8657_v54  ;;  %v8660_v56 = vld [vmem:[%s11864_s4 + $0xc0] ss:$8 sps:$4 sm:$0xff]   ;;  %v2648_v54 = vld [vmem:[#allocation2 + $0x4] sm:$0x1] }
 0x202   :  { %7471 = vmatmul.mubr.msk.bf16.gmra.mrb[12].mxu1 %vm1160_vm2, %v8577_v57  ;;  %v8665_v57 = vld [vmem:[%s11864_s4 + $0x6c4] ss:$8 sps:$4 sm:$0xff]  }
 0x203   :  { %2162 = vmatprep.mubr.bf16.mxu1 %v9384_v4  ;;  %6770 = vmatprep.subr.bf16.mxu0 %v8665_v57 }
 0x20a   :  { %7478 = vmatmul.mubr.msk.bf16.vlgmr.msra.gmra.mrb[8].mxu1 %vm1160_vm2, %v8578_v58  ;;  %v8663_v58 = vld [vmem:[%s11864_s4 + $0x6c0] ss:$8 sps:$4 sm:$0xff]  }
 0x20b   :  { %2221 = vmatpush1.bf16.msra.mxu1 %v2210_v60  ;;  %2172 = vmatprep.mubr.bf16.mxu1 %v9384_v4  ;;  %v8666_v60 = vld [vmem:[%s11864_s4 + $0xd0] ss:$8 sps:$4 sm:$0xff]  }
 0x20c   :  { %2310 = vmatprep.subr.bf16.mxu1 %v2301_v62  ;;  %6771 = vmatpush1.bf16.msra.mxu0 %v8663_v58  ;;  %v8671_v62 = vld [vmem:[%s11864_s4 + $0x6d4] ss:$8 sps:$4 sm:$0xff]  }
 0x20d   :  { %6772 = vmatprep.subr.bf16.mxu0 %v8671_v62  ;;  %v2643_v62 = vld [vmem:[#allocation2 + $0x3] sm:$0x1] }
 0x210   :  { %6773 = vmatpush1.bf16.msra.mxu0 %v8669_v61 }
 0x211   :  { %6774 = vmatprep.subr.bf16.mxu0 %v8677_v1  ;;  %v2711_v1 = vld [vmem:[#allocation2 + $0xa] sm:$0x1] }
 0x212   :  { %7479 = vmatmul.mubr.msk.bf16.gmra.mrb[12].mxu1 %vm1160_vm2, %v8579_v63  ;;  %v8672_v63 = vld [vmem:[%s11864_s4 + $0xe0] ss:$8 sps:$4 sm:$0xff]  }
 0x213   :  { %2252 = vmatprep.mubr.bf16.mxu1 %v9384_v4 }
 0x21a   :  { %7486 = vmatmul.mubr.msk.bf16.vlgmr.msra.gmra.mrb[8].mxu1 %vm1160_vm2, %v8580_v0  ;;  %v8674_v0 = vld [vmem:[%s11864_s4 + $0xe4] ss:$8 sps:$4 sm:$0xff]  }
 0x21b   :  { %2311 = vmatpush1.bf16.msra.mxu1 %v2300_v3  ;;  %2262 = vmatprep.mubr.bf16.mxu1 %v9384_v4  ;;  %v8675_v3 = vld [vmem:[%s11864_s4 + $0x6e0] ss:$8 sps:$4 sm:$0xff]  }
 0x21c   :  { %2400 = vmatprep.subr.bf16.mxu1 %v2391_v5  ;;  %v8683_v5 = vld [vmem:[%s11864_s4 + $0x6f4] ss:$8 sps:$4 sm:$0xff]   ;;  %6775 = vmatpush1.bf16.msra.mxu0 %v8675_v3 }
 0x21d   :  { %6776 = vmatprep.subr.bf16.mxu0 %v8683_v5 }
 0x220   :  { %6777 = vmatpush1.bf16.msra.mxu0 %v8681_v8 }
 0x222   :  { %7487 = vmatmul.mubr.msk.bf16.gmra.mrb[12].mxu1 %vm1160_vm2, %v8581_v6  ;;  %v8678_v6 = vld [vmem:[%s11864_s4 + $0xf0] ss:$8 sps:$4 sm:$0xff]  }
 0x223   :  { %2342 = vmatprep.mubr.bf16.mxu1 %v9384_v4 }
 0x22a   :  { %7494 = vmatmul.mubr.msk.bf16.vlgmr.msra.gmra.mrb[8].mxu1 %vm1160_vm2, %v8582_v7  ;;  %v8686_v7 = vld [vmem:[%s11864_s4 + $0x104] ss:$8 sps:$4 sm:$0xff]  }
 0x22b   :  { %2401 = vmatpush1.bf16.msra.mxu1 %v2390_v9  ;;  %2352 = vmatprep.mubr.bf16.mxu1 %v9384_v4  ;;  %v8690_v9 = vld [vmem:[%s11864_s4 + $0x704] ss:$8 sps:$4 sm:$0xff]  }
 0x22c   :  { %2490 = vmatprep.subr.bf16.mxu1 %v2481_v11  ;;  %6787 = vmatprep.subr.bf16.mxu0 %v8690_v9  ;;  %v9390_v11 = vmov 1966171168  }
 0x232   :  { %7495 = vmatmul.mubr.msk.bf16.gmra.mrb[12].mxu1 %vm1160_vm2, %v8583_v12  ;;  %v2603_v12 = vunpack.c.l.s4 %v9390_v11 }
 0x233   :  { %2432 = vmatprep.mubr.bf16.mxu1 %v9384_v4 }
 0x23a   :  { %7502 = vmatmul.mubr.msk.bf16.vlgmr.msra.gmra.mrb[8].mxu1 %vm1160_vm2, %v8584_v13  ;;  %v2605_v13 = vlaneseq }
 0x23b   :  { %2491 = vmatpush1.bf16.msra.mxu1 %v2480_v15  ;;  %2442 = vmatprep.mubr.bf16.mxu1 %v9384_v4 }
 0x23c   :  { %6500 = vmatprep.subr.bf16.mxu1 %v8590_v14  ;;  %v2558_v14 = vpop.permute.xlu0 %2557 }
 0x242   :  { %7503 = vmatmul.mubr.msk.bf16.gmra.mrb[12].mxu1 %vm1160_vm2, %v8585_v16 }
 0x243   :  { %2522 = vmatprep.mubr.bf16.mxu1 %v9384_v4 }
 0x24a   :  { %7510 = vmatmul.mubr.msk.bf16.vlgmr.msra.gmra.mrb[8].mxu1 %vm1160_vm2, %v8586_v17 }
 0x24b   :  { %2532 = vmatprep.mubr.bf16.mxu1 %v9384_v4  ;;  %6501 = vmatpush1.bf16.msra.mxu1 %v8588_v18  ;;  %v8608_v4 = vld [vmem:[%s11864_s4 + $0x34] ss:$8 sps:$4 sm:$0xff]   ;;  %v2604_v18 = vunpack.c.0.s8 %v2603_v12 }
 0x24c   :  { %6502 = vmatprep.subr.bf16.mxu1 %v8596_v19  ;;  %v10060_v19 = vshrl.u32 %v2605_v13, 7  ;;  %v2662_v13 = vld [vmem:[#allocation2 + $0x6] sm:$0x1] }
 0x24f   :  { %6503 = vmatpush1.bf16.msra.mxu1 %v8594_v20 }
 0x250   :  { %6504 = vmatprep.subr.bf16.mxu1 %v8602_v21  ;;  %v2563_v21 = vpop.permute.xlu1 %2562 }
 0x252   :  { %7511 = vmatmul.mubr.msk.bf16.gmra.mrb[12].mxu1 %vm1160_vm2, %v8587_v22 }
 0x253   :  { %6505 = vmatpush1.bf16.msra.mxu1 %v8600_v23 }
 0x254   :  { %6506 = vmatprep.subr.bf16.mxu1 %v8608_v4 }
 0x257   :  { %6507 = vmatpush1.bf16.msra.mxu1 %v8606_v24 }
 0x258   :  { %6508 = vmatprep.subr.bf16.mxu1 %v8614_v25 }
 0x25b   :  { %6509 = vmatpush1.bf16.msra.mxu1 %v8612_v26 }
 0x25c   :  { %6510 = vmatprep.subr.bf16.mxu1 %v8620_v27  ;;  %v10063_v27 = vsub.s32 %v2604_v18, %v10060_v19 }
 0x25f   :  { %6511 = vmatpush1.bf16.msra.mxu1 %v8618_v28 }
 0x260   :  { %6512 = vmatprep.subr.bf16.mxu1 %v8626_v31 }
 0x263   :  { %6513 = vmatpush1.bf16.msra.mxu1 %v8624_v32 }
 0x264   :  { %6514 = vmatprep.subr.bf16.mxu1 %v8632_v35 }
 0x267   :  { %6515 = vmatpush1.bf16.msra.mxu1 %v8630_v36 }
 0x268   :  { %6516 = vmatprep.subr.bf16.mxu1 %v8638_v39 }
 0x26b   :  { %6517 = vmatpush1.bf16.msra.mxu1 %v8636_v40 }
 0x26c   :  { %6518 = vmatprep.subr.bf16.mxu1 %v8644_v44 }
 0x26f   :  { %6519 = vmatpush1.bf16.msra.mxu1 %v8642_v46 }
 0x270   :  { %6520 = vmatprep.subr.bf16.mxu1 %v8650_v49 }
 0x273   :  { %6521 = vmatpush1.bf16.msra.mxu1 %v8648_v50  ;;  %v2622_v50 = vld [vmem:[#allocation2 + $0x1] sm:$0x1] }
 0x274   :  { %6522 = vmatprep.subr.bf16.mxu1 %v8656_v43 }
 0x277   :  { %6523 = vmatpush1.bf16.msra.mxu1 %v8654_v45 }
 0x278   :  { %6524 = vmatprep.subr.bf16.mxu1 %v8662_v55  ;;  %v2699_v55 = vld [vmem:[#allocation2 + $0x9] sm:$0x1] }
 0x27b   :  { %6525 = vmatpush1.bf16.msra.mxu1 %v8660_v56 }
 0x27c   :  { %6526 = vmatprep.subr.bf16.mxu1 %v8668_v59 }
 0x27f   :  { %6527 = vmatpush1.bf16.msra.mxu1 %v8666_v60 }
 0x280   :  { %6528 = vmatprep.subr.bf16.mxu1 %v8674_v0 }
 0x283   :  { %6529 = vmatpush1.bf16.msra.mxu1 %v8672_v63 }
 0x284   :  { %6530 = vmatprep.subr.bf16.mxu1 %v8680_v2  ;;  %v2657_v2 = vld [vmem:[#allocation2 + $0x5] sm:$0x1] }
 0x287   :  { %6531 = vmatpush1.bf16.msra.mxu1 %v8678_v6 }
 0x288   :  { %6541 = vmatprep.subr.bf16.mxu1 %v8686_v7  ;;  %v2725_v7 = vld [vmem:[#allocation2 + $0xc] sm:$0x1] }
 0x31d   :  { %v2524_v15 = vpop.f32.mrb[8].mxu1 }
 0x31e   :  { %v2575_v16 = vadd.f32 %v2558_v14, %v2524_v15  ;;  %v2526_v17 = vpop.f32.mrb[9].mxu1 }
 0x31f   :  { %v2576_v20 = vadd.f32 %v2558_v14, %v2526_v17  ;;  %v2528_v22 = vpop.f32.mrb[10].mxu1  ;;  %v2720_v14 = vld [vmem:[#allocation2 + $0xb] sm:$0x1]  ;;  %v2671_v17 = vld [vmem:[#allocation2 + $0x7] sm:$0x1] }
 0x320   :  { %v2577_v23 = vadd.f32 %v2563_v21, %v2528_v22  ;;  %v2530_v4 = vpop.f32.mrb[11].mxu1  ;;  %v2583_v25 = vmax.f32 %v2575_v16, 0.0  ;;  %v8696_v22 = vld [vmem:[%s11864_s4 + $0x714] ss:$8 sps:$4 sm:$0xff]  }
 0x321   :  { %v2578_v24 = vadd.f32 %v2563_v21, %v2530_v4  ;;  %v2584_v28 = vmax.f32 %v2576_v20, 0.0  ;;  %v2734_v21 = vld [vmem:[#allocation2 + $0xd] sm:$0x1] }
 0x322   :  { %v2585_v26 = vmax.f32 %v2577_v23, 0.0 }
 0x323   :  { %v2586_v31 = vmax.f32 %v2578_v24, 0.0 }
 0x324   :  { %v2591_v32 = vpack.c.bf16 %v2585_v26, %v2583_v25  ;;  %v7516_v33 = vpack.c.bf16 %v2585_v26, %v2585_v26  ;;  %v2739_v26 = vld [vmem:[#allocation2 + $0xe] sm:$0x1] }
 0x325   :  { %v10070_v34 = vpack.c.bf16 %v2586_v31, %v2584_v28  ;;  %v7530_v35 = vpack.c.bf16 %v2586_v31, %v2586_v31  ;;  %v2534_v36 = vpop.f32.mrb[12].mxu1 }
 0x326   :  { %v2599_v37 = vsel %vm10066_vm8, %v2591_v32, %v2598_v30  ;;  %v2608_v38 = vrot.slane %v2591_v32, %v10063_v27  ;;  %v2681_v39 = vrot.slane %v7516_v33, %v10063_v27  ;;  %v2536_v40 = vpop.f32.mrb[13].mxu1  ;;  %v10083_v46 = vadd.f32 %v2568_v10, %v2534_v36 }
 0x327   :  { %2600 = vst [vmem:[#allocation2] sm:$0x1] %v2599_v37  ;;  %v10078_v42 = vrot.slane %v10070_v34, %v10063_v27  ;;  %v10081_v44 = vrot.slane %v7530_v35, %v10063_v27  ;;  %v10085_v47 = vadd.f32 %v2568_v10, %v2536_v40  ;;  %v10087_v48 = vpop.f32.mrb[14].mxu1  ;;  %v2748_v37 = vld [vmem:[#allocation2 + $0xf] sm:$0x1] }
 0x328   :  { %v2615_v49 = vrot.slane %v2608_v38, %v10063_v27  ;;  %v2625_v51 = vcombine.high %v2608_v38, %v2608_v38  ;;  %v2688_v52 = vrot.slane %v2681_v39, %v10063_v27  ;;  %v2702_v43 = vcombine.high %v2681_v39, %v2681_v39  ;;  %v10091_v45 = vpop.f32.mrb[15].mxu1 }
 0x329   :  { %v2918_v56 = vrot.slane %v10078_v42, %v10063_v27  ;;  %v2931_v57 = vcombine.high %v10078_v42, %v10078_v42  ;;  %v10099_v58 = vrot.slane %v10081_v44, %v10063_v27  ;;  %v3000_v59 = vcombine.high %v10081_v44, %v10081_v44 }
 0x32a   :  { %v2617_v60 = vshrl.u32 %v2615_v49, 16  ;;  %v2632_v61 = vrot.slane %v2625_v51, %v10063_v27  ;;  %v2646_v63 = vcombine.high %v2615_v49, %v2615_v49  ;;  %v2691_v0 = vsel %vm10066_vm8, %v2688_v52, %v2690_v41 }
 0x32b   :  { %2692 = vst [vmem:[#allocation2 + $0x8] sm:$0x1] %v2691_v0  ;;  %v2694_v3 = vshrl.u32 %v2688_v52, 16  ;;  %v2709_v5 = vrot.slane %v2702_v43, %v10063_v27  ;;  %v2723_v6 = vcombine.high %v2688_v52, %v2688_v52  ;;  %v2920_v8 = vshll.u32 %v2918_v56, 16 }
 0x32c   :  { %v2623_v9 = vsel %vm10066_vm8, %v2617_v60, %v2622_v50  ;;  %v2635_v10 = vsel %vm10066_vm8, %v2632_v61, %v2634_v53  ;;  %v2638_v11 = vshrl.u32 %v2632_v61, 16  ;;  %v2649_v12 = vsel %vm10066_vm8, %v2646_v63, %v2648_v54  ;;  %v2573_v60 = vpop.permute.xlu1 %2572 }
 0x32d   :  { %2624 = vst [vmem:[#allocation2 + $0x1] sm:$0x1] %v2623_v9  ;;  %2636 = vst [vmem:[#allocation2 + $0x2] sm:$0x1] %v2635_v10  ;;  %v2652_v15 = vshrl.u32 %v2646_v63, 16  ;;  %v2660_v16 = vcombine.high %v2632_v61, %v2632_v61  ;;  %v2700_v18 = vsel %vm10066_vm8, %v2694_v3, %v2699_v55  ;;  %v2712_v20 = vsel %vm10066_vm8, %v2709_v5, %v2711_v1 }
 0x32e   :  { %2650 = vst [vmem:[#allocation2 + $0x4] sm:$0x1] %v2649_v12  ;;  %v2644_v23 = vsel %vm10066_vm8, %v2638_v11, %v2643_v62  ;;  %2701 = vst [vmem:[#allocation2 + $0x9] sm:$0x1] %v2700_v18  ;;  %v2715_v4 = vshrl.u32 %v2709_v5, 16  ;;  %v2726_v24 = vsel %vm10066_vm8, %v2723_v6, %v2725_v7  ;;  %v2729_v25 = vshrl.u32 %v2723_v6, 16 }
 0x32f   :  { %2713 = vst [vmem:[#allocation2 + $0xa] sm:$0x1] %v2712_v20  ;;  %v2925_v28 = vld [vmem:[#allocation2] sm:$0x1]  ;;  %2645 = vst [vmem:[#allocation2 + $0x3] sm:$0x1] %v2644_v23  ;;  %v2658_v30 = vsel %vm10066_vm8, %v2652_v15, %v2657_v2  ;;  %v2663_v31 = vsel %vm10066_vm8, %v2660_v16, %v2662_v13  ;;  %v2737_v33 = vcombine.high %v2709_v5, %v2709_v5 }
 0x330   :  { %v2666_v32 = vshrl.u32 %v2660_v16, 16  ;;  %2727 = vst [vmem:[#allocation2 + $0xc] sm:$0x1] %v2726_v24  ;;  %2659 = vst [vmem:[#allocation2 + $0x5] sm:$0x1] %v2658_v30  ;;  %v2721_v35 = vsel %vm10066_vm8, %v2715_v4, %v2720_v14  ;;  %v2735_v36 = vsel %vm10066_vm8, %v2729_v25, %v2734_v21  ;;  %v2926_v38 = vsel %vm10119_vm10, %v2920_v8, %v2925_v28 }
 0x331   :  { %2664 = vst [vmem:[#allocation2 + $0x6] sm:$0x1] %v2663_v31  ;;  %v2938_v39 = vrot.slane %v2931_v57, %v10063_v27  ;;  %2722 = vst [vmem:[#allocation2 + $0xb] sm:$0x1] %v2721_v35  ;;  %v2740_v41 = vsel %vm10066_vm8, %v2737_v33, %v2739_v26  ;;  %v2743_v42 = vshrl.u32 %v2737_v33, 16  ;;  %v2950_v49 = vcombine.high %v2918_v56, %v2918_v56 }
 0x332   :  { %v2672_v40 = vsel %vm10066_vm8, %v2666_v32, %v2671_v17  ;;  %2736 = vst [vmem:[#allocation2 + $0xd] sm:$0x1] %v2735_v36  ;;  %2927 = vst [vmem:[#allocation2] sm:$0x1] %v2926_v38  ;;  %v2990_v52 = vshll.u32 %v10099_v58, 16  ;;  %v3007_v53 = vrot.slane %v3000_v59, %v10063_v27  ;;  %v3019_v57 = vcombine.high %v10099_v58, %v10099_v58 }
 0x333   :  { %2673 = vst [vmem:[#allocation2 + $0x7] sm:$0x1] %v2672_v40  ;;  %2741 = vst [vmem:[#allocation2 + $0xe] sm:$0x1] %v2740_v41  ;;  %v2940_v50 = vshll.u32 %v2938_v39, 16  ;;  %v2962_v51 = vcombine.high %v2938_v39, %v2938_v39  ;;  %v2749_v54 = vsel %vm10066_vm8, %v2743_v42, %v2748_v37  ;;  %v2952_v55 = vshll.u32 %v2950_v49, 16 }
 0x334   :  { %v2993_v43 = vld [vmem:[#allocation2 + $0x8] sm:$0x1]  ;;  %v2587_v56 = vmax.f32 %v10083_v46, 0.0  ;;  %2750 = vst [vmem:[#allocation2 + $0xf] sm:$0x1] %v2749_v54  ;;  %v3031_v1 = vcombine.high %v3007_v53, %v3007_v53  ;;  %v2581_v44 = vadd.f32 %v2573_v60, %v10087_v48  ;;  %v2582_v59 = vadd.f32 %v2573_v60, %v10091_v45 }
 0x335   :  { %v2928_v61 = vld [vmem:[#allocation2 + $0x1] sm:$0x1]  ;;  %v2943_v62 = vld [vmem:[#allocation2 + $0x2] sm:$0x1]  ;;  %v2955_v63 = vld [vmem:[#allocation2 + $0x4] sm:$0x1]  ;;  %v2994_v0 = vsel %vm10119_vm10, %v2990_v52, %v2993_v43 }
 0x336   :  { %v2929_v2 = vsel %vm10119_vm10, %v10070_v34, %v2928_v61  ;;  %v2944_v46 = vsel %vm10119_vm10, %v2940_v50, %v2943_v62  ;;  %v2956_v3 = vsel %vm10119_vm10, %v2952_v55, %v2955_v63  ;;  %v2964_v5 = vshll.u32 %v2962_v51, 16  ;;  %2995 = vst [vmem:[#allocation2 + $0x8] sm:$0x1] %v2994_v0  ;;  %v2997_v6 = vld [vmem:[#allocation2 + $0x9] sm:$0x1] }
 0x337   :  { %v3012_v7 = vld [vmem:[#allocation2 + $0xa] sm:$0x1]  ;;  %2930 = vst [vmem:[#allocation2 + $0x1] sm:$0x1] %v2929_v2  ;;  %2945 = vst [vmem:[#allocation2 + $0x2] sm:$0x1] %v2944_v46  ;;  %v2998_v48 = vsel %vm10119_vm10, %v10099_v58, %v2997_v6 }
 0x338   :  { %v2947_v8 = vld [vmem:[#allocation2 + $0x3] sm:$0x1]  ;;  %2957 = vst [vmem:[#allocation2 + $0x4] sm:$0x1] %v2956_v3  ;;  %v3009_v45 = vshll.u32 %v3007_v53, 16  ;;  %v3021_v34 = vshll.u32 %v3019_v57, 16 }
 0x339   :  { %v3024_v9 = vld [vmem:[#allocation2 + $0xc] sm:$0x1]  ;;  %v2948_v10 = vsel %vm10119_vm10, %v2938_v39, %v2947_v8  ;;  %v2959_v11 = vld [vmem:[#allocation2 + $0x5] sm:$0x1]  ;;  %v2967_v12 = vld [vmem:[#allocation2 + $0x6] sm:$0x1] }
 0x33a   :  { %2999 = vst [vmem:[#allocation2 + $0x9] sm:$0x1] %v2998_v48  ;;  %v3033_v13 = vshll.u32 %v3031_v1, 16  ;;  %v2588_v14 = vmax.f32 %v10085_v47, 0.0  ;;  %2949 = vst [vmem:[#allocation2 + $0x3] sm:$0x1] %v2948_v10  ;;  %v2960_v15 = vsel %vm10119_vm10, %v2950_v49, %v2959_v11  ;;  %v2968_v16 = vsel %vm10119_vm10, %v2964_v5, %v2967_v12 }
 0x33b   :  { %v3013_v58 = vsel %vm10119_vm10, %v3009_v45, %v3012_v7  ;;  %v3016_v17 = vld [vmem:[#allocation2 + $0xb] sm:$0x1]  ;;  %v3025_v18 = vsel %vm10119_vm10, %v3021_v34, %v3024_v9  ;;  %v3028_v20 = vld [vmem:[#allocation2 + $0xd] sm:$0x1]  ;;  %2961 = vst [vmem:[#allocation2 + $0x5] sm:$0x1] %v2960_v15 }
 0x33c   :  { %2969 = vst [vmem:[#allocation2 + $0x6] sm:$0x1] %v2968_v16  ;;  %v2971_v21 = vld [vmem:[#allocation2 + $0x7] sm:$0x1]  ;;  %3014 = vst [vmem:[#allocation2 + $0xa] sm:$0x1] %v3013_v58  ;;  %v3017_v47 = vsel %vm10119_vm10, %v3007_v53, %v3016_v17  ;;  %v3029_v23 = vsel %vm10119_vm10, %v3019_v57, %v3028_v20 }
 0x33d   :  { %3026 = vst [vmem:[#allocation2 + $0xc] sm:$0x1] %v3025_v18  ;;  %v3036_v4 = vld [vmem:[#allocation2 + $0xe] sm:$0x1]  ;;  %v2589_v24 = vmax.f32 %v2581_v44, 0.0  ;;  %v2590_v25 = vmax.f32 %v2582_v59, 0.0  ;;  %v2972_v26 = vsel %vm10119_vm10, %v2962_v51, %v2971_v21 }
 0x33e   :  { %3018 = vst [vmem:[#allocation2 + $0xb] sm:$0x1] %v3017_v47  ;;  %3030 = vst [vmem:[#allocation2 + $0xd] sm:$0x1] %v3029_v23  ;;  %v3037_v28 = vsel %vm10119_vm10, %v3033_v13, %v3036_v4  ;;  %v2751_v30 = vld [vmem:[#allocation2 + $0x10] sm:$0x1] }
 0x33f   :  { %2973 = vst [vmem:[#allocation2 + $0x7] sm:$0x1] %v2972_v26  ;;  %3038 = vst [vmem:[#allocation2 + $0xe] sm:$0x1] %v3037_v28  ;;  %v3040_v31 = vld [vmem:[#allocation2 + $0xf] sm:$0x1]  ;;  %v2593_v32 = vpack.c.bf16 %v2589_v24, %v2587_v56  ;;  %v7525_v33 = vpack.c.bf16 %v2589_v24, %v2589_v24  ;;  %v10185_v35 = vpack.c.bf16 %v2590_v25, %v2588_v14 }
 0x340   :  { %v7531_v36 = vpack.c.bf16 %v2590_v25, %v2590_v25  ;;  %v3041_v37 = vsel %vm10119_vm10, %v3031_v1, %v3040_v31  ;;  %v2843_v42 = vld [vmem:[#allocation2 + $0x18] sm:$0x1]  ;;  %v2775_v51 = vld [vmem:[#allocation2 + $0x11] sm:$0x1]  ;;  %v2787_v54 = vld [vmem:[#allocation2 + $0x12] sm:$0x1] }
 0x341   :  { %3042 = vst [vmem:[#allocation2 + $0xf] sm:$0x1] %v3041_v37  ;;  %v2752_v38 = vsel %vm10066_vm8, %v2593_v32, %v2751_v30  ;;  %v2761_v39 = vrot.slane %v2593_v32, %v10063_v27  ;;  %v2834_v40 = vrot.slane %v7525_v33, %v10063_v27  ;;  %v10195_v41 = vrot.slane %v10185_v35, %v10063_v27  ;;  %v2801_v55 = vld [vmem:[#allocation2 + $0x14] sm:$0x1]  ;;  %v2852_v57 = vld [vmem:[#allocation2 + $0x19] sm:$0x1] }
 0x342   :  { %2753 = vst [vmem:[#allocation2 + $0x10] sm:$0x1] %v2752_v38  ;;  %v10198_v49 = vrot.slane %v7531_v36, %v10063_v27  ;;  %v2796_v1 = vld [vmem:[#allocation2 + $0x13] sm:$0x1]  ;;  %v2864_v2 = vld [vmem:[#allocation2 + $0x1a] sm:$0x1] }
 0x343   :  { %v2768_v50 = vrot.slane %v2761_v39, %v10063_v27  ;;  %v2778_v52 = vcombine.high %v2761_v39, %v2761_v39  ;;  %v2841_v43 = vrot.slane %v2834_v40, %v10063_v27  ;;  %v2855_v53 = vcombine.high %v2834_v40, %v2834_v40  ;;  %v2810_v46 = vld [vmem:[#allocation2 + $0x15] sm:$0x1]  ;;  %v2878_v7 = vld [vmem:[#allocation2 + $0x1c] sm:$0x1]  ;;  %v2815_v10 = vld [vmem:[#allocation2 + $0x16] sm:$0x1] }
 0x344   :  { %v3057_v56 = vrot.slane %v10195_v41, %v10063_v27  ;;  %v3068_v60 = vcombine.high %v10195_v41, %v10195_v41  ;;  %v10208_v61 = vrot.slane %v10198_v49, %v10063_v27  ;;  %v3137_v62 = vcombine.high %v10198_v49, %v10198_v49  ;;  %v2873_v11 = vld [vmem:[#allocation2 + $0x1b] sm:$0x1]  ;;  %v2824_v14 = vld [vmem:[#allocation2 + $0x17] sm:$0x1]  ;;  %v2887_v58 = vld [vmem:[#allocation2 + $0x1d] sm:$0x1] }
 0x345   :  { %v2770_v63 = vshrl.u32 %v2768_v50, 16  ;;  %v2785_v0 = vrot.slane %v2778_v52, %v10063_v27  ;;  %v2799_v44 = vcombine.high %v2768_v50, %v2768_v50  ;;  %v2844_v59 = vsel %vm10066_vm8, %v2841_v43, %v2843_v42  ;;  %v2892_v47 = vld [vmem:[#allocation2 + $0x1e] sm:$0x1]  ;;  %v2901_v31 = vld [vmem:[#allocation2 + $0x1f] sm:$0x1] }
 0x346   :  { %2845 = vst [vmem:[#allocation2 + $0x18] sm:$0x1] %v2844_v59  ;;  %v2847_v3 = vshrl.u32 %v2841_v43, 16  ;;  %v2862_v5 = vrot.slane %v2855_v53, %v10063_v27  ;;  %v2876_v6 = vcombine.high %v2841_v43, %v2841_v43  ;;  %v3059_v8 = vshll.u32 %v3057_v56, 16  ;;  %v10241_v36 = vld [vmem:[#allocation2] sm:$0xff] }
 0x347   :  { %v2776_v48 = vsel %vm10066_vm8, %v2770_v63, %v2775_v51  ;;  %v2788_v45 = vsel %vm10066_vm8, %v2785_v0, %v2787_v54  ;;  %v2791_v34 = vshrl.u32 %v2785_v0, 16  ;;  %v2802_v9 = vsel %vm10066_vm8, %v2799_v44, %v2801_v55 }
 0x348   :  { %2777 = vst [vmem:[#allocation2 + $0x11] sm:$0x1] %v2776_v48  ;;  %2789 = vst [vmem:[#allocation2 + $0x12] sm:$0x1] %v2788_v45  ;;  %v2805_v12 = vshrl.u32 %v2799_v44, 16  ;;  %v2813_v13 = vcombine.high %v2785_v0, %v2785_v0  ;;  %v2853_v15 = vsel %vm10066_vm8, %v2847_v3, %v2852_v57  ;;  %v2865_v16 = vsel %vm10066_vm8, %v2862_v5, %v2864_v2  ;;  %v10247_v41 = vld [vmem:[#allocation2 + $0x8] sm:$0xff] }
 0x349   :  { %2803 = vst [vmem:[#allocation2 + $0x14] sm:$0x1] %v2802_v9  ;;  %v2797_v17 = vsel %vm10066_vm8, %v2791_v34, %v2796_v1  ;;  %2854 = vst [vmem:[#allocation2 + $0x19] sm:$0x1] %v2853_v15  ;;  %v2868_v18 = vshrl.u32 %v2862_v5, 16  ;;  %v2879_v20 = vsel %vm10066_vm8, %v2876_v6, %v2878_v7  ;;  %v2882_v21 = vshrl.u32 %v2876_v6, 16 }
 0x34a   :  { %2866 = vst [vmem:[#allocation2 + $0x1a] sm:$0x1] %v2865_v16  ;;  %v3062_v23 = vld [vmem:[#allocation2 + $0x10] sm:$0x1]  ;;  %2798 = vst [vmem:[#allocation2 + $0x13] sm:$0x1] %v2797_v17  ;;  %v2811_v4 = vsel %vm10066_vm8, %v2805_v12, %v2810_v46  ;;  %v2816_v24 = vsel %vm10066_vm8, %v2813_v13, %v2815_v10  ;;  %v2890_v26 = vcombine.high %v2862_v5, %v2862_v5 }
 0x34b   :  { %v2819_v25 = vshrl.u32 %v2813_v13, 16  ;;  %2880 = vst [vmem:[#allocation2 + $0x1c] sm:$0x1] %v2879_v20  ;;  %2812 = vst [vmem:[#allocation2 + $0x15] sm:$0x1] %v2811_v4  ;;  %v2874_v28 = vsel %vm10066_vm8, %v2868_v18, %v2873_v11  ;;  %v2888_v30 = vsel %vm10066_vm8, %v2882_v21, %v2887_v58  ;;  %v3063_v32 = vsel %vm10119_vm10, %v3059_v8, %v3062_v23 }
 0x34c   :  { %2817 = vst [vmem:[#allocation2 + $0x16] sm:$0x1] %v2816_v24  ;;  %v3075_v33 = vrot.slane %v3068_v60, %v10063_v27  ;;  %2875 = vst [vmem:[#allocation2 + $0x1b] sm:$0x1] %v2874_v28  ;;  %v2893_v38 = vsel %vm10066_vm8, %v2890_v26, %v2892_v47  ;;  %v2896_v39 = vshrl.u32 %v2890_v26, 16  ;;  %v3087_v40 = vcombine.high %v3057_v56, %v3057_v56 }
 0x34d   :  { %v2825_v37 = vsel %vm10066_vm8, %v2819_v25, %v2824_v14  ;;  %2889 = vst [vmem:[#allocation2 + $0x1d] sm:$0x1] %v2888_v30  ;;  %3064 = vst [vmem:[#allocation2 + $0x10] sm:$0x1] %v3063_v32  ;;  %v3127_v51 = vshll.u32 %v10208_v61, 16  ;;  %v3144_v43 = vrot.slane %v3137_v62, %v10063_v27  ;;  %v3156_v55 = vcombine.high %v10208_v61, %v10208_v61 }
 0x34e   :  { %2826 = vst [vmem:[#allocation2 + $0x17] sm:$0x1] %v2825_v37  ;;  %2894 = vst [vmem:[#allocation2 + $0x1e] sm:$0x1] %v2893_v38  ;;  %v3077_v42 = vshll.u32 %v3075_v33, 16  ;;  %v3099_v50 = vcombine.high %v3075_v33, %v3075_v33  ;;  %v2902_v53 = vsel %vm10066_vm8, %v2896_v39, %v2901_v31  ;;  %v3089_v54 = vshll.u32 %v3087_v40, 16 }
 0x34f   :  { %v3130_v52 = vld [vmem:[#allocation2 + $0x18] sm:$0x1]  ;;  %v3719_v57 = vrot.slane %v10241_v36, %v10063_v27  ;;  %2903 = vst [vmem:[#allocation2 + $0x1f] sm:$0x1] %v2902_v53  ;;  %v3065_v56 = vld [vmem:[#allocation2 + $0x11] sm:$0x1]  ;;  %v3168_v1 = vcombine.high %v3144_v43, %v3144_v43  ;;  %v3761_v49 = vcombine.high %v10247_v41, %v10247_v41  ;;  %v3712_v11 = vcombine.high %v10241_v36, %v10241_v36 }
 0x350   :  { %v3080_v60 = vld [vmem:[#allocation2 + $0x12] sm:$0x1]  ;;  %v3092_v63 = vld [vmem:[#allocation2 + $0x14] sm:$0x1]  ;;  %v3131_v0 = vsel %vm10119_vm10, %v3127_v51, %v3130_v52  ;;  %v3066_v29 = vsel %vm10119_vm10, %v10185_v35, %v3065_v56  ;;  %v3101_v59 = vshll.u32 %v3099_v50, 16  ;;  %v3146_v6 = vshll.u32 %v3144_v43, 16 }
 0x351   :  { %v3081_v62 = vsel %vm10119_vm10, %v3077_v42, %v3080_v60  ;;  %v3093_v44 = vsel %vm10119_vm10, %v3089_v54, %v3092_v63  ;;  %3132 = vst [vmem:[#allocation2 + $0x18] sm:$0x1] %v3131_v0  ;;  %v3134_v2 = vld [vmem:[#allocation2 + $0x19] sm:$0x1]  ;;  %v3149_v46 = vld [vmem:[#allocation2 + $0x1a] sm:$0x1]  ;;  %v3727_v8 = vcombine.high %v3719_v57, %v3719_v57  ;;  %v3775_v10 = vrot.slane %v3761_v49, %v10063_v27 }
 0x352   :  { %3067 = vst [vmem:[#allocation2 + $0x11] sm:$0x1] %v3066_v29  ;;  %3082 = vst [vmem:[#allocation2 + $0x12] sm:$0x1] %v3081_v62  ;;  %v3084_v3 = vld [vmem:[#allocation2 + $0x13] sm:$0x1]  ;;  %v3135_v5 = vsel %vm10119_vm10, %v10208_v61, %v3134_v2  ;;  %v3150_v13 = vsel %vm10119_vm10, %v3146_v6, %v3149_v46  ;;  %v10300_v25 = vrot.slane %v3719_v57, %v10063_v27 }
 0x353   :  { %3094 = vst [vmem:[#allocation2 + $0x14] sm:$0x1] %v3093_v44  ;;  %v3158_v35 = vshll.u32 %v3156_v55, 16  ;;  %v3161_v7 = vld [vmem:[#allocation2 + $0x1c] sm:$0x1]  ;;  %v3085_v48 = vsel %vm10119_vm10, %v3075_v33, %v3084_v3  ;;  %v3170_v9 = vshll.u32 %v3168_v1, 16  ;;  %v3749_v21 = vrot.slane %v3727_v8, %v10063_v27 }
 0x354   :  { %v3096_v45 = vld [vmem:[#allocation2 + $0x15] sm:$0x1]  ;;  %v3104_v34 = vld [vmem:[#allocation2 + $0x16] sm:$0x1]  ;;  %3136 = vst [vmem:[#allocation2 + $0x19] sm:$0x1] %v3135_v5  ;;  %v3777_v23 = vcombine.high %v3775_v10, %v3775_v10  ;;  %v3726_v32 = vrot.slane %v3712_v11, %v10063_v27  ;;  %v3768_v33 = vrot.slane %v10247_v41, %v10063_v27  ;;  %v10316_v38 = vrot.slane %v3775_v10, %v10063_v27 }
 0x355   :  { %3086 = vst [vmem:[#allocation2 + $0x13] sm:$0x1] %v3085_v48  ;;  %v3097_v61 = vsel %vm10119_vm10, %v3087_v40, %v3096_v45  ;;  %v3105_v12 = vsel %vm10119_vm10, %v3101_v59, %v3104_v34  ;;  %v3153_v14 = vld [vmem:[#allocation2 + $0x1b] sm:$0x1]  ;;  %v3162_v15 = vsel %vm10119_vm10, %v3158_v35, %v3161_v7  ;;  %v3165_v16 = vld [vmem:[#allocation2 + $0x1d] sm:$0x1]  ;;  %6532 = vmatprep.mubr.bf16.mxu1 %v3749_v21 }
 0x356   :  { %3098 = vst [vmem:[#allocation2 + $0x15] sm:$0x1] %v3097_v61  ;;  %3106 = vst [vmem:[#allocation2 + $0x16] sm:$0x1] %v3105_v12  ;;  %v3108_v58 = vld [vmem:[#allocation2 + $0x17] sm:$0x1]  ;;  %v3154_v17 = vsel %vm10119_vm10, %v3144_v43, %v3153_v14  ;;  %v3166_v18 = vsel %vm10119_vm10, %v3156_v55, %v3165_v16  ;;  %v3759_v30 = vcombine.high %v3749_v21, %v3749_v21  ;;  %6533 = vmatmul.mubr.bf16.vlgmr.msra.gmra.mrb[16].mxu1 %v10300_v25 }
 0x357   :  { %3151 = vst [vmem:[#allocation2 + $0x1a] sm:$0x1] %v3150_v13  ;;  %3163 = vst [vmem:[#allocation2 + $0x1c] sm:$0x1] %v3162_v15  ;;  %v3173_v20 = vld [vmem:[#allocation2 + $0x1e] sm:$0x1]  ;;  %v3109_v4 = vsel %vm10119_vm10, %v3099_v50, %v3108_v58  ;;  %v3805_v31 = vrot.slane %v3777_v23, %v10063_v27  ;;  %v3728_v41 = vcombine.high %v3726_v32, %v3726_v32 }
 0x358   :  { %v8684_v47 = vld [vmem:[%s11864_s4 + $0x100] ss:$8 sps:$4 sm:$0xff]   ;;  %3155 = vst [vmem:[#allocation2 + $0x1b] sm:$0x1] %v3154_v17  ;;  %3167 = vst [vmem:[#allocation2 + $0x1d] sm:$0x1] %v3166_v18  ;;  %v3174_v24 = vsel %vm10119_vm10, %v3170_v9, %v3173_v20  ;;  %6573 = vmatprep.mubr.bf16.mxu1 %v3759_v30  ;;  %v10325_v42 = vrot.slane %v3726_v32, %v10063_v27  ;;  %v3776_v51 = vcombine.high %v3768_v33, %v3768_v33 }
 0x359   :  { %v8693_v26 = vld [vmem:[%s11864_s4 + $0x114] ss:$8 sps:$4 sm:$0xff]   ;;  %3110 = vst [vmem:[#allocation2 + $0x17] sm:$0x1] %v3109_v4  ;;  %3175 = vst [vmem:[#allocation2 + $0x1e] sm:$0x1] %v3174_v24  ;;  %6542 = vmatpush1.bf16.msra.mxu1 %v8684_v47  ;;  %v3809_v40 = vcombine.high %v3805_v31, %v3805_v31  ;;  %6778 = vmatprep.mubr.bf16.mxu0 %v3805_v31  ;;  %v10331_v52 = vrot.slane %v3768_v33, %v10063_v27 }
 0x35a   :  { %v3177_v28 = vld [vmem:[#allocation2 + $0x1f] sm:$0x1]  ;;  %v8688_v37 = vld [vmem:[%s11864_s4 + $0x700] ss:$8 sps:$4 sm:$0xff]   ;;  %v8691_v39 = vld [vmem:[%s11864_s4 + $0x110] ss:$8 sps:$4 sm:$0xff]   ;;  %6543 = vmatprep.subr.bf16.mxu1 %v8693_v26  ;;  %6779 = vmatmul.mubr.bf16.vlgmr.msra.gmra.mrb[12].mxu0 %v10316_v38  ;;  %v10335_v43 = vrot.slane %v3728_v41, %v10063_v27  ;;  %v10341_v54 = vrot.slane %v3776_v51, %v10063_v27 }
 0x35b   :  { %v3178_v36 = vsel %vm10119_vm10, %v3168_v1, %v3177_v28  ;;  %v8699_v50 = vld [vmem:[%s11864_s4 + $0x124] ss:$8 sps:$4 sm:$0xff]   ;;  %6788 = vmatpush1.bf16.msra.mxu0 %v8688_v37  ;;  %6819 = vmatprep.mubr.bf16.mxu0 %v3809_v40  ;;  %v8694_v53 = vld [vmem:[%s11864_s4 + $0x710] ss:$8 sps:$4 sm:$0xff]   ;;  %v8697_v55 = vld [vmem:[%s11864_s4 + $0x120] ss:$8 sps:$4 sm:$0xff]  }
 0x35c   :  { %3179 = vst [vmem:[#allocation2 + $0x1f] sm:$0x1] %v3178_v36  ;;  %6789 = vmatprep.subr.bf16.mxu0 %v8696_v22  ;;  %v8702_v57 = vld [vmem:[%s11864_s4 + $0x724] ss:$8 sps:$4 sm:$0xff]   ;;  %v8705_v56 = vld [vmem:[%s11864_s4 + $0x134] ss:$8 sps:$4 sm:$0xff]  }
 0x35d   :  { %6544 = vmatpush1.bf16.msra.mxu1 %v8691_v39  ;;  %v8700_v1 = vld [vmem:[%s11864_s4 + $0x720] ss:$8 sps:$4 sm:$0xff]   ;;  %v8703_v29 = vld [vmem:[%s11864_s4 + $0x130] ss:$8 sps:$4 sm:$0xff]   ;;  %v8708_v62 = vld [vmem:[%s11864_s4 + $0x734] ss:$8 sps:$4 sm:$0xff]  }
 0x35e   :  { %6545 = vmatprep.subr.bf16.mxu1 %v8699_v50  ;;  %v8711_v2 = vld [vmem:[%s11864_s4 + $0x144] ss:$8 sps:$4 sm:$0xff]   ;;  %v8706_v35 = vld [vmem:[%s11864_s4 + $0x730] ss:$8 sps:$4 sm:$0xff]   ;;  %v8709_v48 = vld [vmem:[%s11864_s4 + $0x140] ss:$8 sps:$4 sm:$0xff]  }
 0x35f   :  { %6790 = vmatpush1.bf16.msra.mxu0 %v8694_v53  ;;  %v8714_v45 = vld [vmem:[%s11864_s4 + $0x744] ss:$8 sps:$4 sm:$0xff]   ;;  %v8717_v9 = vld [vmem:[%s11864_s4 + $0x154] ss:$8 sps:$4 sm:$0xff]   ;;  %v8712_v61 = vld [vmem:[%s11864_s4 + $0x740] ss:$8 sps:$4 sm:$0xff]  }
 0x360   :  { %v3182_v60 = vld [vmem:[#allocation2 + $0x10] sm:$0xff]  ;;  %6791 = vmatprep.subr.bf16.mxu0 %v8702_v57  ;;  %v8723_v15 = vld [vmem:[%s11864_s4 + $0x164] ss:$8 sps:$4 sm:$0xff]   ;;  %v8721_v58 = vld [vmem:[%s11864_s4 + $0x160] ss:$8 sps:$4 sm:$0xff]  }
 0x361   :  { %v10353_v63 = vrot.slane %v3182_v60, %v10063_v27  ;;  %v3810_v0 = vcombine.high %v3182_v60, %v3182_v60  ;;  %6546 = vmatpush1.bf16.msra.mxu1 %v8697_v55  ;;  %v8715_v13 = vld [vmem:[%s11864_s4 + $0x150] ss:$8 sps:$4 sm:$0xff]   ;;  %v8720_v14 = vld [vmem:[%s11864_s4 + $0x754] ss:$8 sps:$4 sm:$0xff]   ;;  %v8726_v17 = vld [vmem:[%s11864_s4 + $0x764] ss:$8 sps:$4 sm:$0xff]  }
 0x362   :  { %6547 = vmatprep.subr.bf16.mxu1 %v8705_v56  ;;  %v8718_v16 = vld [vmem:[%s11864_s4 + $0x750] ss:$8 sps:$4 sm:$0xff]   ;;  %v8729_v18 = vld [vmem:[%s11864_s4 + $0x174] ss:$8 sps:$4 sm:$0xff]   ;;  %v8724_v20 = vld [vmem:[%s11864_s4 + $0x760] ss:$8 sps:$4 sm:$0xff]  }
 0x363   :  { %v3183_v49 = vld [vmem:[#allocation2 + $0x18] sm:$0xff]  ;;  %v10366_v44 = vrot.slane %v10353_v63, %v10063_v27  ;;  %v3824_v59 = vrot.slane %v3810_v0, %v10063_v27  ;;  %6792 = vmatpush1.bf16.msra.mxu0 %v8700_v1  ;;  %v8735_v23 = vld [vmem:[%s11864_s4 + $0x184] ss:$8 sps:$4 sm:$0xff]   ;;  %v8733_v24 = vld [vmem:[%s11864_s4 + $0x180] ss:$8 sps:$4 sm:$0xff]  }
 0x364   :  { %v10373_v46 = vrot.slane %v3183_v49, %v10063_v27  ;;  %v3859_v3 = vcombine.high %v3183_v49, %v3183_v49  ;;  %6793 = vmatprep.subr.bf16.mxu0 %v8708_v62  ;;  %v8727_v21 = vld [vmem:[%s11864_s4 + $0x170] ss:$8 sps:$4 sm:$0xff]   ;;  %v8732_v47 = vld [vmem:[%s11864_s4 + $0x774] ss:$8 sps:$4 sm:$0xff]   ;;  %v8738_v26 = vld [vmem:[%s11864_s4 + $0x784] ss:$8 sps:$4 sm:$0xff]  }
 0x365   :  { %v3826_v5 = vcombine.high %v3824_v59, %v3824_v59  ;;  %v10376_v6 = vrot.slane %v3824_v59, %v10063_v27  ;;  %6548 = vmatpush1.bf16.msra.mxu1 %v8703_v29  ;;  %v8730_v4 = vld [vmem:[%s11864_s4 + $0x770] ss:$8 sps:$4 sm:$0xff]   ;;  %v8741_v28 = vld [vmem:[%s11864_s4 + $0x194] ss:$8 sps:$4 sm:$0xff]   ;;  %v8736_v30 = vld [vmem:[%s11864_s4 + $0x780] ss:$8 sps:$4 sm:$0xff]  }
 0x366   :  { %v10383_v7 = vrot.slane %v10373_v46, %v10063_v27  ;;  %v3873_v8 = vrot.slane %v3859_v3, %v10063_v27  ;;  %6549 = vmatprep.subr.bf16.mxu1 %v8711_v2  ;;  %v8739_v31 = vld [vmem:[%s11864_s4 + $0x190] ss:$8 sps:$4 sm:$0xff]   ;;  %v8744_v32 = vld [vmem:[%s11864_s4 + $0x794] ss:$8 sps:$4 sm:$0xff]   ;;  %v8747_v33 = vld [vmem:[%s11864_s4 + $0x1a4] ss:$8 sps:$4 sm:$0xff]  }
 0x367   :  { %v10393_v34 = vrot.slane %v3826_v5, %v10063_v27  ;;  %6794 = vmatpush1.bf16.msra.mxu0 %v8706_v35  ;;  %v8742_v36 = vld [vmem:[%s11864_s4 + $0x790] ss:$8 sps:$4 sm:$0xff]   ;;  %v8745_v37 = vld [vmem:[%s11864_s4 + $0x1a0] ss:$8 sps:$4 sm:$0xff]   ;;  %v8750_v39 = vld [vmem:[%s11864_s4 + $0x7a4] ss:$8 sps:$4 sm:$0xff]  }
 0x368   :  { %v3875_v10 = vcombine.high %v3873_v8, %v3873_v8  ;;  %v10399_v11 = vrot.slane %v3873_v8, %v10063_v27  ;;  %6795 = vmatprep.subr.bf16.mxu0 %v8714_v45  ;;  %v8753_v40 = vld [vmem:[%s11864_s4 + $0x1b4] ss:$8 sps:$4 sm:$0xff]   ;;  %v8748_v22 = vld [vmem:[%s11864_s4 + $0x7a0] ss:$8 sps:$4 sm:$0xff]   ;;  %v8751_v41 = vld [vmem:[%s11864_s4 + $0x1b0] ss:$8 sps:$4 sm:$0xff]  }
 0x369   :  { %6550 = vmatpush1.bf16.msra.mxu1 %v8709_v48  ;;  %v8756_v50 = vld [vmem:[%s11864_s4 + $0x7b4] ss:$8 sps:$4 sm:$0xff]   ;;  %v8759_v51 = vld [vmem:[%s11864_s4 + $0x1c4] ss:$8 sps:$4 sm:$0xff]   ;;  %v8754_v53 = vld [vmem:[%s11864_s4 + $0x7b0] ss:$8 sps:$4 sm:$0xff]  }
 0x36a   :  { %v10405_v12 = vrot.slane %v3875_v10, %v10063_v27  ;;  %6551 = vmatprep.subr.bf16.mxu1 %v8717_v9  ;;  %v8757_v55 = vld [vmem:[%s11864_s4 + $0x1c0] ss:$8 sps:$4 sm:$0xff]   ;;  %v8762_v57 = vld [vmem:[%s11864_s4 + $0x7c4] ss:$8 sps:$4 sm:$0xff]   ;;  %v8765_v56 = vld [vmem:[%s11864_s4 + $0x1d4] ss:$8 sps:$4 sm:$0xff]   ;;  %v3757_v9 = vcombine.high %v10300_v25, %v10300_v25  ;;  %v3807_v25 = vcombine.high %v10316_v38, %v10316_v38 }
 0x36b   :  { %6796 = vmatpush1.bf16.msra.mxu0 %v8712_v61  ;;  %v8760_v60 = vld [vmem:[%s11864_s4 + $0x7c0] ss:$8 sps:$4 sm:$0xff]   ;;  %v8763_v0 = vld [vmem:[%s11864_s4 + $0x1d0] ss:$8 sps:$4 sm:$0xff]   ;;  %v8768_v1 = vld [vmem:[%s11864_s4 + $0x7d4] ss:$8 sps:$4 sm:$0xff]   ;;  %v3825_v61 = vcombine.high %v10353_v63, %v10353_v63 }
 0x36c   :  { %6797 = vmatprep.subr.bf16.mxu0 %v8720_v14  ;;  %v8771_v49 = vld [vmem:[%s11864_s4 + $0x1e4] ss:$8 sps:$4 sm:$0xff]   ;;  %v8766_v29 = vld [vmem:[%s11864_s4 + $0x7d0] ss:$8 sps:$4 sm:$0xff]   ;;  %v8769_v62 = vld [vmem:[%s11864_s4 + $0x1e0] ss:$8 sps:$4 sm:$0xff]  }
 0x36d   :  { %6552 = vmatpush1.bf16.msra.mxu1 %v8715_v13  ;;  %v8774_v59 = vld [vmem:[%s11864_s4 + $0x7e4] ss:$8 sps:$4 sm:$0xff]   ;;  %v8777_v2 = vld [vmem:[%s11864_s4 + $0x1f4] ss:$8 sps:$4 sm:$0xff]   ;;  %v8772_v3 = vld [vmem:[%s11864_s4 + $0x7e0] ss:$8 sps:$4 sm:$0xff]  }
 0x36e   :  { %6553 = vmatprep.subr.bf16.mxu1 %v8723_v15  ;;  %v8775_v5 = vld [vmem:[%s11864_s4 + $0x1f0] ss:$8 sps:$4 sm:$0xff]   ;;  %v8780_v35 = vld [vmem:[%s11864_s4 + $0x7f4] ss:$8 sps:$4 sm:$0xff]   ;;  %v8783_v8 = vld [vmem:[%s11864_s4 + $0x204] ss:$8 sps:$4 sm:$0xff]  }
 0x36f   :  { %6798 = vmatpush1.bf16.msra.mxu0 %v8718_v16  ;;  %v8778_v48 = vld [vmem:[%s11864_s4 + $0x7f0] ss:$8 sps:$4 sm:$0xff]   ;;  %v8781_v45 = vld [vmem:[%s11864_s4 + $0x200] ss:$8 sps:$4 sm:$0xff]   ;;  %v8787_v10 = vld [vmem:[%s11864_s4 + $0x804] ss:$8 sps:$4 sm:$0xff]   ;;  %v10565_v16 = vrot.slane %v3825_v61, %v10063_v27 }
 0x370   :  { %6799 = vmatprep.subr.bf16.mxu0 %v8726_v17  ;;  %v8790_v13 = vld [vmem:[%s11864_s4 + $0x214] ss:$8 sps:$4 sm:$0xff]   ;;  %v8785_v14 = vld [vmem:[%s11864_s4 + $0x800] ss:$8 sps:$4 sm:$0xff]   ;;  %v8788_v63 = vld [vmem:[%s11864_s4 + $0x210] ss:$8 sps:$4 sm:$0xff]  }
 0x371   :  { %6554 = vmatpush1.bf16.msra.mxu1 %v8721_v58  ;;  %v8793_v15 = vld [vmem:[%s11864_s4 + $0x814] ss:$8 sps:$4 sm:$0xff]   ;;  %v8796_v58 = vld [vmem:[%s11864_s4 + $0x224] ss:$8 sps:$4 sm:$0xff]   ;;  %v8791_v38 = vld [vmem:[%s11864_s4 + $0x810] ss:$8 sps:$4 sm:$0xff]  }
 0x372   :  { %6555 = vmatprep.subr.bf16.mxu1 %v8729_v18  ;;  %v8794_v17 = vld [vmem:[%s11864_s4 + $0x220] ss:$8 sps:$4 sm:$0xff]   ;;  %v8799_v18 = vld [vmem:[%s11864_s4 + $0x824] ss:$8 sps:$4 sm:$0xff]   ;;  %v8862_v61 = vld [vmem:[%s11864_s4 + $0x2d4] ss:$8 sps:$4 sm:$0xff]  }
 0x373   :  { %6800 = vmatpush1.bf16.msra.mxu0 %v8724_v20  ;;  %v8802_v20 = vld [vmem:[%s11864_s4 + $0x234] ss:$8 sps:$4 sm:$0xff]  }
 0x374   :  { %6801 = vmatprep.subr.bf16.mxu0 %v8732_v47  ;;  %v8800_v47 = vld [vmem:[%s11864_s4 + $0x230] ss:$8 sps:$4 sm:$0xff]  }
 0x375   :  { %6556 = vmatpush1.bf16.msra.mxu1 %v8727_v21  ;;  %v8797_v21 = vld [vmem:[%s11864_s4 + $0x820] ss:$8 sps:$4 sm:$0xff]  }
 0x376   :  { %6557 = vmatprep.subr.bf16.mxu1 %v8735_v23  ;;  %v8805_v23 = vld [vmem:[%s11864_s4 + $0x834] ss:$8 sps:$4 sm:$0xff]  }
 0x377   :  { %6802 = vmatpush1.bf16.msra.mxu0 %v8730_v4  ;;  %v8808_v4 = vld [vmem:[%s11864_s4 + $0x244] ss:$8 sps:$4 sm:$0xff]  }
 0x378   :  { %6803 = vmatprep.subr.bf16.mxu0 %v8738_v26  ;;  %v8806_v26 = vld [vmem:[%s11864_s4 + $0x240] ss:$8 sps:$4 sm:$0xff]  }
 0x379   :  { %6558 = vmatpush1.bf16.msra.mxu1 %v8733_v24  ;;  %v8803_v24 = vld [vmem:[%s11864_s4 + $0x830] ss:$8 sps:$4 sm:$0xff]  }
 0x37a   :  { %6559 = vmatprep.subr.bf16.mxu1 %v8741_v28  ;;  %v8811_v28 = vld [vmem:[%s11864_s4 + $0x844] ss:$8 sps:$4 sm:$0xff]  }
 0x37b   :  { %6804 = vmatpush1.bf16.msra.mxu0 %v8736_v30  ;;  %v8814_v30 = vld [vmem:[%s11864_s4 + $0x254] ss:$8 sps:$4 sm:$0xff]  }
 0x37c   :  { %6805 = vmatprep.subr.bf16.mxu0 %v8744_v32  ;;  %v8812_v32 = vld [vmem:[%s11864_s4 + $0x250] ss:$8 sps:$4 sm:$0xff]  }
 0x37d   :  { %6560 = vmatpush1.bf16.msra.mxu1 %v8739_v31  ;;  %v8809_v31 = vld [vmem:[%s11864_s4 + $0x840] ss:$8 sps:$4 sm:$0xff]  }
 0x37e   :  { %6561 = vmatprep.subr.bf16.mxu1 %v8747_v33  ;;  %v8817_v33 = vld [vmem:[%s11864_s4 + $0x854] ss:$8 sps:$4 sm:$0xff]  }
 0x37f   :  { %6806 = vmatpush1.bf16.msra.mxu0 %v8742_v36  ;;  %v8820_v36 = vld [vmem:[%s11864_s4 + $0x264] ss:$8 sps:$4 sm:$0xff]  }
 0x380   :  { %6807 = vmatprep.subr.bf16.mxu0 %v8750_v39  ;;  %v8818_v39 = vld [vmem:[%s11864_s4 + $0x260] ss:$8 sps:$4 sm:$0xff]  }
 0x381   :  { %6562 = vmatpush1.bf16.msra.mxu1 %v8745_v37  ;;  %v8815_v37 = vld [vmem:[%s11864_s4 + $0x850] ss:$8 sps:$4 sm:$0xff]  }
 0x382   :  { %6563 = vmatprep.subr.bf16.mxu1 %v8753_v40  ;;  %v8823_v40 = vld [vmem:[%s11864_s4 + $0x864] ss:$8 sps:$4 sm:$0xff]  }
 0x383   :  { %6808 = vmatpush1.bf16.msra.mxu0 %v8748_v22  ;;  %v8826_v22 = vld [vmem:[%s11864_s4 + $0x274] ss:$8 sps:$4 sm:$0xff]  }
 0x384   :  { %6809 = vmatprep.subr.bf16.mxu0 %v8756_v50  ;;  %v8824_v50 = vld [vmem:[%s11864_s4 + $0x270] ss:$8 sps:$4 sm:$0xff]  }
 0x385   :  { %6564 = vmatpush1.bf16.msra.mxu1 %v8751_v41  ;;  %v8821_v41 = vld [vmem:[%s11864_s4 + $0x860] ss:$8 sps:$4 sm:$0xff]  }
 0x386   :  { %6565 = vmatprep.subr.bf16.mxu1 %v8759_v51  ;;  %v8829_v51 = vld [vmem:[%s11864_s4 + $0x874] ss:$8 sps:$4 sm:$0xff]  }
 0x387   :  { %6810 = vmatpush1.bf16.msra.mxu0 %v8754_v53  ;;  %v8832_v53 = vld [vmem:[%s11864_s4 + $0x284] ss:$8 sps:$4 sm:$0xff]  }
 0x388   :  { %6811 = vmatprep.subr.bf16.mxu0 %v8762_v57  ;;  %v8830_v57 = vld [vmem:[%s11864_s4 + $0x280] ss:$8 sps:$4 sm:$0xff]  }
 0x389   :  { %6566 = vmatpush1.bf16.msra.mxu1 %v8757_v55  ;;  %v8827_v55 = vld [vmem:[%s11864_s4 + $0x870] ss:$8 sps:$4 sm:$0xff]  }
 0x38a   :  { %6567 = vmatprep.subr.bf16.mxu1 %v8765_v56  ;;  %v8835_v56 = vld [vmem:[%s11864_s4 + $0x884] ss:$8 sps:$4 sm:$0xff]  }
 0x38b   :  { %6812 = vmatpush1.bf16.msra.mxu0 %v8760_v60  ;;  %v8838_v60 = vld [vmem:[%s11864_s4 + $0x294] ss:$8 sps:$4 sm:$0xff]  }
 0x38c   :  { %6813 = vmatprep.subr.bf16.mxu0 %v8768_v1  ;;  %v8836_v1 = vld [vmem:[%s11864_s4 + $0x290] ss:$8 sps:$4 sm:$0xff]  }
 0x38d   :  { %6568 = vmatpush1.bf16.msra.mxu1 %v8763_v0  ;;  %v8833_v0 = vld [vmem:[%s11864_s4 + $0x880] ss:$8 sps:$4 sm:$0xff]  }
 0x38e   :  { %6569 = vmatprep.subr.bf16.mxu1 %v8771_v49  ;;  %v8841_v49 = vld [vmem:[%s11864_s4 + $0x894] ss:$8 sps:$4 sm:$0xff]  }
 0x38f   :  { %6814 = vmatpush1.bf16.msra.mxu0 %v8766_v29  ;;  %v8844_v29 = vld [vmem:[%s11864_s4 + $0x2a4] ss:$8 sps:$4 sm:$0xff]  }
 0x390   :  { %6815 = vmatprep.subr.bf16.mxu0 %v8774_v59  ;;  %v8842_v59 = vld [vmem:[%s11864_s4 + $0x2a0] ss:$8 sps:$4 sm:$0xff]  }
 0x391   :  { %6570 = vmatpush1.bf16.msra.mxu1 %v8769_v62  ;;  %v8839_v62 = vld [vmem:[%s11864_s4 + $0x890] ss:$8 sps:$4 sm:$0xff]  }
 0x392   :  { %6571 = vmatprep.subr.bf16.mxu1 %v8777_v2  ;;  %v8847_v2 = vld [vmem:[%s11864_s4 + $0x8a4] ss:$8 sps:$4 sm:$0xff]  }
 0x393   :  { %6816 = vmatpush1.bf16.msra.mxu0 %v8772_v3  ;;  %v8850_v3 = vld [vmem:[%s11864_s4 + $0x2b4] ss:$8 sps:$4 sm:$0xff]  }
 0x394   :  { %6817 = vmatprep.subr.bf16.mxu0 %v8780_v35  ;;  %v8848_v35 = vld [vmem:[%s11864_s4 + $0x2b0] ss:$8 sps:$4 sm:$0xff]  }
 0x395   :  { %6572 = vmatpush1.bf16.msra.mxu1 %v8775_v5  ;;  %v8845_v5 = vld [vmem:[%s11864_s4 + $0x8a0] ss:$8 sps:$4 sm:$0xff]  }
 0x396   :  { %6582 = vmatprep.subr.bf16.mxu1 %v8783_v8  ;;  %v8853_v8 = vld [vmem:[%s11864_s4 + $0x8b4] ss:$8 sps:$4 sm:$0xff]  }
 0x397   :  { %6818 = vmatpush1.bf16.msra.mxu0 %v8778_v48  ;;  %v8856_v48 = vld [vmem:[%s11864_s4 + $0x2c4] ss:$8 sps:$4 sm:$0xff]  }
 0x398   :  { %6574 = vmatmul.mubr.bf16.vlgmr.msra.gmra.mrb[16].mxu1 %v3757_v9  ;;  %6828 = vmatprep.subr.bf16.mxu0 %v8787_v10  ;;  %v8854_v9 = vld [vmem:[%s11864_s4 + $0x2c0] ss:$8 sps:$4 sm:$0xff]   ;;  %v8859_v10 = vld [vmem:[%s11864_s4 + $0x8c4] ss:$8 sps:$4 sm:$0xff]  }
 0x399   :  { %6583 = vmatpush1.bf16.msra.mxu1 %v8781_v45  ;;  %6614 = vmatprep.mubr.bf16.mxu1 %v10335_v43  ;;  %v8851_v45 = vld [vmem:[%s11864_s4 + $0x8b0] ss:$8 sps:$4 sm:$0xff]  }
 0x39a   :  { %6584 = vmatprep.subr.bf16.mxu1 %v8790_v13  ;;  %6820 = vmatmul.mubr.bf16.vlgmr.msra.gmra.mrb[12].mxu0 %v3807_v25  ;;  %v8857_v13 = vld [vmem:[%s11864_s4 + $0x8c0] ss:$8 sps:$4 sm:$0xff]   ;;  %v8865_v25 = vld [vmem:[%s11864_s4 + $0x8d4] ss:$8 sps:$4 sm:$0xff]  }
 0x39b   :  { %6829 = vmatpush1.bf16.msra.mxu0 %v8785_v14  ;;  %6860 = vmatprep.mubr.bf16.mxu0 %v10565_v16  ;;  %v8860_v14 = vld [vmem:[%s11864_s4 + $0x2d0] ss:$8 sps:$4 sm:$0xff]  }
 0x39c   :  { %6830 = vmatprep.subr.bf16.mxu0 %v8793_v15  ;;  %v8863_v15 = vld [vmem:[%s11864_s4 + $0x8d0] ss:$8 sps:$4 sm:$0xff]  }
 0x39d   :  { %6585 = vmatpush1.bf16.msra.mxu1 %v8788_v63  ;;  %v8868_v63 = vld [vmem:[%s11864_s4 + $0x2e4] ss:$8 sps:$4 sm:$0xff]  }
 0x39e   :  { %6586 = vmatprep.subr.bf16.mxu1 %v8796_v58  ;;  %v8866_v58 = vld [vmem:[%s11864_s4 + $0x2e0] ss:$8 sps:$4 sm:$0xff]  }
 0x39f   :  { %6831 = vmatpush1.bf16.msra.mxu0 %v8791_v38  ;;  %v8871_v38 = vld [vmem:[%s11864_s4 + $0x8e4] ss:$8 sps:$4 sm:$0xff]  }
 0x3a0   :  { %6832 = vmatprep.subr.bf16.mxu0 %v8799_v18  ;;  %v8869_v18 = vld [vmem:[%s11864_s4 + $0x8e0] ss:$8 sps:$4 sm:$0xff]  }
 0x3a1   :  { %6587 = vmatpush1.bf16.msra.mxu1 %v8794_v17  ;;  %v8874_v17 = vld [vmem:[%s11864_s4 + $0x2f4] ss:$8 sps:$4 sm:$0xff]  }
 0x3a2   :  { %6588 = vmatprep.subr.bf16.mxu1 %v8802_v20  ;;  %v8872_v20 = vld [vmem:[%s11864_s4 + $0x2f0] ss:$8 sps:$4 sm:$0xff]  }
 0x3a3   :  { %6833 = vmatpush1.bf16.msra.mxu0 %v8797_v21  ;;  %v8877_v21 = vld [vmem:[%s11864_s4 + $0x8f4] ss:$8 sps:$4 sm:$0xff]  }
 0x3a4   :  { %6834 = vmatprep.subr.bf16.mxu0 %v8805_v23  ;;  %v8875_v23 = vld [vmem:[%s11864_s4 + $0x8f0] ss:$8 sps:$4 sm:$0xff]  }
 0x3a5   :  { %6589 = vmatpush1.bf16.msra.mxu1 %v8800_v47  ;;  %v8880_v47 = vld [vmem:[%s11864_s4 + $0x304] ss:$8 sps:$4 sm:$0xff]  }
 0x3a6   :  { %6590 = vmatprep.subr.bf16.mxu1 %v8808_v4  ;;  %v8878_v4 = vld [vmem:[%s11864_s4 + $0x300] ss:$8 sps:$4 sm:$0xff]  }
 0x3a7   :  { %6835 = vmatpush1.bf16.msra.mxu0 %v8803_v24  ;;  %v8883_v24 = vld [vmem:[%s11864_s4 + $0x904] ss:$8 sps:$4 sm:$0xff]  }
 0x3a8   :  { %6836 = vmatprep.subr.bf16.mxu0 %v8811_v28  ;;  %v3760_v28 = vcombine.high %v10335_v43, %v10335_v43  ;;  %v3857_v43 = vcombine.high %v10565_v16, %v10565_v16  ;;  %v8895_v16 = vld [vmem:[%s11864_s4 + $0x924] ss:$8 sps:$4 sm:$0xff]  }
 0x3a9   :  { %6591 = vmatpush1.bf16.msra.mxu1 %v8806_v26  ;;  %v8886_v26 = vld [vmem:[%s11864_s4 + $0x314] ss:$8 sps:$4 sm:$0xff]  }
 0x3aa   :  { %6592 = vmatprep.subr.bf16.mxu1 %v8814_v30  ;;  %v8881_v30 = vld [vmem:[%s11864_s4 + $0x900] ss:$8 sps:$4 sm:$0xff]  }
 0x3ab   :  { %6837 = vmatpush1.bf16.msra.mxu0 %v8809_v31  ;;  %v8884_v31 = vld [vmem:[%s11864_s4 + $0x310] ss:$8 sps:$4 sm:$0xff]  }
 0x3ac   :  { %6838 = vmatprep.subr.bf16.mxu0 %v8817_v33  ;;  %v8892_v33 = vld [vmem:[%s11864_s4 + $0x324] ss:$8 sps:$4 sm:$0xff]  }
 0x3ad   :  { %6593 = vmatpush1.bf16.msra.mxu1 %v8812_v32  ;;  %v8889_v32 = vld [vmem:[%s11864_s4 + $0x914] ss:$8 sps:$4 sm:$0xff]  }
 0x3ae   :  { %6594 = vmatprep.subr.bf16.mxu1 %v8820_v36  ;;  %v8887_v36 = vld [vmem:[%s11864_s4 + $0x910] ss:$8 sps:$4 sm:$0xff]  }
 0x3af   :  { %6839 = vmatpush1.bf16.msra.mxu0 %v8815_v37  ;;  %v8890_v37 = vld [vmem:[%s11864_s4 + $0x320] ss:$8 sps:$4 sm:$0xff]  }
 0x3b0   :  { %6840 = vmatprep.subr.bf16.mxu0 %v8823_v40  ;;  %v8893_v40 = vld [vmem:[%s11864_s4 + $0x920] ss:$8 sps:$4 sm:$0xff]  }
 0x3b1   :  { %6595 = vmatpush1.bf16.msra.mxu1 %v8818_v39  ;;  %v8898_v39 = vld [vmem:[%s11864_s4 + $0x334] ss:$8 sps:$4 sm:$0xff]  }
 0x3b2   :  { %6596 = vmatprep.subr.bf16.mxu1 %v8826_v22  ;;  %v8896_v22 = vld [vmem:[%s11864_s4 + $0x330] ss:$8 sps:$4 sm:$0xff]  }
 0x3b3   :  { %6841 = vmatpush1.bf16.msra.mxu0 %v8821_v41  ;;  %v8901_v41 = vld [vmem:[%s11864_s4 + $0x934] ss:$8 sps:$4 sm:$0xff]  }
 0x3b4   :  { %6842 = vmatprep.subr.bf16.mxu0 %v8829_v51  ;;  %v8899_v51 = vld [vmem:[%s11864_s4 + $0x930] ss:$8 sps:$4 sm:$0xff]  }
 0x3b5   :  { %6597 = vmatpush1.bf16.msra.mxu1 %v8824_v50  ;;  %v8904_v50 = vld [vmem:[%s11864_s4 + $0x344] ss:$8 sps:$4 sm:$0xff]  }
 0x3b6   :  { %6598 = vmatprep.subr.bf16.mxu1 %v8832_v53  ;;  %v8902_v53 = vld [vmem:[%s11864_s4 + $0x340] ss:$8 sps:$4 sm:$0xff]  }
 0x3b7   :  { %6843 = vmatpush1.bf16.msra.mxu0 %v8827_v55  ;;  %v8907_v55 = vld [vmem:[%s11864_s4 + $0x944] ss:$8 sps:$4 sm:$0xff]  }
 0x3b8   :  { %6844 = vmatprep.subr.bf16.mxu0 %v8835_v56  ;;  %v8905_v56 = vld [vmem:[%s11864_s4 + $0x940] ss:$8 sps:$4 sm:$0xff]  }
 0x3b9   :  { %6599 = vmatpush1.bf16.msra.mxu1 %v8830_v57  ;;  %v8910_v57 = vld [vmem:[%s11864_s4 + $0x354] ss:$8 sps:$4 sm:$0xff]  }
 0x3ba   :  { %6600 = vmatprep.subr.bf16.mxu1 %v8838_v60  ;;  %v8908_v60 = vld [vmem:[%s11864_s4 + $0x350] ss:$8 sps:$4 sm:$0xff]  }
 0x3bb   :  { %6845 = vmatpush1.bf16.msra.mxu0 %v8833_v0  ;;  %v8913_v0 = vld [vmem:[%s11864_s4 + $0x954] ss:$8 sps:$4 sm:$0xff]  }
 0x3bc   :  { %6846 = vmatprep.subr.bf16.mxu0 %v8841_v49  ;;  %v8911_v49 = vld [vmem:[%s11864_s4 + $0x950] ss:$8 sps:$4 sm:$0xff]  }
 0x3bd   :  { %6601 = vmatpush1.bf16.msra.mxu1 %v8836_v1  ;;  %v8916_v1 = vld [vmem:[%s11864_s4 + $0x364] ss:$8 sps:$4 sm:$0xff]  }
 0x3be   :  { %6602 = vmatprep.subr.bf16.mxu1 %v8844_v29  ;;  %v8914_v29 = vld [vmem:[%s11864_s4 + $0x360] ss:$8 sps:$4 sm:$0xff]  }
 0x3bf   :  { %6847 = vmatpush1.bf16.msra.mxu0 %v8839_v62  ;;  %v8919_v62 = vld [vmem:[%s11864_s4 + $0x964] ss:$8 sps:$4 sm:$0xff]  }
 0x3c0   :  { %6848 = vmatprep.subr.bf16.mxu0 %v8847_v2  ;;  %v8917_v2 = vld [vmem:[%s11864_s4 + $0x960] ss:$8 sps:$4 sm:$0xff]  }
 0x3c1   :  { %6603 = vmatpush1.bf16.msra.mxu1 %v8842_v59  ;;  %v8922_v59 = vld [vmem:[%s11864_s4 + $0x374] ss:$8 sps:$4 sm:$0xff]  }
 0x3c2   :  { %6604 = vmatprep.subr.bf16.mxu1 %v8850_v3  ;;  %v8920_v3 = vld [vmem:[%s11864_s4 + $0x370] ss:$8 sps:$4 sm:$0xff]  }
 0x3c3   :  { %6849 = vmatpush1.bf16.msra.mxu0 %v8845_v5  ;;  %v8925_v5 = vld [vmem:[%s11864_s4 + $0x974] ss:$8 sps:$4 sm:$0xff]  }
 0x3c4   :  { %6850 = vmatprep.subr.bf16.mxu0 %v8853_v8  ;;  %v8923_v8 = vld [vmem:[%s11864_s4 + $0x970] ss:$8 sps:$4 sm:$0xff]  }
 0x3c5   :  { %6605 = vmatpush1.bf16.msra.mxu1 %v8848_v35  ;;  %v8928_v35 = vld [vmem:[%s11864_s4 + $0x384] ss:$8 sps:$4 sm:$0xff]  }
 0x3c6   :  { %6606 = vmatprep.subr.bf16.mxu1 %v8856_v48  ;;  %v8926_v48 = vld [vmem:[%s11864_s4 + $0x380] ss:$8 sps:$4 sm:$0xff]  }
 0x3c7   :  { %6851 = vmatpush1.bf16.msra.mxu0 %v8851_v45  ;;  %v8931_v45 = vld [vmem:[%s11864_s4 + $0x984] ss:$8 sps:$4 sm:$0xff]  }
 0x3c8   :  { %6852 = vmatprep.subr.bf16.mxu0 %v8859_v10  ;;  %v8929_v10 = vld [vmem:[%s11864_s4 + $0x980] ss:$8 sps:$4 sm:$0xff]  }
 0x3c9   :  { %6607 = vmatpush1.bf16.msra.mxu1 %v8854_v9  ;;  %v8934_v9 = vld [vmem:[%s11864_s4 + $0x394] ss:$8 sps:$4 sm:$0xff]  }
 0x3ca   :  { %6608 = vmatprep.subr.bf16.mxu1 %v8862_v61  ;;  %v8932_v61 = vld [vmem:[%s11864_s4 + $0x390] ss:$8 sps:$4 sm:$0xff]  }
 0x3cb   :  { %6853 = vmatpush1.bf16.msra.mxu0 %v8857_v13  ;;  %v8937_v13 = vld [vmem:[%s11864_s4 + $0x994] ss:$8 sps:$4 sm:$0xff]  }
 0x3cc   :  { %6854 = vmatprep.subr.bf16.mxu0 %v8865_v25  ;;  %v8935_v25 = vld [vmem:[%s11864_s4 + $0x990] ss:$8 sps:$4 sm:$0xff]  }
 0x3cd   :  { %6609 = vmatpush1.bf16.msra.mxu1 %v8860_v14  ;;  %v8940_v14 = vld [vmem:[%s11864_s4 + $0x3a4] ss:$8 sps:$4 sm:$0xff]  }
 0x3ce   :  { %6610 = vmatprep.subr.bf16.mxu1 %v8868_v63  ;;  %v8938_v63 = vld [vmem:[%s11864_s4 + $0x3a0] ss:$8 sps:$4 sm:$0xff]  }
 0x3cf   :  { %6855 = vmatpush1.bf16.msra.mxu0 %v8863_v15  ;;  %v8943_v15 = vld [vmem:[%s11864_s4 + $0x9a4] ss:$8 sps:$4 sm:$0xff]  }
 0x3d0   :  { %6856 = vmatprep.subr.bf16.mxu0 %v8871_v38  ;;  %v8941_v38 = vld [vmem:[%s11864_s4 + $0x9a0] ss:$8 sps:$4 sm:$0xff]  }
 0x3d1   :  { %6611 = vmatpush1.bf16.msra.mxu1 %v8866_v58  ;;  %v8946_v58 = vld [vmem:[%s11864_s4 + $0x3b4] ss:$8 sps:$4 sm:$0xff]  }
 0x3d2   :  { %6612 = vmatprep.subr.bf16.mxu1 %v8874_v17  ;;  %v8944_v17 = vld [vmem:[%s11864_s4 + $0x3b0] ss:$8 sps:$4 sm:$0xff]  }
 0x3d3   :  { %6857 = vmatpush1.bf16.msra.mxu0 %v8869_v18  ;;  %v8949_v18 = vld [vmem:[%s11864_s4 + $0x9b4] ss:$8 sps:$4 sm:$0xff]  }
 0x3d4   :  { %6858 = vmatprep.subr.bf16.mxu0 %v8877_v21  ;;  %v8947_v21 = vld [vmem:[%s11864_s4 + $0x9b0] ss:$8 sps:$4 sm:$0xff]  }
 0x3d5   :  { %6613 = vmatpush1.bf16.msra.mxu1 %v8872_v20  ;;  %v8952_v20 = vld [vmem:[%s11864_s4 + $0x3c4] ss:$8 sps:$4 sm:$0xff]  }
 0x3d6   :  { %6623 = vmatprep.subr.bf16.mxu1 %v8880_v47  ;;  %v8950_v47 = vld [vmem:[%s11864_s4 + $0x3c0] ss:$8 sps:$4 sm:$0xff]  }
 0x3d7   :  { %6859 = vmatpush1.bf16.msra.mxu0 %v8875_v23  ;;  %v8955_v23 = vld [vmem:[%s11864_s4 + $0x9c4] ss:$8 sps:$4 sm:$0xff]  }
 0x3d8   :  { %6615 = vmatmul.mubr.bf16.vlgmr.msra.gmra.mrb[16].mxu1 %v10325_v42  ;;  %6869 = vmatprep.subr.bf16.mxu0 %v8883_v24  ;;  %v8953_v24 = vld [vmem:[%s11864_s4 + $0x9c0] ss:$8 sps:$4 sm:$0xff]  }
 0x3d9   :  { %6624 = vmatpush1.bf16.msra.mxu1 %v8878_v4  ;;  %6655 = vmatprep.mubr.bf16.mxu1 %v3760_v28  ;;  %v8958_v4 = vld [vmem:[%s11864_s4 + $0x3d4] ss:$8 sps:$4 sm:$0xff]  }
 0x3da   :  { %6625 = vmatprep.subr.bf16.mxu1 %v8886_v26  ;;  %6861 = vmatmul.mubr.bf16.vlgmr.msra.gmra.mrb[12].mxu0 %v10366_v44  ;;  %v8956_v26 = vld [vmem:[%s11864_s4 + $0x3d0] ss:$8 sps:$4 sm:$0xff]   ;;  %v8961_v28 = vld [vmem:[%s11864_s4 + $0x9d4] ss:$8 sps:$4 sm:$0xff]  }
 0x3db   :  { %6870 = vmatpush1.bf16.msra.mxu0 %v8881_v30  ;;  %6901 = vmatprep.mubr.bf16.mxu0 %v3857_v43  ;;  %v8964_v30 = vld [vmem:[%s11864_s4 + $0x3e4] ss:$8 sps:$4 sm:$0xff]  }
 0x3dc   :  { %6871 = vmatprep.subr.bf16.mxu0 %v8889_v32  ;;  %v8962_v32 = vld [vmem:[%s11864_s4 + $0x3e0] ss:$8 sps:$4 sm:$0xff]   ;;  %v8967_v43 = vld [vmem:[%s11864_s4 + $0x9e4] ss:$8 sps:$4 sm:$0xff]  }
 0x3dd   :  { %6626 = vmatpush1.bf16.msra.mxu1 %v8884_v31  ;;  %v8959_v31 = vld [vmem:[%s11864_s4 + $0x9d0] ss:$8 sps:$4 sm:$0xff]  }
 0x3de   :  { %6627 = vmatprep.subr.bf16.mxu1 %v8892_v33  ;;  %v8970_v33 = vld [vmem:[%s11864_s4 + $0x3f4] ss:$8 sps:$4 sm:$0xff]  }
 0x3df   :  { %6872 = vmatpush1.bf16.msra.mxu0 %v8887_v36  ;;  %v8965_v36 = vld [vmem:[%s11864_s4 + $0x9e0] ss:$8 sps:$4 sm:$0xff]  }
 0x3e0   :  { %6873 = vmatprep.subr.bf16.mxu0 %v8895_v16  ;;  %v8973_v16 = vld [vmem:[%s11864_s4 + $0x9f4] ss:$8 sps:$4 sm:$0xff]  }
 0x3e1   :  { %6628 = vmatpush1.bf16.msra.mxu1 %v8890_v37  ;;  %v8968_v37 = vld [vmem:[%s11864_s4 + $0x3f0] ss:$8 sps:$4 sm:$0xff]  }
 0x3e2   :  { %6629 = vmatprep.subr.bf16.mxu1 %v8898_v39  ;;  %v8976_v39 = vld [vmem:[%s11864_s4 + $0x404] ss:$8 sps:$4 sm:$0xff]  }
 0x3e3   :  { %6874 = vmatpush1.bf16.msra.mxu0 %v8893_v40  ;;  %v8971_v40 = vld [vmem:[%s11864_s4 + $0x9f0] ss:$8 sps:$4 sm:$0xff]  }
 0x3e4   :  { %6875 = vmatprep.subr.bf16.mxu0 %v8901_v41  ;;  %v3758_v41 = vcombine.high %v10325_v42, %v10325_v42  ;;  %v3855_v42 = vcombine.high %v10366_v44, %v10366_v44  ;;  %v8984_v44 = vld [vmem:[%s11864_s4 + $0xa10] ss:$8 sps:$4 sm:$0xff]  }
 0x3e5   :  { %6630 = vmatpush1.bf16.msra.mxu1 %v8896_v22  ;;  %v8974_v22 = vld [vmem:[%s11864_s4 + $0x400] ss:$8 sps:$4 sm:$0xff]  }
 0x3e6   :  { %6631 = vmatprep.subr.bf16.mxu1 %v8904_v50  ;;  %v8979_v50 = vld [vmem:[%s11864_s4 + $0xa04] ss:$8 sps:$4 sm:$0xff]  }
 0x3e7   :  { %6876 = vmatpush1.bf16.msra.mxu0 %v8899_v51  ;;  %v8983_v51 = vld [vmem:[%s11864_s4 + $0x414] ss:$8 sps:$4 sm:$0xff]  }
 0x3e8   :  { %6877 = vmatprep.subr.bf16.mxu0 %v8907_v55  ;;  %v8981_v55 = vld [vmem:[%s11864_s4 + $0x410] ss:$8 sps:$4 sm:$0xff]  }
 0x3e9   :  { %6632 = vmatpush1.bf16.msra.mxu1 %v8902_v53  ;;  %v8977_v53 = vld [vmem:[%s11864_s4 + $0xa00] ss:$8 sps:$4 sm:$0xff]  }
 0x3ea   :  { %6633 = vmatprep.subr.bf16.mxu1 %v8910_v57  ;;  %v8986_v57 = vld [vmem:[%s11864_s4 + $0xa14] ss:$8 sps:$4 sm:$0xff]  }
 0x3eb   :  { %6878 = vmatpush1.bf16.msra.mxu0 %v8905_v56  ;;  %v8989_v56 = vld [vmem:[%s11864_s4 + $0x424] ss:$8 sps:$4 sm:$0xff]  }
 0x3ec   :  { %6879 = vmatprep.subr.bf16.mxu0 %v8913_v0  ;;  %v8992_v0 = vld [vmem:[%s11864_s4 + $0xa24] ss:$8 sps:$4 sm:$0xff]  }
 0x3ed   :  { %6634 = vmatpush1.bf16.msra.mxu1 %v8908_v60  ;;  %v8987_v60 = vld [vmem:[%s11864_s4 + $0x420] ss:$8 sps:$4 sm:$0xff]  }
 0x3ee   :  { %6635 = vmatprep.subr.bf16.mxu1 %v8916_v1  ;;  %v8995_v1 = vld [vmem:[%s11864_s4 + $0x434] ss:$8 sps:$4 sm:$0xff]  }
 0x3ef   :  { %6880 = vmatpush1.bf16.msra.mxu0 %v8911_v49  ;;  %v8990_v49 = vld [vmem:[%s11864_s4 + $0xa20] ss:$8 sps:$4 sm:$0xff]  }
 0x3f0   :  { %6881 = vmatprep.subr.bf16.mxu0 %v8919_v62  ;;  %v8998_v62 = vld [vmem:[%s11864_s4 + $0xa34] ss:$8 sps:$4 sm:$0xff]  }
 0x3f1   :  { %6636 = vmatpush1.bf16.msra.mxu1 %v8914_v29  ;;  %v8993_v29 = vld [vmem:[%s11864_s4 + $0x430] ss:$8 sps:$4 sm:$0xff]  }
 0x3f2   :  { %6637 = vmatprep.subr.bf16.mxu1 %v8922_v59  ;;  %v9001_v59 = vld [vmem:[%s11864_s4 + $0x444] ss:$8 sps:$4 sm:$0xff]  }
 0x3f3   :  { %6882 = vmatpush1.bf16.msra.mxu0 %v8917_v2  ;;  %v8996_v2 = vld [vmem:[%s11864_s4 + $0xa30] ss:$8 sps:$4 sm:$0xff]  }
 0x3f4   :  { %6883 = vmatprep.subr.bf16.mxu0 %v8925_v5  ;;  %v9004_v5 = vld [vmem:[%s11864_s4 + $0xa44] ss:$8 sps:$4 sm:$0xff]  }
 0x3f5   :  { %6638 = vmatpush1.bf16.msra.mxu1 %v8920_v3  ;;  %v8999_v3 = vld [vmem:[%s11864_s4 + $0x440] ss:$8 sps:$4 sm:$0xff]  }
 0x3f6   :  { %6639 = vmatprep.subr.bf16.mxu1 %v8928_v35  ;;  %v9007_v35 = vld [vmem:[%s11864_s4 + $0x454] ss:$8 sps:$4 sm:$0xff]  }
 0x3f7   :  { %6884 = vmatpush1.bf16.msra.mxu0 %v8923_v8  ;;  %v9002_v8 = vld [vmem:[%s11864_s4 + $0xa40] ss:$8 sps:$4 sm:$0xff]  }
 0x3f8   :  { %6885 = vmatprep.subr.bf16.mxu0 %v8931_v45  ;;  %v9010_v45 = vld [vmem:[%s11864_s4 + $0xa54] ss:$8 sps:$4 sm:$0xff]  }
 0x3f9   :  { %6640 = vmatpush1.bf16.msra.mxu1 %v8926_v48  ;;  %v9005_v48 = vld [vmem:[%s11864_s4 + $0x450] ss:$8 sps:$4 sm:$0xff]  }
 0x3fa   :  { %6641 = vmatprep.subr.bf16.mxu1 %v8934_v9  ;;  %v9013_v9 = vld [vmem:[%s11864_s4 + $0x464] ss:$8 sps:$4 sm:$0xff]  }
 0x3fb   :  { %6886 = vmatpush1.bf16.msra.mxu0 %v8929_v10  ;;  %v9008_v10 = vld [vmem:[%s11864_s4 + $0xa50] ss:$8 sps:$4 sm:$0xff]  }
 0x3fc   :  { %6887 = vmatprep.subr.bf16.mxu0 %v8937_v13  ;;  %v9016_v13 = vld [vmem:[%s11864_s4 + $0xa64] ss:$8 sps:$4 sm:$0xff]  }
 0x3fd   :  { %6642 = vmatpush1.bf16.msra.mxu1 %v8932_v61  ;;  %v9011_v61 = vld [vmem:[%s11864_s4 + $0x460] ss:$8 sps:$4 sm:$0xff]  }
 0x3fe   :  { %6643 = vmatprep.subr.bf16.mxu1 %v8940_v14  ;;  %v9019_v14 = vld [vmem:[%s11864_s4 + $0x474] ss:$8 sps:$4 sm:$0xff]  }
 0x3ff   :  { %6888 = vmatpush1.bf16.msra.mxu0 %v8935_v25  ;;  %v9014_v25 = vld [vmem:[%s11864_s4 + $0xa60] ss:$8 sps:$4 sm:$0xff]  }
 0x400   :  { %6889 = vmatprep.subr.bf16.mxu0 %v8943_v15  ;;  %v9022_v15 = vld [vmem:[%s11864_s4 + $0xa74] ss:$8 sps:$4 sm:$0xff]  }
 0x401   :  { %6644 = vmatpush1.bf16.msra.mxu1 %v8938_v63  ;;  %v9017_v63 = vld [vmem:[%s11864_s4 + $0x470] ss:$8 sps:$4 sm:$0xff]  }
 0x402   :  { %6645 = vmatprep.subr.bf16.mxu1 %v8946_v58  ;;  %v9025_v58 = vld [vmem:[%s11864_s4 + $0x484] ss:$8 sps:$4 sm:$0xff]  }
 0x403   :  { %6890 = vmatpush1.bf16.msra.mxu0 %v8941_v38  ;;  %v9020_v38 = vld [vmem:[%s11864_s4 + $0xa70] ss:$8 sps:$4 sm:$0xff]  }
 0x404   :  { %6891 = vmatprep.subr.bf16.mxu0 %v8949_v18  ;;  %v9028_v18 = vld [vmem:[%s11864_s4 + $0xa84] ss:$8 sps:$4 sm:$0xff]  }
 0x405   :  { %6646 = vmatpush1.bf16.msra.mxu1 %v8944_v17  ;;  %v9023_v17 = vld [vmem:[%s11864_s4 + $0x480] ss:$8 sps:$4 sm:$0xff]  }
 0x406   :  { %6647 = vmatprep.subr.bf16.mxu1 %v8952_v20  ;;  %v9031_v20 = vld [vmem:[%s11864_s4 + $0x494] ss:$8 sps:$4 sm:$0xff]  }
 0x407   :  { %6892 = vmatpush1.bf16.msra.mxu0 %v8947_v21  ;;  %v9026_v21 = vld [vmem:[%s11864_s4 + $0xa80] ss:$8 sps:$4 sm:$0xff]  }
 0x408   :  { %6893 = vmatprep.subr.bf16.mxu0 %v8955_v23  ;;  %v9034_v23 = vld [vmem:[%s11864_s4 + $0xa94] ss:$8 sps:$4 sm:$0xff]  }
 0x409   :  { %6648 = vmatpush1.bf16.msra.mxu1 %v8950_v47  ;;  %v9029_v47 = vld [vmem:[%s11864_s4 + $0x490] ss:$8 sps:$4 sm:$0xff]  }
 0x40a   :  { %6649 = vmatprep.subr.bf16.mxu1 %v8958_v4  ;;  %v9037_v4 = vld [vmem:[%s11864_s4 + $0x4a4] ss:$8 sps:$4 sm:$0xff]  }
 0x40b   :  { %6894 = vmatpush1.bf16.msra.mxu0 %v8953_v24  ;;  %v9032_v24 = vld [vmem:[%s11864_s4 + $0xa90] ss:$8 sps:$4 sm:$0xff]  }
 0x40c   :  { %6895 = vmatprep.subr.bf16.mxu0 %v8961_v28  ;;  %v9040_v28 = vld [vmem:[%s11864_s4 + $0xaa4] ss:$8 sps:$4 sm:$0xff]  }
 0x40d   :  { %6650 = vmatpush1.bf16.msra.mxu1 %v8956_v26  ;;  %v9035_v26 = vld [vmem:[%s11864_s4 + $0x4a0] ss:$8 sps:$4 sm:$0xff]  }
 0x40e   :  { %6651 = vmatprep.subr.bf16.mxu1 %v8964_v30  ;;  %v9043_v30 = vld [vmem:[%s11864_s4 + $0x4b4] ss:$8 sps:$4 sm:$0xff]  }
 0x40f   :  { %6896 = vmatpush1.bf16.msra.mxu0 %v8959_v31  ;;  %v9038_v31 = vld [vmem:[%s11864_s4 + $0xaa0] ss:$8 sps:$4 sm:$0xff]  }
 0x410   :  { %6897 = vmatprep.subr.bf16.mxu0 %v8967_v43  ;;  %v9046_v43 = vld [vmem:[%s11864_s4 + $0xab4] ss:$8 sps:$4 sm:$0xff]  }
 0x411   :  { %6652 = vmatpush1.bf16.msra.mxu1 %v8962_v32  ;;  %v9041_v32 = vld [vmem:[%s11864_s4 + $0x4b0] ss:$8 sps:$4 sm:$0xff]  }
 0x412   :  { %6653 = vmatprep.subr.bf16.mxu1 %v8970_v33  ;;  %v9049_v33 = vld [vmem:[%s11864_s4 + $0x4c4] ss:$8 sps:$4 sm:$0xff]  }
 0x413   :  { %6898 = vmatpush1.bf16.msra.mxu0 %v8965_v36  ;;  %v9044_v36 = vld [vmem:[%s11864_s4 + $0xab0] ss:$8 sps:$4 sm:$0xff]  }
 0x414   :  { %6899 = vmatprep.subr.bf16.mxu0 %v8973_v16  ;;  %v9052_v16 = vld [vmem:[%s11864_s4 + $0xac4] ss:$8 sps:$4 sm:$0xff]  }
 0x415   :  { %6654 = vmatpush1.bf16.msra.mxu1 %v8968_v37  ;;  %v9047_v37 = vld [vmem:[%s11864_s4 + $0x4c0] ss:$8 sps:$4 sm:$0xff]  }
 0x416   :  { %6664 = vmatprep.subr.bf16.mxu1 %v8976_v39  ;;  %v9055_v39 = vld [vmem:[%s11864_s4 + $0x4d4] ss:$8 sps:$4 sm:$0xff]  }
 0x417   :  { %6900 = vmatpush1.bf16.msra.mxu0 %v8971_v40  ;;  %v9050_v40 = vld [vmem:[%s11864_s4 + $0xac0] ss:$8 sps:$4 sm:$0xff]  }
 0x418   :  { %6656 = vmatmul.mubr.bf16.vlgmr.msra.gmra.mrb[16].mxu1 %v3758_v41  ;;  %6910 = vmatprep.subr.bf16.mxu0 %v8979_v50  ;;  %v9058_v41 = vld [vmem:[%s11864_s4 + $0xad4] ss:$8 sps:$4 sm:$0xff]   ;;  %v9061_v50 = vld [vmem:[%s11864_s4 + $0x4e4] ss:$8 sps:$4 sm:$0xff]  }
 0x419   :  { %6665 = vmatpush1.bf16.msra.mxu1 %v8974_v22  ;;  %6696 = vmatprep.mubr.bf16.mxu1 %v10341_v54  ;;  %v9053_v22 = vld [vmem:[%s11864_s4 + $0x4d0] ss:$8 sps:$4 sm:$0xff]  }
 0x41a   :  { %6666 = vmatprep.subr.bf16.mxu1 %v8983_v51  ;;  %6902 = vmatmul.mubr.bf16.vlgmr.msra.gmra.mrb[12].mxu0 %v3855_v42  ;;  %v9056_v51 = vld [vmem:[%s11864_s4 + $0xad0] ss:$8 sps:$4 sm:$0xff]   ;;  %v9064_v42 = vld [vmem:[%s11864_s4 + $0xae4] ss:$8 sps:$4 sm:$0xff]  }
 0x41b   :  { %6911 = vmatpush1.bf16.msra.mxu0 %v8977_v53  ;;  %6942 = vmatprep.mubr.bf16.mxu0 %v10393_v34  ;;  %v9059_v53 = vld [vmem:[%s11864_s4 + $0x4e0] ss:$8 sps:$4 sm:$0xff]  }
 0x41c   :  { %6912 = vmatprep.subr.bf16.mxu0 %v8986_v57  ;;  %v9062_v57 = vld [vmem:[%s11864_s4 + $0xae0] ss:$8 sps:$4 sm:$0xff]  }
 0x41d   :  { %6667 = vmatpush1.bf16.msra.mxu1 %v8981_v55  ;;  %v9067_v55 = vld [vmem:[%s11864_s4 + $0x4f4] ss:$8 sps:$4 sm:$0xff]  }
 0x41e   :  { %6668 = vmatprep.subr.bf16.mxu1 %v8989_v56  ;;  %v9065_v56 = vld [vmem:[%s11864_s4 + $0x4f0] ss:$8 sps:$4 sm:$0xff]  }
 0x41f   :  { %6913 = vmatpush1.bf16.msra.mxu0 %v8984_v44  ;;  %v9070_v44 = vld [vmem:[%s11864_s4 + $0xaf4] ss:$8 sps:$4 sm:$0xff]  }
 0x420   :  { %6914 = vmatprep.subr.bf16.mxu0 %v8992_v0  ;;  %v9068_v0 = vld [vmem:[%s11864_s4 + $0xaf0] ss:$8 sps:$4 sm:$0xff]  }
 0x421   :  { %6669 = vmatpush1.bf16.msra.mxu1 %v8987_v60  ;;  %v9073_v60 = vld [vmem:[%s11864_s4 + $0x504] ss:$8 sps:$4 sm:$0xff]  }
 0x422   :  { %6670 = vmatprep.subr.bf16.mxu1 %v8995_v1  ;;  %v9071_v1 = vld [vmem:[%s11864_s4 + $0x500] ss:$8 sps:$4 sm:$0xff]  }
 0x423   :  { %6915 = vmatpush1.bf16.msra.mxu0 %v8990_v49  ;;  %v9076_v49 = vld [vmem:[%s11864_s4 + $0xb04] ss:$8 sps:$4 sm:$0xff]  }
 0x424   :  { %6916 = vmatprep.subr.bf16.mxu0 %v8998_v62  ;;  %v3808_v62 = vcombine.high %v10341_v54, %v10341_v54  ;;  %v3858_v54 = vcombine.high %v10393_v34, %v10393_v34  ;;  %v9088_v34 = vld [vmem:[%s11864_s4 + $0xb24] ss:$8 sps:$4 sm:$0xff]  }
 0x425   :  { %6671 = vmatpush1.bf16.msra.mxu1 %v8993_v29  ;;  %v9079_v29 = vld [vmem:[%s11864_s4 + $0x514] ss:$8 sps:$4 sm:$0xff]  }
 0x426   :  { %6672 = vmatprep.subr.bf16.mxu1 %v9001_v59  ;;  %v9074_v59 = vld [vmem:[%s11864_s4 + $0xb00] ss:$8 sps:$4 sm:$0xff]  }
 0x427   :  { %6917 = vmatpush1.bf16.msra.mxu0 %v8996_v2  ;;  %v9077_v2 = vld [vmem:[%s11864_s4 + $0x510] ss:$8 sps:$4 sm:$0xff]  }
 0x428   :  { %6918 = vmatprep.subr.bf16.mxu0 %v9004_v5  ;;  %v9085_v5 = vld [vmem:[%s11864_s4 + $0x524] ss:$8 sps:$4 sm:$0xff]  }
 0x429   :  { %6673 = vmatpush1.bf16.msra.mxu1 %v8999_v3  ;;  %v9082_v3 = vld [vmem:[%s11864_s4 + $0xb14] ss:$8 sps:$4 sm:$0xff]  }
 0x42a   :  { %6674 = vmatprep.subr.bf16.mxu1 %v9007_v35  ;;  %v9080_v35 = vld [vmem:[%s11864_s4 + $0xb10] ss:$8 sps:$4 sm:$0xff]  }
 0x42b   :  { %6919 = vmatpush1.bf16.msra.mxu0 %v9002_v8  ;;  %v9083_v8 = vld [vmem:[%s11864_s4 + $0x520] ss:$8 sps:$4 sm:$0xff]  }
 0x42c   :  { %6920 = vmatprep.subr.bf16.mxu0 %v9010_v45  ;;  %v9086_v45 = vld [vmem:[%s11864_s4 + $0xb20] ss:$8 sps:$4 sm:$0xff]  }
 0x42d   :  { %6675 = vmatpush1.bf16.msra.mxu1 %v9005_v48  ;;  %v9091_v48 = vld [vmem:[%s11864_s4 + $0x534] ss:$8 sps:$4 sm:$0xff]  }
 0x42e   :  { %6676 = vmatprep.subr.bf16.mxu1 %v9013_v9  ;;  %v9089_v9 = vld [vmem:[%s11864_s4 + $0x530] ss:$8 sps:$4 sm:$0xff]  }
 0x42f   :  { %6921 = vmatpush1.bf16.msra.mxu0 %v9008_v10  ;;  %v9094_v10 = vld [vmem:[%s11864_s4 + $0xb34] ss:$8 sps:$4 sm:$0xff]  }
 0x430   :  { %6922 = vmatprep.subr.bf16.mxu0 %v9016_v13  ;;  %v9092_v13 = vld [vmem:[%s11864_s4 + $0xb30] ss:$8 sps:$4 sm:$0xff]  }
 0x431   :  { %6677 = vmatpush1.bf16.msra.mxu1 %v9011_v61  ;;  %v9097_v61 = vld [vmem:[%s11864_s4 + $0x544] ss:$8 sps:$4 sm:$0xff]  }
 0x432   :  { %6678 = vmatprep.subr.bf16.mxu1 %v9019_v14  ;;  %v9095_v14 = vld [vmem:[%s11864_s4 + $0x540] ss:$8 sps:$4 sm:$0xff]  }
 0x433   :  { %6923 = vmatpush1.bf16.msra.mxu0 %v9014_v25  ;;  %v9100_v25 = vld [vmem:[%s11864_s4 + $0xb44] ss:$8 sps:$4 sm:$0xff]  }
 0x434   :  { %6924 = vmatprep.subr.bf16.mxu0 %v9022_v15  ;;  %v9098_v15 = vld [vmem:[%s11864_s4 + $0xb40] ss:$8 sps:$4 sm:$0xff]  }
 0x435   :  { %6679 = vmatpush1.bf16.msra.mxu1 %v9017_v63  ;;  %v9103_v63 = vld [vmem:[%s11864_s4 + $0x554] ss:$8 sps:$4 sm:$0xff]  }
 0x436   :  { %6680 = vmatprep.subr.bf16.mxu1 %v9025_v58  ;;  %v9101_v58 = vld [vmem:[%s11864_s4 + $0x550] ss:$8 sps:$4 sm:$0xff]  }
 0x437   :  { %6925 = vmatpush1.bf16.msra.mxu0 %v9020_v38  ;;  %v9106_v38 = vld [vmem:[%s11864_s4 + $0xb54] ss:$8 sps:$4 sm:$0xff]  }
 0x438   :  { %6926 = vmatprep.subr.bf16.mxu0 %v9028_v18  ;;  %v9104_v18 = vld [vmem:[%s11864_s4 + $0xb50] ss:$8 sps:$4 sm:$0xff]  }
 0x439   :  { %6681 = vmatpush1.bf16.msra.mxu1 %v9023_v17  ;;  %v9109_v17 = vld [vmem:[%s11864_s4 + $0x564] ss:$8 sps:$4 sm:$0xff]  }
 0x43a   :  { %6682 = vmatprep.subr.bf16.mxu1 %v9031_v20  ;;  %v9107_v20 = vld [vmem:[%s11864_s4 + $0x560] ss:$8 sps:$4 sm:$0xff]  }
 0x43b   :  { %6927 = vmatpush1.bf16.msra.mxu0 %v9026_v21  ;;  %v9112_v21 = vld [vmem:[%s11864_s4 + $0xb64] ss:$8 sps:$4 sm:$0xff]  }
 0x43c   :  { %6928 = vmatprep.subr.bf16.mxu0 %v9034_v23  ;;  %v9110_v23 = vld [vmem:[%s11864_s4 + $0xb60] ss:$8 sps:$4 sm:$0xff]  }
 0x43d   :  { %6683 = vmatpush1.bf16.msra.mxu1 %v9029_v47  ;;  %v9115_v47 = vld [vmem:[%s11864_s4 + $0x574] ss:$8 sps:$4 sm:$0xff]  }
 0x43e   :  { %6684 = vmatprep.subr.bf16.mxu1 %v9037_v4  ;;  %v9113_v4 = vld [vmem:[%s11864_s4 + $0x570] ss:$8 sps:$4 sm:$0xff]  }
 0x43f   :  { %6929 = vmatpush1.bf16.msra.mxu0 %v9032_v24  ;;  %v9118_v24 = vld [vmem:[%s11864_s4 + $0xb74] ss:$8 sps:$4 sm:$0xff]  }
 0x440   :  { %6930 = vmatprep.subr.bf16.mxu0 %v9040_v28  ;;  %v9116_v28 = vld [vmem:[%s11864_s4 + $0xb70] ss:$8 sps:$4 sm:$0xff]  }
 0x441   :  { %6685 = vmatpush1.bf16.msra.mxu1 %v9035_v26  ;;  %v9121_v26 = vld [vmem:[%s11864_s4 + $0x584] ss:$8 sps:$4 sm:$0xff]  }
 0x442   :  { %6686 = vmatprep.subr.bf16.mxu1 %v9043_v30  ;;  %v9119_v30 = vld [vmem:[%s11864_s4 + $0x580] ss:$8 sps:$4 sm:$0xff]  }
 0x443   :  { %6931 = vmatpush1.bf16.msra.mxu0 %v9038_v31  ;;  %v9124_v31 = vld [vmem:[%s11864_s4 + $0xb84] ss:$8 sps:$4 sm:$0xff]  }
 0x444   :  { %6932 = vmatprep.subr.bf16.mxu0 %v9046_v43  ;;  %v9122_v43 = vld [vmem:[%s11864_s4 + $0xb80] ss:$8 sps:$4 sm:$0xff]  }
 0x445   :  { %6687 = vmatpush1.bf16.msra.mxu1 %v9041_v32  ;;  %v9127_v32 = vld [vmem:[%s11864_s4 + $0x594] ss:$8 sps:$4 sm:$0xff]  }
 0x446   :  { %6688 = vmatprep.subr.bf16.mxu1 %v9049_v33  ;;  %v9125_v33 = vld [vmem:[%s11864_s4 + $0x590] ss:$8 sps:$4 sm:$0xff]  }
 0x447   :  { %6933 = vmatpush1.bf16.msra.mxu0 %v9044_v36  ;;  %v9130_v36 = vld [vmem:[%s11864_s4 + $0xb94] ss:$8 sps:$4 sm:$0xff]  }
 0x448   :  { %6934 = vmatprep.subr.bf16.mxu0 %v9052_v16  ;;  %v9128_v16 = vld [vmem:[%s11864_s4 + $0xb90] ss:$8 sps:$4 sm:$0xff]  }
 0x449   :  { %6689 = vmatpush1.bf16.msra.mxu1 %v9047_v37  ;;  %v9133_v37 = vld [vmem:[%s11864_s4 + $0x5a4] ss:$8 sps:$4 sm:$0xff]  }
 0x44a   :  { %6690 = vmatprep.subr.bf16.mxu1 %v9055_v39  ;;  %v9131_v39 = vld [vmem:[%s11864_s4 + $0x5a0] ss:$8 sps:$4 sm:$0xff]  }
 0x44b   :  { %6935 = vmatpush1.bf16.msra.mxu0 %v9050_v40  ;;  %v9136_v40 = vld [vmem:[%s11864_s4 + $0xba4] ss:$8 sps:$4 sm:$0xff]  }
 0x44c   :  { %6936 = vmatprep.subr.bf16.mxu0 %v9058_v41  ;;  %v9134_v41 = vld [vmem:[%s11864_s4 + $0xba0] ss:$8 sps:$4 sm:$0xff]  }
 0x44d   :  { %6691 = vmatpush1.bf16.msra.mxu1 %v9053_v22  ;;  %v9139_v22 = vld [vmem:[%s11864_s4 + $0x5b4] ss:$8 sps:$4 sm:$0xff]  }
 0x44e   :  { %6692 = vmatprep.subr.bf16.mxu1 %v9061_v50  ;;  %v9137_v50 = vld [vmem:[%s11864_s4 + $0x5b0] ss:$8 sps:$4 sm:$0xff]  }
 0x44f   :  { %6937 = vmatpush1.bf16.msra.mxu0 %v9056_v51  ;;  %v9142_v51 = vld [vmem:[%s11864_s4 + $0xbb4] ss:$8 sps:$4 sm:$0xff]  }
 0x450   :  { %6938 = vmatprep.subr.bf16.mxu0 %v9064_v42  ;;  %v9140_v42 = vld [vmem:[%s11864_s4 + $0xbb0] ss:$8 sps:$4 sm:$0xff]  }
 0x451   :  { %6693 = vmatpush1.bf16.msra.mxu1 %v9059_v53  ;;  %v9145_v53 = vld [vmem:[%s11864_s4 + $0x5c4] ss:$8 sps:$4 sm:$0xff]  }
 0x452   :  { %6694 = vmatprep.subr.bf16.mxu1 %v9067_v55  ;;  %v9143_v55 = vld [vmem:[%s11864_s4 + $0x5c0] ss:$8 sps:$4 sm:$0xff]  }
 0x453   :  { %6939 = vmatpush1.bf16.msra.mxu0 %v9062_v57  ;;  %v9148_v57 = vld [vmem:[%s11864_s4 + $0xbc4] ss:$8 sps:$4 sm:$0xff]  }
 0x454   :  { %6940 = vmatprep.subr.bf16.mxu0 %v9070_v44  ;;  %v9146_v44 = vld [vmem:[%s11864_s4 + $0xbc0] ss:$8 sps:$4 sm:$0xff]  }
 0x455   :  { %6695 = vmatpush1.bf16.msra.mxu1 %v9065_v56  ;;  %v9151_v56 = vld [vmem:[%s11864_s4 + $0x5d4] ss:$8 sps:$4 sm:$0xff]  }
 0x456   :  { %6705 = vmatprep.subr.bf16.mxu1 %v9073_v60  ;;  %v9149_v60 = vld [vmem:[%s11864_s4 + $0x5d0] ss:$8 sps:$4 sm:$0xff]  }
 0x457   :  { %6941 = vmatpush1.bf16.msra.mxu0 %v9068_v0  ;;  %v9154_v0 = vld [vmem:[%s11864_s4 + $0xbd4] ss:$8 sps:$4 sm:$0xff]  }
 0x458   :  { %6697 = vmatmul.mubr.bf16.vlgmr.msra.gmra.mrb[16].mxu1 %v10331_v52  ;;  %6951 = vmatprep.subr.bf16.mxu0 %v9076_v49  ;;  %v9152_v49 = vld [vmem:[%s11864_s4 + $0xbd0] ss:$8 sps:$4 sm:$0xff]  }
 0x459   :  { %6706 = vmatpush1.bf16.msra.mxu1 %v9071_v1  ;;  %6737 = vmatprep.mubr.bf16.mxu1 %v3808_v62  ;;  %v9157_v1 = vld [vmem:[%s11864_s4 + $0x5e4] ss:$8 sps:$4 sm:$0xff]  }
 0x45a   :  { %6707 = vmatprep.subr.bf16.mxu1 %v9079_v29  ;;  %6943 = vmatmul.mubr.bf16.vlgmr.msra.gmra.mrb[12].mxu0 %v10376_v6  ;;  %v9155_v29 = vld [vmem:[%s11864_s4 + $0x5e0] ss:$8 sps:$4 sm:$0xff]   ;;  %v9160_v62 = vld [vmem:[%s11864_s4 + $0xbe4] ss:$8 sps:$4 sm:$0xff]  }
 0x45b   :  { %6952 = vmatpush1.bf16.msra.mxu0 %v9074_v59  ;;  %6983 = vmatprep.mubr.bf16.mxu0 %v3858_v54  ;;  %v9163_v59 = vld [vmem:[%s11864_s4 + $0x5f4] ss:$8 sps:$4 sm:$0xff]  }
 0x45c   :  { %6953 = vmatprep.subr.bf16.mxu0 %v9082_v3  ;;  %v9161_v3 = vld [vmem:[%s11864_s4 + $0x5f0] ss:$8 sps:$4 sm:$0xff]   ;;  %v9166_v54 = vld [vmem:[%s11864_s4 + $0xbf4] ss:$8 sps:$4 sm:$0xff]  }
 0x45d   :  { %6708 = vmatpush1.bf16.msra.mxu1 %v9077_v2  ;;  %v9158_v2 = vld [vmem:[%s11864_s4 + $0xbe0] ss:$8 sps:$4 sm:$0xff]  }
 0x45e   :  { %6709 = vmatprep.subr.bf16.mxu1 %v9085_v5  ;;  %v9164_v5 = vld [vmem:[%s11864_s4 + $0xbf0] ss:$8 sps:$4 sm:$0xff]  }
 0x45f   :  { %6954 = vmatpush1.bf16.msra.mxu0 %v9080_v35  ;;  %v9169_v35 = vld [vmem:[%s11864_s4 + $0xc04] ss:$8 sps:$4 sm:$0xff]  }
 0x460   :  { %6955 = vmatprep.subr.bf16.mxu0 %v9088_v34  ;;  %v3874_v34 = vcombine.high %v10373_v46, %v10373_v46  ;;  %v9175_v46 = vld [vmem:[%s11864_s4 + $0xc24] ss:$8 sps:$4 sm:$0xff]  }
 0x461   :  { %6710 = vmatpush1.bf16.msra.mxu1 %v9083_v8  ;;  %v3806_v8 = vcombine.high %v10331_v52, %v10331_v52  ;;  %v9170_v52 = vld [vmem:[%s11864_s4 + $0xc10] ss:$8 sps:$4 sm:$0xff]  }
 0x462   :  { %6711 = vmatprep.subr.bf16.mxu1 %v9091_v48  ;;  %v9167_v48 = vld [vmem:[%s11864_s4 + $0xc00] ss:$8 sps:$4 sm:$0xff]  }
 0x463   :  { %6956 = vmatpush1.bf16.msra.mxu0 %v9086_v45  ;;  %v3856_v45 = vcombine.high %v10376_v6, %v10376_v6  ;;  %v9173_v6 = vld [vmem:[%s11864_s4 + $0xc20] ss:$8 sps:$4 sm:$0xff]  }
 0x464   :  { %6957 = vmatprep.subr.bf16.mxu0 %v9094_v10  ;;  %v11349_v10 = vrot.slane %v3874_v34, %v10063_v27  ;;  %v9178_v27 = vld [vmem:[%s11864_s4 + $0xc34] ss:$8 sps:$4 sm:$0xff]   ;;  %v9251_v34 = vld [vmem:[%s11864_s4 + $0xdc0] ss:$8 sps:$4 sm:$0xff]  }
 0x465   :  { %6712 = vmatpush1.bf16.msra.mxu1 %v9089_v9  ;;  %v9172_v9 = vld [vmem:[%s11864_s4 + $0xc14] ss:$8 sps:$4 sm:$0xff]  }
 0x466   :  { %6713 = vmatprep.subr.bf16.mxu1 %v9097_v61  ;;  %v9176_v61 = vld [vmem:[%s11864_s4 + $0xc30] ss:$8 sps:$4 sm:$0xff]  }
 0x467   :  { %6958 = vmatpush1.bf16.msra.mxu0 %v9092_v13  ;;  %v9181_v13 = vld [vmem:[%s11864_s4 + $0xc44] ss:$8 sps:$4 sm:$0xff]  }
 0x468   :  { %6959 = vmatprep.subr.bf16.mxu0 %v9100_v25  ;;  %v9184_v25 = vld [vmem:[%s11864_s4 + $0xc54] ss:$8 sps:$4 sm:$0xff]  }
 0x469   :  { %6714 = vmatpush1.bf16.msra.mxu1 %v9095_v14  ;;  %v9179_v14 = vld [vmem:[%s11864_s4 + $0xc40] ss:$8 sps:$4 sm:$0xff]  }
 0x46a   :  { %6715 = vmatprep.subr.bf16.mxu1 %v9103_v63  ;;  %v9182_v63 = vld [vmem:[%s11864_s4 + $0xc50] ss:$8 sps:$4 sm:$0xff]  }
 0x46b   :  { %6960 = vmatpush1.bf16.msra.mxu0 %v9098_v15  ;;  %v9187_v15 = vld [vmem:[%s11864_s4 + $0xc64] ss:$8 sps:$4 sm:$0xff]  }
 0x46c   :  { %6961 = vmatprep.subr.bf16.mxu0 %v9106_v38  ;;  %v9190_v38 = vld [vmem:[%s11864_s4 + $0xc74] ss:$8 sps:$4 sm:$0xff]  }
 0x46d   :  { %6716 = vmatpush1.bf16.msra.mxu1 %v9101_v58  ;;  %v9185_v58 = vld [vmem:[%s11864_s4 + $0xc60] ss:$8 sps:$4 sm:$0xff]  }
 0x46e   :  { %6717 = vmatprep.subr.bf16.mxu1 %v9109_v17  ;;  %v9188_v17 = vld [vmem:[%s11864_s4 + $0xc70] ss:$8 sps:$4 sm:$0xff]  }
 0x46f   :  { %6962 = vmatpush1.bf16.msra.mxu0 %v9104_v18  ;;  %v9193_v18 = vld [vmem:[%s11864_s4 + $0xc84] ss:$8 sps:$4 sm:$0xff]  }
 0x470   :  { %6963 = vmatprep.subr.bf16.mxu0 %v9112_v21  ;;  %v9196_v21 = vld [vmem:[%s11864_s4 + $0xc94] ss:$8 sps:$4 sm:$0xff]  }
 0x471   :  { %6718 = vmatpush1.bf16.msra.mxu1 %v9107_v20  ;;  %v9191_v20 = vld [vmem:[%s11864_s4 + $0xc80] ss:$8 sps:$4 sm:$0xff]  }
 0x472   :  { %6719 = vmatprep.subr.bf16.mxu1 %v9115_v47  ;;  %v9194_v47 = vld [vmem:[%s11864_s4 + $0xc90] ss:$8 sps:$4 sm:$0xff]  }
 0x473   :  { %6964 = vmatpush1.bf16.msra.mxu0 %v9110_v23  ;;  %v9199_v23 = vld [vmem:[%s11864_s4 + $0xca4] ss:$8 sps:$4 sm:$0xff]  }
 0x474   :  { %6965 = vmatprep.subr.bf16.mxu0 %v9118_v24  ;;  %v9202_v24 = vld [vmem:[%s11864_s4 + $0xcb4] ss:$8 sps:$4 sm:$0xff]  }
 0x475   :  { %6720 = vmatpush1.bf16.msra.mxu1 %v9113_v4  ;;  %v9197_v4 = vld [vmem:[%s11864_s4 + $0xca0] ss:$8 sps:$4 sm:$0xff]  }
 0x476   :  { %6721 = vmatprep.subr.bf16.mxu1 %v9121_v26  ;;  %v9200_v26 = vld [vmem:[%s11864_s4 + $0xcb0] ss:$8 sps:$4 sm:$0xff]  }
 0x477   :  { %6966 = vmatpush1.bf16.msra.mxu0 %v9116_v28  ;;  %v9205_v28 = vld [vmem:[%s11864_s4 + $0xcc4] ss:$8 sps:$4 sm:$0xff]  }
 0x478   :  { %6967 = vmatprep.subr.bf16.mxu0 %v9124_v31  ;;  %v9208_v31 = vld [vmem:[%s11864_s4 + $0xcd4] ss:$8 sps:$4 sm:$0xff]  }
 0x479   :  { %6722 = vmatpush1.bf16.msra.mxu1 %v9119_v30  ;;  %v9203_v30 = vld [vmem:[%s11864_s4 + $0xcc0] ss:$8 sps:$4 sm:$0xff]  }
 0x47a   :  { %6723 = vmatprep.subr.bf16.mxu1 %v9127_v32  ;;  %v9206_v32 = vld [vmem:[%s11864_s4 + $0xcd0] ss:$8 sps:$4 sm:$0xff]  }
 0x47b   :  { %6968 = vmatpush1.bf16.msra.mxu0 %v9122_v43  ;;  %v9211_v43 = vld [vmem:[%s11864_s4 + $0xce4] ss:$8 sps:$4 sm:$0xff]  }
 0x47c   :  { %6969 = vmatprep.subr.bf16.mxu0 %v9130_v36  ;;  %v9214_v36 = vld [vmem:[%s11864_s4 + $0xcf4] ss:$8 sps:$4 sm:$0xff]  }
 0x47d   :  { %6724 = vmatpush1.bf16.msra.mxu1 %v9125_v33  ;;  %v9209_v33 = vld [vmem:[%s11864_s4 + $0xce0] ss:$8 sps:$4 sm:$0xff]  }
 0x47e   :  { %6725 = vmatprep.subr.bf16.mxu1 %v9133_v37  ;;  %v9212_v37 = vld [vmem:[%s11864_s4 + $0xcf0] ss:$8 sps:$4 sm:$0xff]  }
 0x47f   :  { %6970 = vmatpush1.bf16.msra.mxu0 %v9128_v16  ;;  %v9217_v16 = vld [vmem:[%s11864_s4 + $0xd04] ss:$8 sps:$4 sm:$0xff]  }
 0x480   :  { %6971 = vmatprep.subr.bf16.mxu0 %v9136_v40  ;;  %v9220_v40 = vld [vmem:[%s11864_s4 + $0xd14] ss:$8 sps:$4 sm:$0xff]  }
 0x481   :  { %6726 = vmatpush1.bf16.msra.mxu1 %v9131_v39  ;;  %v9215_v39 = vld [vmem:[%s11864_s4 + $0xd00] ss:$8 sps:$4 sm:$0xff]  }
 0x482   :  { %6727 = vmatprep.subr.bf16.mxu1 %v9139_v22  ;;  %v3906_v22 = vcombine.high %v11349_v10, %v11349_v10 }
 0x483   :  { %6972 = vmatpush1.bf16.msra.mxu0 %v9134_v41  ;;  %v9218_v41 = vld [vmem:[%s11864_s4 + $0xd10] ss:$8 sps:$4 sm:$0xff]  }
 0x484   :  { %6973 = vmatprep.subr.bf16.mxu0 %v9142_v51  ;;  %v9221_v51 = vld [vmem:[%s11864_s4 + $0xd20] ss:$8 sps:$4 sm:$0xff]  }
 0x485   :  { %6728 = vmatpush1.bf16.msra.mxu1 %v9137_v50  ;;  %v9223_v50 = vld [vmem:[%s11864_s4 + $0xd24] ss:$8 sps:$4 sm:$0xff]  }
 0x486   :  { %6729 = vmatprep.subr.bf16.mxu1 %v9145_v53  ;;  %v9226_v53 = vld [vmem:[%s11864_s4 + $0xd34] ss:$8 sps:$4 sm:$0xff]  }
 0x487   :  { %6974 = vmatpush1.bf16.msra.mxu0 %v9140_v42  ;;  %v9224_v42 = vld [vmem:[%s11864_s4 + $0xd30] ss:$8 sps:$4 sm:$0xff]  }
 0x488   :  { %6975 = vmatprep.subr.bf16.mxu0 %v9148_v57  ;;  %v9227_v57 = vld [vmem:[%s11864_s4 + $0xd40] ss:$8 sps:$4 sm:$0xff]  }
 0x489   :  { %6730 = vmatpush1.bf16.msra.mxu1 %v9143_v55  ;;  %v9229_v55 = vld [vmem:[%s11864_s4 + $0xd44] ss:$8 sps:$4 sm:$0xff]  }
 0x48a   :  { %6731 = vmatprep.subr.bf16.mxu1 %v9151_v56  ;;  %v9232_v56 = vld [vmem:[%s11864_s4 + $0xd54] ss:$8 sps:$4 sm:$0xff]  }
 0x48b   :  { %6976 = vmatpush1.bf16.msra.mxu0 %v9146_v44  ;;  %v9230_v44 = vld [vmem:[%s11864_s4 + $0xd50] ss:$8 sps:$4 sm:$0xff]  }
 0x48c   :  { %6977 = vmatprep.subr.bf16.mxu0 %v9154_v0  ;;  %v9233_v0 = vld [vmem:[%s11864_s4 + $0xd60] ss:$8 sps:$4 sm:$0xff]  }
 0x48d   :  { %6732 = vmatpush1.bf16.msra.mxu1 %v9149_v60  ;;  %v9235_v60 = vld [vmem:[%s11864_s4 + $0xd64] ss:$8 sps:$4 sm:$0xff]  }
 0x48e   :  { %6733 = vmatprep.subr.bf16.mxu1 %v9157_v1  ;;  %v9238_v1 = vld [vmem:[%s11864_s4 + $0xd74] ss:$8 sps:$4 sm:$0xff]  }
 0x48f   :  { %6978 = vmatpush1.bf16.msra.mxu0 %v9152_v49  ;;  %v9236_v49 = vld [vmem:[%s11864_s4 + $0xd70] ss:$8 sps:$4 sm:$0xff]  }
 0x490   :  { %6979 = vmatprep.subr.bf16.mxu0 %v9160_v62  ;;  %v9239_v62 = vld [vmem:[%s11864_s4 + $0xd80] ss:$8 sps:$4 sm:$0xff]  }
 0x491   :  { %6734 = vmatpush1.bf16.msra.mxu1 %v9155_v29  ;;  %v9241_v29 = vld [vmem:[%s11864_s4 + $0xd84] ss:$8 sps:$4 sm:$0xff]  }
 0x492   :  { %6735 = vmatprep.subr.bf16.mxu1 %v9163_v59  ;;  %v9244_v59 = vld [vmem:[%s11864_s4 + $0xd94] ss:$8 sps:$4 sm:$0xff]  }
 0x493   :  { %6980 = vmatpush1.bf16.msra.mxu0 %v9158_v2  ;;  %v9242_v2 = vld [vmem:[%s11864_s4 + $0xd90] ss:$8 sps:$4 sm:$0xff]  }
 0x494   :  { %6981 = vmatprep.subr.bf16.mxu0 %v9166_v54  ;;  %v9245_v54 = vld [vmem:[%s11864_s4 + $0xda0] ss:$8 sps:$4 sm:$0xff]  }
 0x495   :  { %6736 = vmatpush1.bf16.msra.mxu1 %v9161_v3  ;;  %v9247_v3 = vld [vmem:[%s11864_s4 + $0xda4] ss:$8 sps:$4 sm:$0xff]  }
 0x497   :  { %6982 = vmatpush1.bf16.msra.mxu0 %v9164_v5  ;;  %v9250_v5 = vld [vmem:[%s11864_s4 + $0xdb4] ss:$8 sps:$4 sm:$0xff]  }
 0x498   :  { %6738 = vmatmul.mubr.bf16.vlgmr.msra.gmra.mrb[16].mxu1 %v3806_v8  ;;  %6992 = vmatprep.subr.bf16.mxu0 %v9169_v35  ;;  %v9248_v35 = vld [vmem:[%s11864_s4 + $0xdb0] ss:$8 sps:$4 sm:$0xff]   ;;  %v9253_v8 = vld [vmem:[%s11864_s4 + $0xdc4] ss:$8 sps:$4 sm:$0xff]  }
 0x49a   :  { %6984 = vmatmul.mubr.bf16.vlgmr.msra.gmra.mrb[12].mxu0 %v3856_v45  ;;  %v9254_v45 = vld [vmem:[%s11864_s4 + $0xdd0] ss:$8 sps:$4 sm:$0xff]  }
 0x49b   :  { %6993 = vmatpush1.bf16.msra.mxu0 %v9167_v48  ;;  %7024 = vmatprep.mubr.bf16.mxu0 %v11349_v10  ;;  %v9256_v48 = vld [vmem:[%s11864_s4 + $0xdd4] ss:$8 sps:$4 sm:$0xff]   ;;  %v9257_v10 = vld [vmem:[%s11864_s4 + $0xde0] ss:$8 sps:$4 sm:$0xff]  }
 0x49c   :  { %6994 = vmatprep.subr.bf16.mxu0 %v9172_v9  ;;  %v9259_v9 = vld [vmem:[%s11864_s4 + $0xde4] ss:$8 sps:$4 sm:$0xff]  }
 0x49f   :  { %6995 = vmatpush1.bf16.msra.mxu0 %v9170_v52  ;;  %v9262_v52 = vld [vmem:[%s11864_s4 + $0xdf4] ss:$8 sps:$4 sm:$0xff]  }
 0x4a0   :  { %6996 = vmatprep.subr.bf16.mxu0 %v9175_v46  ;;  %v9260_v46 = vld [vmem:[%s11864_s4 + $0xdf0] ss:$8 sps:$4 sm:$0xff]  }
 0x4a3   :  { %6997 = vmatpush1.bf16.msra.mxu0 %v9173_v6  ;;  %v9265_v6 = vld [vmem:[%s11864_s4 + $0xe04] ss:$8 sps:$4 sm:$0xff]  }
 0x4a4   :  { %6998 = vmatprep.subr.bf16.mxu0 %v9178_v27  ;;  %v9263_v27 = vld [vmem:[%s11864_s4 + $0xe00] ss:$8 sps:$4 sm:$0xff]  }
 0x4a7   :  { %6999 = vmatpush1.bf16.msra.mxu0 %v9176_v61  ;;  %v3904_v61 = vcombine.high %v10383_v7, %v10383_v7 }
 0x4a8   :  { %7000 = vmatprep.subr.bf16.mxu0 %v9181_v13  ;;  %v9269_v13 = vld [vmem:[%s11864_s4 + $0xe14] ss:$8 sps:$4 sm:$0xff]  }
 0x4ab   :  { %7001 = vmatpush1.bf16.msra.mxu0 %v9179_v14  ;;  %v9267_v14 = vld [vmem:[%s11864_s4 + $0xe10] ss:$8 sps:$4 sm:$0xff]  }
 0x4ac   :  { %7002 = vmatprep.subr.bf16.mxu0 %v9184_v25  ;;  %v9272_v25 = vld [vmem:[%s11864_s4 + $0xe24] ss:$8 sps:$4 sm:$0xff]  }
 0x4af   :  { %7003 = vmatpush1.bf16.msra.mxu0 %v9182_v63  ;;  %v7174_v63 = vld [vmem:[%s11866_s6 + $0x80] sm:$0xff] }
 0x4b0   :  { %7004 = vmatprep.subr.bf16.mxu0 %v9187_v15  ;;  %v7158_v15 = vld [vmem:[%s11866_s6] sm:$0xff] }
 0x4b3   :  { %7005 = vmatpush1.bf16.msra.mxu0 %v9185_v58 }
 0x4b4   :  { %7006 = vmatprep.subr.bf16.mxu0 %v9190_v38  ;;  %v7159_v38 = vld [vmem:[%s11866_s6 + $0x8] sm:$0xff] }
 0x4b7   :  { %7007 = vmatpush1.bf16.msra.mxu0 %v9188_v17  ;;  %v7176_v17 = vld [vmem:[%s11866_s6 + $0x90] sm:$0xff] }
 0x4b8   :  { %7008 = vmatprep.subr.bf16.mxu0 %v9193_v18  ;;  %v7177_v18 = vld [vmem:[%s11866_s6 + $0x98] sm:$0xff] }
 0x4bb   :  { %7009 = vmatpush1.bf16.msra.mxu0 %v9191_v20  ;;  %v8301_v20 = vpack.c.bf16 %v7159_v38, %v7158_v15  ;;  %v9306_v15 = vld [vmem:[%s11864_s4 + $0xee0] ss:$8 sps:$4 sm:$0xff]   ;;  %v9309_v38 = vld [vmem:[%s11864_s4 + $0xef0] ss:$8 sps:$4 sm:$0xff]  }
 0x4bc   :  { %7010 = vmatprep.subr.bf16.mxu0 %v9196_v21  ;;  %v8303_v21 = vpack.c.bf16 %v7177_v18, %v7176_v17  ;;  %v9314_v17 = vld [vmem:[%s11864_s4 + $0xf04] ss:$8 sps:$4 sm:$0xff]   ;;  %v9312_v18 = vld [vmem:[%s11864_s4 + $0xf00] ss:$8 sps:$4 sm:$0xff]  }
 0x4bf   :  { %7011 = vmatpush1.bf16.msra.mxu0 %v9194_v47  ;;  %v7160_v47 = vld [vmem:[%s11866_s6 + $0x10] sm:$0xff] }
 0x4c0   :  { %7012 = vmatprep.subr.bf16.mxu0 %v9199_v23  ;;  %v7161_v23 = vld [vmem:[%s11866_s6 + $0x18] sm:$0xff] }
 0x4c3   :  { %7013 = vmatpush1.bf16.msra.mxu0 %v9197_v4  ;;  %v7178_v4 = vld [vmem:[%s11866_s6 + $0xa0] sm:$0xff] }
 0x4c4   :  { %7014 = vmatprep.subr.bf16.mxu0 %v9202_v24  ;;  %v7179_v24 = vld [vmem:[%s11866_s6 + $0xa8] sm:$0xff] }
 0x4c7   :  { %7015 = vmatpush1.bf16.msra.mxu0 %v9200_v26  ;;  %v8305_v26 = vpack.c.bf16 %v7161_v23, %v7160_v47  ;;  %v9315_v47 = vld [vmem:[%s11864_s4 + $0xf10] ss:$8 sps:$4 sm:$0xff]   ;;  %v9320_v23 = vld [vmem:[%s11864_s4 + $0xf24] ss:$8 sps:$4 sm:$0xff]  }
 0x4c8   :  { %7016 = vmatprep.subr.bf16.mxu0 %v9205_v28  ;;  %v9270_v28 = vld [vmem:[%s11864_s4 + $0xe20] ss:$8 sps:$4 sm:$0xff]  }
 0x4cb   :  { %7017 = vmatpush1.bf16.msra.mxu0 %v9203_v30  ;;  %v8307_v30 = vpack.c.bf16 %v7179_v24, %v7178_v4  ;;  %v9318_v4 = vld [vmem:[%s11864_s4 + $0xf20] ss:$8 sps:$4 sm:$0xff]   ;;  %v9321_v24 = vld [vmem:[%s11864_s4 + $0xf30] ss:$8 sps:$4 sm:$0xff]  }
 0x4cc   :  { %7018 = vmatprep.subr.bf16.mxu0 %v9208_v31  ;;  %v7162_v31 = vld [vmem:[%s11866_s6 + $0x20] sm:$0xff] }
 0x4cf   :  { %7019 = vmatpush1.bf16.msra.mxu0 %v9206_v32  ;;  %v7163_v32 = vld [vmem:[%s11866_s6 + $0x28] sm:$0xff] }
 0x4d0   :  { %7020 = vmatprep.subr.bf16.mxu0 %v9211_v43  ;;  %v9275_v43 = vld [vmem:[%s11864_s4 + $0xe34] ss:$8 sps:$4 sm:$0xff]  }
 0x4d3   :  { %7021 = vmatpush1.bf16.msra.mxu0 %v9209_v33  ;;  %v7180_v33 = vld [vmem:[%s11866_s6 + $0xb0] sm:$0xff] }
 0x4d4   :  { %7022 = vmatprep.subr.bf16.mxu0 %v9214_v36  ;;  %v7181_v36 = vld [vmem:[%s11866_s6 + $0xb8] sm:$0xff] }
 0x4d7   :  { %7023 = vmatpush1.bf16.msra.mxu0 %v9212_v37  ;;  %v8309_v37 = vpack.c.bf16 %v7163_v32, %v7162_v31 }
 0x4d8   :  { %7033 = vmatprep.subr.bf16.mxu0 %v9217_v16  ;;  %v9273_v16 = vld [vmem:[%s11864_s4 + $0xe30] ss:$8 sps:$4 sm:$0xff]  }
 0x4da   :  { %7025 = vmatmul.mubr.bf16.vlgmr.msra.gmra.mrb[12].mxu0 %v10383_v7  ;;  %v7175_v7 = vld [vmem:[%s11866_s6 + $0x88] sm:$0xff] }
 0x4db   :  { %7034 = vmatpush1.bf16.msra.mxu0 %v9215_v39  ;;  %7065 = vmatprep.mubr.bf16.mxu0 %v3906_v22  ;;  %v8299_v58 = vpack.c.bf16 %v7175_v7, %v7174_v63  ;;  %v8311_v39 = vpack.c.bf16 %v7181_v36, %v7180_v33  ;;  %v7165_v22 = vld [vmem:[%s11866_s6 + $0x38] sm:$0xff]  ;;  %v9308_v7 = vld [vmem:[%s11864_s4 + $0xee4] ss:$8 sps:$4 sm:$0xff]  }
 0x4dc   :  { %7035 = vmatprep.subr.bf16.mxu0 %v9220_v40  ;;  %v7164_v40 = vld [vmem:[%s11866_s6 + $0x30] sm:$0xff]  ;;  %v9332_v36 = vld [vmem:[%s11864_s4 + $0xf64] ss:$8 sps:$4 sm:$0xff]  }
 0x4dd   :  { %8300 = vmatprep.subr.bf16.mxu1 %v8299_v58  ;;  %v9303_v63 = vld [vmem:[%s11864_s4 + $0xed0] ss:$8 sps:$4 sm:$0xff]   ;;  %v9311_v58 = vld [vmem:[%s11864_s4 + $0xef4] ss:$8 sps:$4 sm:$0xff]  }
 0x4de   :  { %8302 = vmatpush3.bf16.msra.mxu1 %v8301_v20  ;;  %v9317_v20 = vld [vmem:[%s11864_s4 + $0xf14] ss:$8 sps:$4 sm:$0xff]  }
 0x4df   :  { %7036 = vmatpush1.bf16.msra.mxu0 %v9218_v41  ;;  %8304 = vmatprep.subr.bf16.mxu1 %v8303_v21  ;;  %v9278_v41 = vld [vmem:[%s11864_s4 + $0xe44] ss:$8 sps:$4 sm:$0xff]   ;;  %v3907_v21 = vcombine.high %v10405_v12, %v10405_v12 }
 0x4e0   :  { %7037 = vmatprep.subr.bf16.mxu0 %v9223_v50  ;;  %v7182_v50 = vld [vmem:[%s11866_s6 + $0xc0] sm:$0xff] }
 0x4e2   :  { %8306 = vmatpush3.bf16.msra.mxu1 %v8305_v26  ;;  %v9326_v26 = vld [vmem:[%s11864_s4 + $0xf44] ss:$8 sps:$4 sm:$0xff]  }
 0x4e3   :  { %7038 = vmatpush1.bf16.msra.mxu0 %v9221_v51  ;;  %8308 = vmatprep.subr.bf16.mxu1 %v8307_v30  ;;  %v7183_v51 = vld [vmem:[%s11866_s6 + $0xc8] sm:$0xff]  ;;  %v9329_v30 = vld [vmem:[%s11864_s4 + $0xf54] ss:$8 sps:$4 sm:$0xff]  }
 0x4e4   :  { %7039 = vmatprep.subr.bf16.mxu0 %v9226_v53  ;;  %v8313_v53 = vpack.c.bf16 %v7165_v22, %v7164_v40  ;;  %v9333_v40 = vld [vmem:[%s11864_s4 + $0xf70] ss:$8 sps:$4 sm:$0xff]   ;;  %v9338_v22 = vld [vmem:[%s11864_s4 + $0xf84] ss:$8 sps:$4 sm:$0xff]  }
 0x4e6   :  { %8310 = vmatpush3.bf16.msra.mxu1 %v8309_v37 }
 0x4e7   :  { %7040 = vmatpush1.bf16.msra.mxu0 %v9224_v42  ;;  %v9276_v42 = vld [vmem:[%s11864_s4 + $0xe40] ss:$8 sps:$4 sm:$0xff]   ;;  %8312 = vmatprep.subr.bf16.mxu1 %v8311_v39  ;;  %v9335_v39 = vld [vmem:[%s11864_s4 + $0xf74] ss:$8 sps:$4 sm:$0xff]  }
 0x4e8   :  { %7041 = vmatprep.subr.bf16.mxu0 %v9229_v55  ;;  %v8315_v55 = vpack.c.bf16 %v7183_v51, %v7182_v50  ;;  %v9341_v50 = vld [vmem:[%s11864_s4 + $0xf94] ss:$8 sps:$4 sm:$0xff]   ;;  %v9339_v51 = vld [vmem:[%s11864_s4 + $0xf90] ss:$8 sps:$4 sm:$0xff]  }
 0x4ea   :  { %8314 = vmatpush3.bf16.msra.mxu1 %v8313_v53  ;;  %v9344_v53 = vld [vmem:[%s11864_s4 + $0xfa4] ss:$8 sps:$4 sm:$0xff]  }
 0x4eb   :  { %7042 = vmatpush1.bf16.msra.mxu0 %v9227_v57  ;;  %v7166_v57 = vld [vmem:[%s11866_s6 + $0x40] sm:$0xff]  ;;  %8316 = vmatprep.subr.bf16.mxu1 %v8315_v55  ;;  %v9347_v55 = vld [vmem:[%s11864_s4 + $0xfb4] ss:$8 sps:$4 sm:$0xff]  }
 0x4ec   :  { %7043 = vmatprep.subr.bf16.mxu0 %v9232_v56  ;;  %v7167_v56 = vld [vmem:[%s11866_s6 + $0x48] sm:$0xff] }
 0x4ef   :  { %7044 = vmatpush1.bf16.msra.mxu0 %v9230_v44  ;;  %v9281_v44 = vld [vmem:[%s11864_s4 + $0xe54] ss:$8 sps:$4 sm:$0xff]  }
 0x4f0   :  { %7045 = vmatprep.subr.bf16.mxu0 %v9235_v60  ;;  %v7184_v60 = vld [vmem:[%s11866_s6 + $0xd0] sm:$0xff] }
 0x4f3   :  { %7046 = vmatpush1.bf16.msra.mxu0 %v9233_v0  ;;  %v7185_v0 = vld [vmem:[%s11866_s6 + $0xd8] sm:$0xff] }
 0x4f4   :  { %7047 = vmatprep.subr.bf16.mxu0 %v9238_v1  ;;  %v8317_v1 = vpack.c.bf16 %v7167_v56, %v7166_v57  ;;  %v9345_v57 = vld [vmem:[%s11864_s4 + $0xfb0] ss:$8 sps:$4 sm:$0xff]   ;;  %v9350_v56 = vld [vmem:[%s11864_s4 + $0xfc4] ss:$8 sps:$4 sm:$0xff]  }
 0x4f6   :  { %8318 = vmatpush3.bf16.msra.mxu1 %v8317_v1  ;;  %v9356_v1 = vld [vmem:[%s11864_s4 + $0xfe4] ss:$8 sps:$4 sm:$0xff]  }
 0x4f7   :  { %7048 = vmatpush1.bf16.msra.mxu0 %v9236_v49  ;;  %v9279_v49 = vld [vmem:[%s11864_s4 + $0xe50] ss:$8 sps:$4 sm:$0xff]  }
 0x4f8   :  { %7049 = vmatprep.subr.bf16.mxu0 %v9241_v29  ;;  %v8319_v29 = vpack.c.bf16 %v7185_v0, %v7184_v60  ;;  %v9353_v60 = vld [vmem:[%s11864_s4 + $0xfd4] ss:$8 sps:$4 sm:$0xff]   ;;  %v9351_v0 = vld [vmem:[%s11864_s4 + $0xfd0] ss:$8 sps:$4 sm:$0xff]  }
 0x4fa   :  { %8320 = vmatprep.subr.bf16.mxu1 %v8319_v29  ;;  %v9359_v29 = vld [vmem:[%s11864_s4 + $0xff4] ss:$8 sps:$4 sm:$0xff]  }
 0x4fb   :  { %7050 = vmatpush1.bf16.msra.mxu0 %v9239_v62  ;;  %v7168_v62 = vld [vmem:[%s11866_s6 + $0x50] sm:$0xff] }
 0x4fc   :  { %7051 = vmatprep.subr.bf16.mxu0 %v9244_v59  ;;  %v7169_v59 = vld [vmem:[%s11866_s6 + $0x58] sm:$0xff] }
 0x4ff   :  { %7052 = vmatpush1.bf16.msra.mxu0 %v9242_v2  ;;  %v9284_v2 = vld [vmem:[%s11864_s4 + $0xe64] ss:$8 sps:$4 sm:$0xff]  }
 0x500   :  { %7053 = vmatprep.subr.bf16.mxu0 %v9247_v3  ;;  %v7186_v3 = vld [vmem:[%s11866_s6 + $0xe0] sm:$0xff] }
 0x503   :  { %7054 = vmatpush1.bf16.msra.mxu0 %v9245_v54  ;;  %v7187_v54 = vld [vmem:[%s11866_s6 + $0xe8] sm:$0xff] }
 0x504   :  { %7055 = vmatprep.subr.bf16.mxu0 %v9250_v5  ;;  %v8321_v5 = vpack.c.bf16 %v7169_v59, %v7168_v62  ;;  %v9357_v62 = vld [vmem:[%s11864_s4 + $0xff0] ss:$8 sps:$4 sm:$0xff]   ;;  %v3905_v59 = vcombine.high %v10399_v11, %v10399_v11 }
 0x506   :  { %8322 = vmatpush3.bf16.msra.mxu1 %v8321_v5  ;;  %v7188_v5 = vld [vmem:[%s11866_s6 + $0xf0] sm:$0xff] }
 0x507   :  { %7056 = vmatpush1.bf16.msra.mxu0 %v9248_v35  ;;  %v9282_v35 = vld [vmem:[%s11864_s4 + $0xe60] ss:$8 sps:$4 sm:$0xff]  }
 0x508   :  { %7057 = vmatprep.subr.bf16.mxu0 %v9253_v8  ;;  %v8323_v8 = vpack.c.bf16 %v7187_v54, %v7186_v3  ;;  %v7171_v3 = vld [vmem:[%s11866_s6 + $0x68] sm:$0xff] }
 0x50a   :  { %8324 = vmatprep.subr.bf16.mxu1 %v8323_v8 }
 0x50b   :  { %7058 = vmatpush1.bf16.msra.mxu0 %v9251_v34  ;;  %v9287_v34 = vld [vmem:[%s11864_s4 + $0xe74] ss:$8 sps:$4 sm:$0xff]  }
 0x50c   :  { %7059 = vmatprep.subr.bf16.mxu0 %v9256_v48  ;;  %v9285_v48 = vld [vmem:[%s11864_s4 + $0xe70] ss:$8 sps:$4 sm:$0xff]  }
 0x50f   :  { %7060 = vmatpush1.bf16.msra.mxu0 %v9254_v45  ;;  %v9290_v45 = vld [vmem:[%s11864_s4 + $0xe84] ss:$8 sps:$4 sm:$0xff]  }
 0x510   :  { %7061 = vmatprep.subr.bf16.mxu0 %v9259_v9  ;;  %v9288_v9 = vld [vmem:[%s11864_s4 + $0xe80] ss:$8 sps:$4 sm:$0xff]  }
 0x513   :  { %7062 = vmatpush1.bf16.msra.mxu0 %v9257_v10  ;;  %v9293_v10 = vld [vmem:[%s11864_s4 + $0xe94] ss:$8 sps:$4 sm:$0xff]  }
 0x514   :  { %7063 = vmatprep.subr.bf16.mxu0 %v9262_v52  ;;  %v9291_v52 = vld [vmem:[%s11864_s4 + $0xe90] ss:$8 sps:$4 sm:$0xff]  }
 0x517   :  { %7064 = vmatpush1.bf16.msra.mxu0 %v9260_v46  ;;  %v9296_v46 = vld [vmem:[%s11864_s4 + $0xea4] ss:$8 sps:$4 sm:$0xff]  }
 0x518   :  { %7074 = vmatprep.subr.bf16.mxu0 %v9265_v6  ;;  %v9294_v6 = vld [vmem:[%s11864_s4 + $0xea0] ss:$8 sps:$4 sm:$0xff]  }
 0x51a   :  { %7066 = vmatmul.mubr.bf16.vlgmr.msra.gmra.mrb[12].mxu0 %v3904_v61  ;;  %v9297_v61 = vld [vmem:[%s11864_s4 + $0xeb0] ss:$8 sps:$4 sm:$0xff]  }
 0x51b   :  { %7075 = vmatpush1.bf16.msra.mxu0 %v9263_v27  ;;  %7106 = vmatprep.mubr.bf16.mxu0 %v10405_v12  ;;  %v9299_v27 = vld [vmem:[%s11864_s4 + $0xeb4] ss:$8 sps:$4 sm:$0xff]  }
 0x51c   :  { %7076 = vmatprep.subr.bf16.mxu0 %v9269_v13  ;;  %v9302_v13 = vld [vmem:[%s11864_s4 + $0xec4] ss:$8 sps:$4 sm:$0xff]   ;;  %v9323_v12 = vld [vmem:[%s11864_s4 + $0xf34] ss:$8 sps:$4 sm:$0xff]  }
 0x51f   :  { %7077 = vmatpush1.bf16.msra.mxu0 %v9267_v14  ;;  %v9300_v14 = vld [vmem:[%s11864_s4 + $0xec0] ss:$8 sps:$4 sm:$0xff]  }
 0x520   :  { %7078 = vmatprep.subr.bf16.mxu0 %v9272_v25  ;;  %v9305_v25 = vld [vmem:[%s11864_s4 + $0xed4] ss:$8 sps:$4 sm:$0xff]  }
 0x523   :  { %7079 = vmatpush1.bf16.msra.mxu0 %v9270_v28  ;;  %v9324_v28 = vld [vmem:[%s11864_s4 + $0xf40] ss:$8 sps:$4 sm:$0xff]  }
 0x524   :  { %7080 = vmatprep.subr.bf16.mxu0 %v9275_v43  ;;  %v9327_v43 = vld [vmem:[%s11864_s4 + $0xf50] ss:$8 sps:$4 sm:$0xff]  }
 0x527   :  { %7081 = vmatpush1.bf16.msra.mxu0 %v9273_v16  ;;  %v9330_v16 = vld [vmem:[%s11864_s4 + $0xf60] ss:$8 sps:$4 sm:$0xff]  }
 0x528   :  { %7082 = vmatprep.subr.bf16.mxu0 %v9278_v41  ;;  %v9336_v41 = vld [vmem:[%s11864_s4 + $0xf80] ss:$8 sps:$4 sm:$0xff]  }
 0x52b   :  { %7083 = vmatpush1.bf16.msra.mxu0 %v9276_v42  ;;  %v9342_v42 = vld [vmem:[%s11864_s4 + $0xfa0] ss:$8 sps:$4 sm:$0xff]  }
 0x52c   :  { %7084 = vmatprep.subr.bf16.mxu0 %v9281_v44  ;;  %v9348_v44 = vld [vmem:[%s11864_s4 + $0xfc0] ss:$8 sps:$4 sm:$0xff]  }
 0x52f   :  { %7085 = vmatpush1.bf16.msra.mxu0 %v9279_v49  ;;  %v9354_v49 = vld [vmem:[%s11864_s4 + $0xfe0] ss:$8 sps:$4 sm:$0xff]  }
 0x530   :  { %7086 = vmatprep.subr.bf16.mxu0 %v9284_v2  ;;  %v7170_v2 = vld [vmem:[%s11866_s6 + $0x60] sm:$0xff] }
 0x531   :  { %v8325_v54 = vpack.c.bf16 %v7171_v3, %v7170_v2 }
 0x533   :  { %7087 = vmatpush1.bf16.msra.mxu0 %v9282_v35  ;;  %v7189_v35 = vld [vmem:[%s11866_s6 + $0xf8] sm:$0xff]  ;;  %8326 = vmatpush3.bf16.msra.mxu1 %v8325_v54 }
 0x534   :  { %7088 = vmatprep.subr.bf16.mxu0 %v9287_v34  ;;  %v8327_v8 = vpack.c.bf16 %v7189_v35, %v7188_v5  ;;  %v7173_v34 = vld [vmem:[%s11866_s6 + $0x78] sm:$0xff] }
 0x536   :  { %8328 = vmatprep.subr.bf16.mxu1 %v8327_v8 }
 0x537   :  { %7089 = vmatpush1.bf16.msra.mxu0 %v9285_v48 }
 0x538   :  { %7090 = vmatprep.subr.bf16.mxu0 %v9290_v45  ;;  %v3700_v45 = vsub.s32 0, %v10060_v19 }
 0x53b   :  { %7091 = vmatpush1.bf16.msra.mxu0 %v9288_v9  ;;  %v3696_v9 = vld [vmem:[%s11865_s5] sm:$0x3] }
 0x53c   :  { %7092 = vmatprep.subr.bf16.mxu0 %v9293_v10  ;;  %v3704_v10 = vsub.s32 1, %v10060_v19  ;;  %v8044_v19 = vld [vmem:[%s11867_s7] ss:$0 sm:$0xff] }
 0x53f   :  { %7093 = vmatpush1.bf16.msra.mxu0 %v9291_v52  ;;  %v3701_v52 = vrot.slane %v3696_v9, %v3700_v45 }
 0x540   :  { %7094 = vmatprep.subr.bf16.mxu0 %v9296_v46  ;;  %v3705_v46 = vrot.slane %v3696_v9, %v3704_v10 }
 0x543   :  { %7095 = vmatpush1.bf16.msra.mxu0 %v9294_v6 }
 0x544   :  { %7096 = vmatprep.subr.bf16.mxu0 %v9299_v27 }
 0x547   :  { %7097 = vmatpush1.bf16.msra.mxu0 %v9297_v61 }
 0x548   :  { %7098 = vmatprep.subr.bf16.mxu0 %v9302_v13 }
 0x54b   :  { %7099 = vmatpush1.bf16.msra.mxu0 %v9300_v14 }
 0x54c   :  { %7100 = vmatprep.subr.bf16.mxu0 %v9305_v25 }
 0x54f   :  { %7101 = vmatpush1.bf16.msra.mxu0 %v9303_v63 }
 0x550   :  { %7102 = vmatprep.subr.bf16.mxu0 %v9308_v7 }
 0x553   :  { %7103 = vmatpush1.bf16.msra.mxu0 %v9306_v15 }
 0x554   :  { %7104 = vmatprep.subr.bf16.mxu0 %v9311_v58 }
 0x557   :  { %7105 = vmatpush1.bf16.msra.mxu0 %v9309_v38 }
 0x558   :  { %7115 = vmatprep.subr.bf16.mxu0 %v9314_v17 }
 0x55a   :  { %7107 = vmatmul.mubr.bf16.vlgmr.msra.gmra.mrb[12].mxu0 %v10399_v11  ;;  %v7172_v11 = vld [vmem:[%s11866_s6 + $0x70] sm:$0xff] }
 0x55b   :  { %7116 = vmatpush1.bf16.msra.mxu0 %v9312_v18  ;;  %7147 = vmatprep.mubr.bf16.mxu0 %v3907_v21  ;;  %v8329_v48 = vpack.c.bf16 %v7173_v34, %v7172_v11 }
 0x55c   :  { %7117 = vmatprep.subr.bf16.mxu0 %v9317_v20 }
 0x55d   :  { %8330 = vmatpush3.bf16.msra.mxu1 %v8329_v48 }
 0x55f   :  { %7118 = vmatpush1.bf16.msra.mxu0 %v9315_v47 }
 0x560   :  { %7119 = vmatprep.subr.bf16.mxu0 %v9320_v23 }
 0x563   :  { %7120 = vmatpush1.bf16.msra.mxu0 %v9318_v4 }
 0x564   :  { %7121 = vmatprep.subr.bf16.mxu0 %v9323_v12 }
 0x567   :  { %7122 = vmatpush1.bf16.msra.mxu0 %v9321_v24 }
 0x568   :  { %7123 = vmatprep.subr.bf16.mxu0 %v9326_v26 }
 0x56b   :  { %v11751_v31 = vpop.f32.mrb[16].mxu1  ;;  %7124 = vmatpush1.bf16.msra.mxu0 %v9324_v28 }
 0x56c   :  { %v11753_v32 = vpop.f32.mrb[17].mxu1  ;;  %7125 = vmatprep.subr.bf16.mxu0 %v9329_v30  ;;  %v8331_v6 = vadd.f32 %v11751_v31, %v3701_v52 }
 0x56d   :  { %v6743_v33 = vpop.f32.mrb[18].mxu1  ;;  %v8333_v27 = vadd.f32 %v11753_v32, %v3705_v46 }
 0x56e   :  { %v6744_v37 = vpop.f32.mrb[19].mxu1 }
 0x56f   :  { %7126 = vmatpush1.bf16.msra.mxu0 %v9327_v43 }
 0x570   :  { %7127 = vmatprep.subr.bf16.mxu0 %v9332_v36 }
 0x573   :  { %7128 = vmatpush1.bf16.msra.mxu0 %v9330_v16 }
 0x574   :  { %7129 = vmatprep.subr.bf16.mxu0 %v9335_v39 }
 0x577   :  { %7130 = vmatpush1.bf16.msra.mxu0 %v9333_v40 }
 0x578   :  { %7131 = vmatprep.subr.bf16.mxu0 %v9338_v22 }
 0x57b   :  { %7132 = vmatpush1.bf16.msra.mxu0 %v9336_v41 }
 0x57c   :  { %7133 = vmatprep.subr.bf16.mxu0 %v9341_v50 }
 0x57f   :  { %7134 = vmatpush1.bf16.msra.mxu0 %v9339_v51 }
 0x580   :  { %7135 = vmatprep.subr.bf16.mxu0 %v9344_v53 }
 0x583   :  { %7136 = vmatpush1.bf16.msra.mxu0 %v9342_v42 }
 0x584   :  { %7137 = vmatprep.subr.bf16.mxu0 %v9347_v55 }
 0x587   :  { %7138 = vmatpush1.bf16.msra.mxu0 %v9345_v57 }
 0x588   :  { %7139 = vmatprep.subr.bf16.mxu0 %v9350_v56 }
 0x58b   :  { %7140 = vmatpush1.bf16.msra.mxu0 %v9348_v44 }
 0x58c   :  { %7141 = vmatprep.subr.bf16.mxu0 %v9353_v60 }
 0x58f   :  { %7142 = vmatpush1.bf16.msra.mxu0 %v9351_v0 }
 0x590   :  { %7143 = vmatprep.subr.bf16.mxu0 %v9356_v1 }
 0x593   :  { %7144 = vmatpush1.bf16.msra.mxu0 %v9354_v49 }
 0x594   :  { %7145 = vmatprep.subr.bf16.mxu0 %v9359_v29 }
 0x597   :  { %7146 = vmatpush1.bf16.msra.mxu0 %v9357_v62 }
 0x59a   :  { %7148 = vmatmul.mubr.bf16.vlgmr.msra.gmra.mrb[12].mxu0 %v3905_v59 }
 0x66d   :  { %v7149_v61 = vpop.f32.mrb[12].mxu0 }
 0x66e   :  { %v8332_v13 = vadd.f32 %v8331_v6, %v7149_v61  ;;  %v7151_v14 = vpop.f32.mrb[13].mxu0 }
 0x66f   :  { %v8334_v25 = vadd.f32 %v8333_v27, %v7151_v14  ;;  %v7153_v63 = vpop.f32.mrb[14].mxu0 }
 0x670   :  { %v7154_v7 = vpop.f32.mrb[15].mxu0  ;;  %v7156_v58 = vmax.f32 %v8332_v13, 0.0 }
 0x671   :  { %v7157_v15 = vmax.f32 %v8334_v25, 0.0 }
 0x673   :  { %7261 = vmatprep.mubr.f32.mxu1 %v7157_v15 }
 0x674   :  { %7262 = vmatmul.mubr.f32.vlgmr.msra.gmra.mrb[20].mxu1 %v7156_v58 }
 0x747   :  { %v8284_v38 = vpop.f32.mrb[20].mxu1 }
 0x748   :  { %v8285_v17 = vpop.f32.mrb[21].mxu1 }
 0x749   :  { %v8286_v18 = vadd.f32 %v8285_v17, %v8284_v38 }
 0x74b   :  { %v7264_v20 = vadd.f32 %v8286_v18, %v8044_v19 }
 0x74d   :  { %7268 = vst.msk [vmem:[#allocation8] sm:$0x3] %vm7267_vm11, %v7264_v20 }
 0x74e   :  { %9371 = shalt.err (!%p9368_p4)
}
 0x74f   :  { %s9372_s23 = scalar_lea.hbm %s11870_s10, 32 }
 0x750   :  { %p9373_p5 = scmp.ne.s32.totalorder %s11870_s10, %s9372_s23  ;;  %p9376_p6 = scmp.lt.u32.totalorder %s9372_s23, %s11870_s10 }
 0x752   :  { %p9378_p7 = pnand %p9376_p6, %p9373_p5 }
 0x754   :  { %9381 = shalt.err (!%p9378_p7)
}
 0x755   :  { %7278 = dma.vmem_to_hbm [thread:$0]  %s7276_s20, 32, %s11870_s10, [#allocation9]  }
 0x756   :  { %9382 = dma.done.wait [#allocation9], 32  }
 0x757   :  { %9383 = vsyncadd [#allocation9], 4294967264 }
 0x758   :  { %7282 = vsyncpa [#allocation9], 1 }

</bundles_post_ra>
